<compile_context>
chip_gen: v5e
topology: v5e:2x2
jax: 0.10.0
libtpu: 0.0.40
codegen_flags: <defaults>
</compile_context>

<pallas_src>
import functools

import jax
import jax.numpy as jnp
from jax.experimental import pallas as pl
from jax.experimental.pallas import tpu as pltpu

H_BERT = 768    # BERT hidden size (pooler in/out, fc1 in)
H_FC1  = 512    # fc1 out
N_CLS  = 3      # number of classes (fc2 out)
N_PAD  = 128    # lane-dense padded logit width
NEG_BIG = -1e30


def _round_up(x, m):
    return (x + m - 1) // m * m


def _use_bf16_tanh():
    """bf16 EUP tanh only on v6e/v7x; keep f32 on v5e/older (no bf16 VPU/EUP)."""
    try:
        kind = jax.devices()[0].device_kind.lower()
    except Exception:
        return False
    return ("v6" in kind) or ("v7" in kind)


def bert_head_kernel(x_ref, wp_ref, bp_ref, w1_ref, b1_ref, w2_ref, b2_ref, o_ref,
                     *, bf16_tanh):
    """pooler(dense+tanh) -> fc1 -> ReLU -> (dropout=identity) -> fc2 -> LogSoftmax(dim=1)."""
    # Activations arrive in f32; cast to bf16 in-kernel for the MXU (free VPU op).
    x = x_ref[...].astype(jnp.bfloat16)                                  # [TB, 768]

    # BERT pooler: dense + tanh (produces cls_hs). bf16 into the MXU, f32 accumulate.
    p = jnp.dot(x, wp_ref[...], preferred_element_type=jnp.float32)      # [TB, 768] f32
    p = p + bp_ref[...]
    if bf16_tanh:
        pb = jnp.tanh(p.astype(jnp.bfloat16))                            # bf16 EUP path
    else:
        pb = jnp.tanh(p).astype(jnp.bfloat16)                            # f32 EUP (v5e)

    # fc1 + bias + ReLU.
    h = jnp.dot(pb, w1_ref[...], preferred_element_type=jnp.float32)     # [TB, 512] f32
    h = jnp.maximum(h + b1_ref[...], 0.0)
    # nn.Dropout(0.1): identity at inference time (no-op here).

    # fc2 into a lane-dense 128-wide padded logits block.  b2_pad already carries
    # -1e30 on pad lanes, so no iota/where mask is needed before the softmax.
    logits = jnp.dot(h.astype(jnp.bfloat16), w2_ref[...],
                     preferred_element_type=jnp.float32)                 # [TB, 128] f32
    logits = logits + b2_ref[...]

    # Numerically-stable log-softmax over dim=1 (f32).
    m = jnp.max(logits, axis=1, keepdims=True)
    z = logits - m
    lse = jnp.log(jnp.sum(jnp.exp(z), axis=1, keepdims=True))
    o_ref[...] = z - lse


def make_bert_head_params(wp, bp, w1, b1, w2, b2):
    """One-time weight preprocessing (hoisted out of the per-call path).

    wp : [768, 768] pooler dense weight ([in, out] layout)
    bp : [1, 768]
    w1 : [768, 512]  (transposed from PyTorch nn.Linear [out, in])
    b1 : [1, 512]
    w2 : [512, 3]
    b2 : [1, 3]
    """
    wp_bf = jnp.asarray(wp, jnp.bfloat16)
    w1_bf = jnp.asarray(w1, jnp.bfloat16)
    w2_pad = jnp.zeros((H_FC1, N_PAD), jnp.float32).at[:, :N_CLS].set(
        jnp.asarray(w2, jnp.float32)).astype(jnp.bfloat16)
    # Pad lanes carry -1e30 so their exp() contributes 0 to the softmax denominator.
    b2_pad = jnp.full((1, N_PAD), NEG_BIG, jnp.float32).at[:, :N_CLS].set(
        jnp.asarray(b2, jnp.float32))
    bp_f = jnp.asarray(bp, jnp.float32).reshape(1, H_BERT)
    b1_f = jnp.asarray(b1, jnp.float32).reshape(1, H_FC1)
    return (wp_bf, bp_f, w1_bf, b1_f, w2_pad, b2_pad)


def bert_head(pooled, params, *, tb_max=512):
    """Pallas wrapper.

    pooled : [B, 768] pre-pooler features (f32; cast to bf16 happens in-kernel)
    params : output of make_bert_head_params()
    returns [B, 3] log-probs (f32)
    """
    wp_bf, bp_f, w1_bf, b1_f, w2_pad, b2_pad = params
    B = pooled.shape[0]

    # Balanced batch tiling: waste <8 padded rows, and >=2 grid steps when B>=16 so
    # both v7x TensorCores get work via the "parallel" grid axis.
    B8 = _round_up(B, 8)
    n_tiles = pl.cdiv(B8, tb_max)
    if B8 >= 16:
        n_tiles = max(n_tiles, 2)
    TB = _round_up(pl.cdiv(B8, n_tiles), 8)
    n_tiles = pl.cdiv(B8, TB)
    Bp = n_tiles * TB

    x = pooled.astype(jnp.float32)
    if Bp != B:
        x = jnp.pad(x, ((0, Bp - B), (0, 0)))

    resident = lambda shp: pl.BlockSpec(shp, lambda i: (0, 0))   # weights stay VMEM-resident
    per_tile = lambda shp: pl.BlockSpec(shp, lambda i: (i, 0))   # batch-tiled tensors

    cost = pl.CostEstimate(
        flops=2 * Bp * (H_BERT * H_BERT + H_BERT * H_FC1 + H_FC1 * N_PAD),
        transcendentals=Bp * (H_BERT + N_PAD),
        bytes_accessed=(x.size * 4 + wp_bf.size * 2 + w1_bf.size * 2 + w2_pad.size * 2
                        + bp_f.size * 4 + b1_f.size * 4 + b2_pad.size * 4
                        + Bp * N_PAD * 4),
    )

    kernel = functools.partial(bert_head_kernel, bf16_tanh=_use_bf16_tanh())

    out = pl.pallas_call(
        kernel,
        out_shape=jax.ShapeDtypeStruct((Bp, N_PAD), jnp.float32),
        grid_spec=pltpu.PrefetchScalarGridSpec(
            num_scalar_prefetch=0,
            grid=(n_tiles,),
            in_specs=[
                per_tile((TB, H_BERT)),       # x       [Bp, 768]  f32
                resident((H_BERT, H_BERT)),   # wp      [768, 768] bf16
                resident((1, H_BERT)),        # bp      [1, 768]   f32
                resident((H_BERT, H_FC1)),    # w1      [768, 512] bf16
                resident((1, H_FC1)),         # b1      [1, 512]   f32
                resident((H_FC1, N_PAD)),     # w2 pad  [512, 128] bf16
                resident((1, N_PAD)),         # b2 pad  [1, 128]   f32 (-1e30 on pad lanes)
            ],
            out_specs=per_tile((TB, N_PAD)),
        ),
        compiler_params=pltpu.CompilerParams(
            dimension_semantics=("parallel",),      # shard batch tiles across TCs (v7x)
            vmem_limit_bytes=32 * 1024 * 1024,      # explicit: safe on v5e's 16 MiB default
        ),
        cost_estimate=cost,
    )(x, wp_bf, bp_f, w1_bf, b1_f, w2_pad, b2_pad)

    return out[:B, :N_CLS]


def fake_bert_encoder(sent_id, mask, emb_table):
    # TODO(synk): the pretrained BERT encoder (12 transformer layers) is an external
    # module passed into BERTArch and is not reproduced here; this deterministic
    # stand-in (embedding lookup + masked mean pool) produces the pre-pooler [B, 768]
    # features. The BERT pooler (dense + tanh) itself IS fused into the Pallas kernel.
    emb = jnp.take(emb_table, sent_id, axis=0)                          # [B, S, 768]
    m = mask.astype(jnp.float32)[..., None]                             # [B, S, 1]
    return (emb * m).sum(axis=1) / jnp.maximum(m.sum(axis=1), 1.0)      # [B, 768]


if __name__ == "__main__":
    key = jax.random.PRNGKey(0)
    B, S, V = 8, 16, 32
    k = jax.random.split(key, 9)

    # token ids and attention mask (inputs of BERTArch.forward)
    sent_id = jax.random.randint(k[0], (B, S), 0, V, dtype=jnp.int32)
    mask = (jax.random.uniform(k[1], (B, S)) > 0.2).astype(jnp.int32)

    # deterministic synthetic parameters
    emb = 0.02 * jax.random.normal(k[2], (V, H_BERT), jnp.float32)
    wp  = (1.0 / (H_BERT ** 0.5)) * jax.random.normal(k[3], (H_BERT, H_BERT), jnp.float32)
    bp  = 0.01 * jax.random.normal(k[4], (1, H_BERT), jnp.float32)
    w1  = (1.0 / (H_BERT ** 0.5)) * jax.random.normal(k[5], (H_BERT, H_FC1), jnp.float32)
    b1  = 0.01 * jax.random.normal(k[6], (1, H_FC1), jnp.float32)
    w2  = (1.0 / (H_FC1 ** 0.5)) * jax.random.normal(k[7], (H_FC1, N_CLS), jnp.float32)
    b2  = 0.01 * jax.random.normal(k[8], (1, N_CLS), jnp.float32)

    # One-time preprocessing (model init), then the fused forward.
    params = make_bert_head_params(wp, bp, w1, b1, w2, b2)
    pooled = fake_bert_encoder(sent_id, mask, emb)                      # [B, 768]
    out = bert_head(pooled, params)                                     # [B, 3] log-probs
    out = jax.block_until_ready(out)

    # Reference with matched precision path (bf16 matmul operands, f32 accumulation,
    # tanh in the same dtype the kernel uses on this chip generation).
    bf16_tanh = _use_bf16_tanh()
    xb = pooled.astype(jnp.float32).astype(jnp.bfloat16)
    p_ref = jnp.dot(xb, wp.astype(jnp.bfloat16),
                    preferred_element_type=jnp.float32) + bp
    if bf16_tanh:
        pb_ref = jnp.tanh(p_ref.astype(jnp.bfloat16))
    else:
        pb_ref = jnp.tanh(p_ref).astype(jnp.bfloat16)
    ref_h = jnp.maximum(jnp.dot(pb_ref, w1.astype(jnp.bfloat16),
                                preferred_element_type=jnp.float32) + b1, 0.0)
    ref_logits = jnp.dot(ref_h.astype(jnp.bfloat16), w2.astype(jnp.bfloat16),
                         preferred_element_type=jnp.float32) + b2
    ref = jax.nn.log_softmax(ref_logits, axis=1)

    assert out.shape == (B, N_CLS)
    # log-softmax rows must exp-sum to 1
    assert bool(jnp.allclose(jnp.exp(out).sum(axis=1), 1.0, atol=1e-4))
    # match the precision-matched reference
    assert bool(jnp.allclose(out, ref, atol=1e-2, rtol=1e-2))
    print("KERNEL_OK")
</pallas_src>

<mosaic_0001>
module attributes {stable_mosaic.version = 11 : i64} {
  func.func @bert_head_kernel(%arg0: i32, %arg1: memref<8x768xf32, #tpu.memory_space<vmem>>, %arg2: memref<768x768xbf16, #tpu.memory_space<vmem>>, %arg3: memref<1x768xf32, #tpu.memory_space<vmem>>, %arg4: memref<768x512xbf16, #tpu.memory_space<vmem>>, %arg5: memref<1x512xf32, #tpu.memory_space<vmem>>, %arg6: memref<512x128xbf16, #tpu.memory_space<vmem>>, %arg7: memref<1x128xf32, #tpu.memory_space<vmem>>, %arg8: memref<8x128xf32, #tpu.memory_space<vmem>>) attributes {dimension_semantics = [#tpu.dimension_semantics<parallel>], iteration_bounds = array<i64: 1>, scalar_prefetch = 0 : i64, scratch_operands = 0 : i64, tpu.core_type = #tpu.core_type<tc>, window_params = [{transform_indices = @transform_0, window_bounds = array<i64: 8, 768>}, {pipeline_mode = #tpu.pipeline_mode<synchronous>, transform_indices = @transform_1, window_bounds = array<i64: 768, 768>}, {pipeline_mode = #tpu.pipeline_mode<synchronous>, transform_indices = @transform_2, window_bounds = array<i64: 1, 768>}, {pipeline_mode = #tpu.pipeline_mode<synchronous>, transform_indices = @transform_3, window_bounds = array<i64: 768, 512>}, {pipeline_mode = #tpu.pipeline_mode<synchronous>, transform_indices = @transform_4, window_bounds = array<i64: 1, 512>}, {pipeline_mode = #tpu.pipeline_mode<synchronous>, transform_indices = @transform_5, window_bounds = array<i64: 512, 128>}, {pipeline_mode = #tpu.pipeline_mode<synchronous>, transform_indices = @transform_6, window_bounds = array<i64: 1, 128>}, {transform_indices = @transform_7, window_bounds = array<i64: 8, 128>}]} {
    %c0 = arith.constant 0 : index
    %c0_0 = arith.constant 0 : index
    %0 = vector.load %arg1[%c0, %c0_0] : memref<8x768xf32, #tpu.memory_space<vmem>>, vector<8x768xf32>
    %1 = arith.truncf %0 : vector<8x768xf32> to vector<8x768xbf16>
    %c0_1 = arith.constant 0 : index
    %c0_2 = arith.constant 0 : index
    %2 = vector.load %arg2[%c0_1, %c0_2] : memref<768x768xbf16, #tpu.memory_space<vmem>>, vector<768x768xbf16>
    %cst = arith.constant dense<0.000000e+00> : vector<8x768xf32>
    %3 = tpu.matmul %1, %2, %cst {dimension_numbers = #tpu.dot_dimension_numbers<[1], [0], [0], [1], [0, 0, 1, 1], [], []>} : vector<8x768xbf16>, vector<768x768xbf16>, vector<8x768xf32> -> vector<8x768xf32>
    %c0_3 = arith.constant 0 : index
    %c0_4 = arith.constant 0 : index
    %4 = vector.load %arg3[%c0_3, %c0_4] : memref<1x768xf32, #tpu.memory_space<vmem>>, vector<1x768xf32>
    %5 = vector.broadcast %4 : vector<1x768xf32> to vector<8x768xf32>
    %6 = arith.addf %3, %5 : vector<8x768xf32>
    %7 = math.tanh %6 : vector<8x768xf32>
    %8 = arith.truncf %7 : vector<8x768xf32> to vector<8x768xbf16>
    %c0_5 = arith.constant 0 : index
    %c0_6 = arith.constant 0 : index
    %9 = vector.load %arg4[%c0_5, %c0_6] : memref<768x512xbf16, #tpu.memory_space<vmem>>, vector<768x512xbf16>
    %cst_7 = arith.constant dense<0.000000e+00> : vector<8x512xf32>
    %10 = tpu.matmul %8, %9, %cst_7 {dimension_numbers = #tpu.dot_dimension_numbers<[1], [0], [0], [1], [0, 0, 1, 1], [], []>} : vector<8x768xbf16>, vector<768x512xbf16>, vector<8x512xf32> -> vector<8x512xf32>
    %c0_8 = arith.constant 0 : index
    %c0_9 = arith.constant 0 : index
    %11 = vector.load %arg5[%c0_8, %c0_9] : memref<1x512xf32, #tpu.memory_space<vmem>>, vector<1x512xf32>
    %12 = vector.broadcast %11 : vector<1x512xf32> to vector<8x512xf32>
    %13 = arith.addf %10, %12 : vector<8x512xf32>
    %cst_10 = arith.constant 0.000000e+00 : f32
    %14 = vector.broadcast %cst_10 : f32 to vector<8x512xf32>
    %15 = arith.maximumf %13, %14 : vector<8x512xf32>
    %16 = arith.truncf %15 : vector<8x512xf32> to vector<8x512xbf16>
    %c0_11 = arith.constant 0 : index
    %c0_12 = arith.constant 0 : index
    %17 = vector.load %arg6[%c0_11, %c0_12] : memref<512x128xbf16, #tpu.memory_space<vmem>>, vector<512x128xbf16>
    %cst_13 = arith.constant dense<0.000000e+00> : vector<8x128xf32>
    %18 = tpu.matmul %16, %17, %cst_13 {dimension_numbers = #tpu.dot_dimension_numbers<[1], [0], [0], [1], [0, 0, 1, 1], [], []>} : vector<8x512xbf16>, vector<512x128xbf16>, vector<8x128xf32> -> vector<8x128xf32>
    %c0_14 = arith.constant 0 : index
    %c0_15 = arith.constant 0 : index
    %19 = vector.load %arg7[%c0_14, %c0_15] : memref<1x128xf32, #tpu.memory_space<vmem>>, vector<1x128xf32>
    %20 = vector.broadcast %19 : vector<1x128xf32> to vector<8x128xf32>
    %21 = arith.addf %18, %20 : vector<8x128xf32>
    %cst_16 = arith.constant dense<0xFF800000> : vector<8xf32>
    %22 = vector.multi_reduction <maximumf>, %21, %cst_16 [1] : vector<8x128xf32> to vector<8xf32>
    %23 = vector.shape_cast %22 : vector<8xf32> to vector<8x1xf32>
    %24 = vector.broadcast %23 : vector<8x1xf32> to vector<8x128xf32>
    %25 = arith.subf %21, %24 : vector<8x128xf32>
    %26 = math.exp %25 : vector<8x128xf32>
    %cst_17 = arith.constant dense<0.000000e+00> : vector<8xf32>
    %27 = vector.multi_reduction <add>, %26, %cst_17 [1] : vector<8x128xf32> to vector<8xf32>
    %28 = vector.shape_cast %27 : vector<8xf32> to vector<8x1xf32>
    %29 = math.log %28 : vector<8x1xf32>
    %30 = vector.broadcast %29 : vector<8x1xf32> to vector<8x128xf32>
    %31 = arith.subf %25, %30 : vector<8x128xf32>
    %c0_18 = arith.constant 0 : index
    %c0_19 = arith.constant 0 : index
    %32 = vector.load %arg8[%c0_18, %c0_19] : memref<8x128xf32, #tpu.memory_space<vmem>>, vector<8x128xf32>
    tpu.vector_store %arg8[%c0_18, %c0_19], %31 {strides = array<i32>} : memref<8x128xf32, #tpu.memory_space<vmem>>, vector<8x128xf32>,
    return
  }
  func.func @transform_0(%arg0: i32) -> (i32, i32) {
    %c0_i32 = arith.constant 0 : i32
    %c0_i32_0 = arith.constant 0 : i32
    return %arg0, %c0_i32 : i32, i32
  }
  func.func @transform_1(%arg0: i32) -> (i32, i32) {
    %c0_i32 = arith.constant 0 : i32
    %c0_i32_0 = arith.constant 0 : i32
    %c0_i32_1 = arith.constant 0 : i32
    return %c0_i32, %c0_i32_0 : i32, i32
  }
  func.func @transform_2(%arg0: i32) -> (i32, i32) {
    %c0_i32 = arith.constant 0 : i32
    %c0_i32_0 = arith.constant 0 : i32
    %c0_i32_1 = arith.constant 0 : i32
    return %c0_i32, %c0_i32_0 : i32, i32
  }
  func.func @transform_3(%arg0: i32) -> (i32, i32) {
    %c0_i32 = arith.constant 0 : i32
    %c0_i32_0 = arith.constant 0 : i32
    %c0_i32_1 = arith.constant 0 : i32
    return %c0_i32, %c0_i32_0 : i32, i32
  }
  func.func @transform_4(%arg0: i32) -> (i32, i32) {
    %c0_i32 = arith.constant 0 : i32
    %c0_i32_0 = arith.constant 0 : i32
    %c0_i32_1 = arith.constant 0 : i32
    return %c0_i32, %c0_i32_0 : i32, i32
  }
  func.func @transform_5(%arg0: i32) -> (i32, i32) {
    %c0_i32 = arith.constant 0 : i32
    %c0_i32_0 = arith.constant 0 : i32
    %c0_i32_1 = arith.constant 0 : i32
    return %c0_i32, %c0_i32_0 : i32, i32
  }
  func.func @transform_6(%arg0: i32) -> (i32, i32) {
    %c0_i32 = arith.constant 0 : i32
    %c0_i32_0 = arith.constant 0 : i32
    %c0_i32_1 = arith.constant 0 : i32
    return %c0_i32, %c0_i32_0 : i32, i32
  }
  func.func @transform_7(%arg0: i32) -> (i32, i32) {
    %c0_i32 = arith.constant 0 : i32
    %c0_i32_0 = arith.constant 0 : i32
    return %arg0, %c0_i32 : i32, i32
  }
}

</mosaic_0001>

<bundles_post_ra>
// kernel: tpu_custom_call.1
= control target key start
LH: loop header
LB: loop body
LE: loop exit
PB: predicated region body
PF: predicated region fallthrough
CT: control target
= control target key end

     0   :  { %12 = vsyncpa [#allocation3], 0  ;;  %s7222_s0 = inlined_call_operand.hbm [shape: f32[8,768], index: 0, kind: input, shape index: {}]   ;;  %s7223_s1 = inlined_call_operand.hbm [shape: bf16[768,768], index: 1, kind: input, shape index: {}]   ;;  %s7224_s2 = inlined_call_operand.hbm [shape: f32[1,768], index: 2, kind: input, shape index: {}]   ;;  %s7225_s3 = inlined_call_operand.hbm [shape: bf16[768,512], index: 3, kind: input, shape index: {}]   ;;  %s7226_s4 = inlined_call_operand.hbm [shape: f32[1,512], index: 4, kind: input, shape index: {}]   ;;  %s7227_s5 = inlined_call_operand.hbm [shape: bf16[512,128], index: 5, kind: input, shape index: {}]   ;;  %s7228_s6 = inlined_call_operand.hbm [shape: f32[1,128], index: 6, kind: input, shape index: {}]   ;;  %s7229_s7 = inlined_call_operand.hbm [shape: f32[8,128], index: 7, kind: output, shape index: {}]  }
   0x1   :  { %13 = vsyncpa [#allocation6], 0 }
   0x2   :  { %14 = vsyncpa [#allocation9], 0 }
   0x3   :  { %15 = vsyncpa [#allocation12], 0  ;;  %s32_s26 = sshll.u32 %s7223_s1, 4  ;;  %s33_s26 = int_to_ptr.hbm [resolvable:$true] %s32_s26 }
   0x4   :  { %16 = vsyncpa [#allocation4], 0  ;;  %s6981_s27 = smov [#allocation5]   ;;  %s56_s8 = sshll.u32 %s7225_s3, 4  ;;  %s57_s8 = int_to_ptr.hbm [resolvable:$true] %s56_s8 }
   0x5   :  { %s34_s28 = sshll.u32 %s6981_s27, 4  ;;  %s6982_s9 = smov 384   ;;  %s35_s28 = int_to_ptr.vmem [resolvable:$true] %s34_s28 }
   0x6   :  { %s6983_s10 = smov 24   ;;  %s6984_s11 = smov [#allocation8]  }
   0x7   :  { %40 = dma.hbm_to_vmem [thread:$0]  %s33_s26, 36864, %s35_s28, [#allocation6], %s6982_s9, %s6982_s9, %s6983_s10  }
   0x8   :  { %s58_s12 = sshll.u32 %s6984_s11, 4  ;;  %s6985_s13 = smov 256   ;;  %s59_s12 = int_to_ptr.vmem [resolvable:$true] %s58_s12 }
   0x9   :  { %s6986_s14 = smov 16   ;;  %s80_s16 = sshll.u32 %s7227_s5, 4  ;;  %s81_s16 = int_to_ptr.hbm [resolvable:$true] %s80_s16 }
   0xa   :  { %64 = dma.hbm_to_vmem [thread:$0]  %s57_s8, 24576, %s59_s12, [#allocation9], %s6985_s13, %s6985_s13, %s6986_s14  }
   0xb   :  { %s6987_s17 = smov [#allocation11]   ;;  %s22_s20 = sshll.u32 %s7222_s0, 4  ;;  %s23_s20 = int_to_ptr.hbm [resolvable:$true] %s22_s20 }
   0xc   :  { %s82_s18 = sshll.u32 %s6987_s17, 4  ;;  %s6988_s21 = smov 64   ;;  %s83_s18 = int_to_ptr.vmem [resolvable:$true] %s82_s18 }
   0xd   :  { %s6989_s22 = smov 4   ;;  %s6990_s23 = smov [#allocation2]  }
   0xe   :  { %88 = dma.hbm_to_vmem [thread:$0]  %s81_s16, 4096, %s83_s18, [#allocation12], %s6988_s21, %s6988_s21, %s6989_s22  }
   0xf   :  { %s24_s24 = sshll.u32 %s6990_s23, 4  ;;  %s46_s27 = sshll.u32 %s7224_s2, 4  ;;  %s25_s24 = int_to_ptr.vmem [resolvable:$true] %s24_s24  ;;  %s47_s27 = int_to_ptr.hbm [resolvable:$true] %s46_s27 }
  0x10   :  { %27 = dma.hbm_to_vmem [thread:$0]  %s23_s20, 768, %s25_s24, [#allocation3]  }
  0x11   :  { %s70_s29 = sshll.u32 %s7226_s4, 4  ;;  %s6991_s30 = smov [#allocation7]   ;;  %s71_s29 = int_to_ptr.hbm [resolvable:$true] %s70_s29 }
  0x12   :  { %s48_s8 = sshll.u32 %s6991_s30, 4  ;;  %s6992_s0 = smov [#allocation10]   ;;  %s49_s8 = int_to_ptr.vmem [resolvable:$true] %s48_s8 }
  0x13   :  { %51 = dma.hbm_to_vmem [thread:$0]  %s47_s27, 96, %s49_s8, [#allocation6]  }
  0x14   :  { %s72_s9 = sshll.u32 %s6992_s0, 4  ;;  %s94_s12 = sshll.u32 %s7228_s6, 4  ;;  %s73_s9 = int_to_ptr.vmem [resolvable:$true] %s72_s9  ;;  %s95_s12 = int_to_ptr.hbm [resolvable:$true] %s94_s12 }
  0x15   :  { %75 = dma.hbm_to_vmem [thread:$0]  %s71_s29, 64, %s73_s9, [#allocation9]  }
  0x16   :  { %s6993_s2 = smov [#allocation13]  }
  0x17   :  { %s96_s13 = sshll.u32 %s6993_s2, 4  ;;  %s97_s13 = int_to_ptr.vmem [resolvable:$true] %s96_s13 }
  0x18   :  { %99 = dma.hbm_to_vmem [thread:$0]  %s95_s12, 16, %s97_s13, [#allocation12]  }
  0x19   :  { %6971 = dma.done.wait [#allocation3], 768  }
  0x1a   :  { %6972 = vsyncadd [#allocation3], 4294966528 }
  0x1b   :  { %6973 = dma.done.wait [#allocation6], 36960  }
  0x1c   :  { %6974 = vsyncadd [#allocation6], 4294930336 }
  0x1d   :  { %6975 = dma.done.wait [#allocation9], 24640  }
  0x1e   :  { %6976 = vsyncadd [#allocation9], 4294942656 }
  0x1f   :  { %6977 = dma.done.wait [#allocation12], 4112  }
  0x20   :  { %6978 = vsyncadd [#allocation12], 4294963184  ;;  %v4357_v0 = vld [vmem:[#allocation5 + $0x150] sm:$0xf]  ;;  %v6280_v1 = vld [vmem:[#allocation5 + $0x164] sm:$0xf0] }
  0x21   :  { %v4549_v2 = vld [vmem:[#allocation5 + $0x2d0] sm:$0xf]  ;;  %v4358_v3 = vor.u32 %v6280_v1, %v4357_v0  ;;  %v6328_v4 = vld [vmem:[#allocation5 + $0x2e4] sm:$0xf0]  ;;  %v4333_v11 = vld [vmem:[#allocation5 + $0x120] sm:$0xf] }
  0x22   :  { %v4741_v5 = vld [vmem:[#allocation5 + $0x450] sm:$0xf]  ;;  %v6376_v6 = vld [vmem:[#allocation5 + $0x464] sm:$0xf0]  ;;  %v4550_v7 = vor.u32 %v6328_v4, %v4549_v2  ;;  %v6274_v13 = vld [vmem:[#allocation5 + $0x134] sm:$0xf0] }
  0x23   :  { %v4742_v8 = vor.u32 %v6376_v6, %v4741_v5  ;;  %v4933_v9 = vld [vmem:[#allocation5 + $0x5d0] sm:$0xf]  ;;  %v6424_v10 = vld [vmem:[#allocation5 + $0x5e4] sm:$0xf0]  ;;  %1882 = vmatpush.bf16.msra.mxu0 %v4358_v3  ;;  %v4525_v14 = vld [vmem:[#allocation5 + $0x2a0] sm:$0xf]  ;;  %v4334_v16 = vor.u32 %v6274_v13, %v4333_v11 }
  0x24   :  { %v4934_v12 = vor.u32 %v6424_v10, %v4933_v9  ;;  %v6322_v15 = vld [vmem:[#allocation5 + $0x2b4] sm:$0xf0]  ;;  %1895 = vmatpush.bf16.msra.mxu1 %v4550_v7  ;;  %v4717_v18 = vld [vmem:[#allocation5 + $0x420] sm:$0xf]  ;;  %v4309_v23 = vld [vmem:[#allocation5 + $0xf0] sm:$0xf] }
  0x25   :  { %1908 = vmatpush.bf16.msra.mxu2 %v4742_v8  ;;  %v4526_v17 = vor.u32 %v6322_v15, %v4525_v14  ;;  %v6370_v19 = vld [vmem:[#allocation5 + $0x434] sm:$0xf0]  ;;  %v4909_v20 = vld [vmem:[#allocation5 + $0x5a0] sm:$0xf]  ;;  %v6268_v24 = vld [vmem:[#allocation5 + $0x104] sm:$0xf0] }
  0x26   :  { %1921 = vmatpush.bf16.msra.mxu3 %v4934_v12  ;;  %v4718_v21 = vor.u32 %v6370_v19, %v4717_v18  ;;  %v6418_v22 = vld [vmem:[#allocation5 + $0x5b4] sm:$0xf0]  ;;  %v4501_v26 = vld [vmem:[#allocation5 + $0x270] sm:$0xf]  ;;  %v6316_v27 = vld [vmem:[#allocation5 + $0x284] sm:$0xf0]  ;;  %v4310_v29 = vor.u32 %v6268_v24, %v4309_v23 }
  0x27   :  { %v4910_v25 = vor.u32 %v6418_v22, %v4909_v20  ;;  %v4693_v28 = vld [vmem:[#allocation5 + $0x3f0] sm:$0xf]  ;;  %1883 = vmatpush.bf16.msra.mxu0 %v4334_v16  ;;  %v6364_v30 = vld [vmem:[#allocation5 + $0x404] sm:$0xf0]  ;;  %v4502_v33 = vor.u32 %v6316_v27, %v4501_v26  ;;  %v4285_v35 = vld [vmem:[#allocation5 + $0xc0] sm:$0xf] }
  0x28   :  { %v4885_v31 = vld [vmem:[#allocation5 + $0x570] sm:$0xf]  ;;  %v6412_v32 = vld [vmem:[#allocation5 + $0x584] sm:$0xf0]  ;;  %1896 = vmatpush.bf16.msra.mxu1 %v4526_v17  ;;  %v4694_v34 = vor.u32 %v6364_v30, %v4693_v28  ;;  %v6262_v36 = vld [vmem:[#allocation5 + $0xd4] sm:$0xf0] }
  0x29   :  { %1909 = vmatpush.bf16.msra.mxu2 %v4718_v21  ;;  %v4477_v37 = vld [vmem:[#allocation5 + $0x240] sm:$0xf]  ;;  %v4886_v38 = vor.u32 %v6412_v32, %v4885_v31  ;;  %v6310_v39 = vld [vmem:[#allocation5 + $0x254] sm:$0xf0]  ;;  %v4286_v44 = vor.u32 %v6262_v36, %v4285_v35  ;;  %v4261_v47 = vld [vmem:[#allocation5 + $0x90] sm:$0xf] }
  0x2a   :  { %1922 = vmatpush.bf16.msra.mxu3 %v4910_v25  ;;  %v4669_v40 = vld [vmem:[#allocation5 + $0x3c0] sm:$0xf]  ;;  %v6358_v41 = vld [vmem:[#allocation5 + $0x3d4] sm:$0xf0]  ;;  %v4478_v45 = vor.u32 %v6310_v39, %v4477_v37  ;;  %v6256_v48 = vld [vmem:[#allocation5 + $0xa4] sm:$0xf0] }
  0x2b   :  { %v4861_v42 = vld [vmem:[#allocation5 + $0x540] sm:$0xf]  ;;  %v6406_v43 = vld [vmem:[#allocation5 + $0x554] sm:$0xf0]  ;;  %1884 = vmatpush.bf16.msra.mxu0 %v4310_v29  ;;  %v4670_v46 = vor.u32 %v6358_v41, %v4669_v40  ;;  %v4453_v49 = vld [vmem:[#allocation5 + $0x210] sm:$0xf]  ;;  %v4262_v56 = vor.u32 %v6256_v48, %v4261_v47 }
  0x2c   :  { %1897 = vmatpush.bf16.msra.mxu1 %v4502_v33  ;;  %v4862_v50 = vor.u32 %v6406_v43, %v4861_v42  ;;  %v6304_v51 = vld [vmem:[#allocation5 + $0x224] sm:$0xf0]  ;;  %v4645_v52 = vld [vmem:[#allocation5 + $0x390] sm:$0xf]  ;;  %v4237_v59 = vld [vmem:[#allocation5 + $0x60] sm:$0xf] }
  0x2d   :  { %1910 = vmatpush.bf16.msra.mxu2 %v4694_v34  ;;  %v6352_v53 = vld [vmem:[#allocation5 + $0x3a4] sm:$0xf0]  ;;  %v4837_v54 = vld [vmem:[#allocation5 + $0x510] sm:$0xf]  ;;  %v4454_v57 = vor.u32 %v6304_v51, %v4453_v49  ;;  %v6250_v60 = vld [vmem:[#allocation5 + $0x74] sm:$0xf0] }
  0x2e   :  { %1923 = vmatpush.bf16.msra.mxu3 %v4886_v38  ;;  %v6400_v55 = vld [vmem:[#allocation5 + $0x524] sm:$0xf0]  ;;  %v4646_v58 = vor.u32 %v6352_v53, %v4645_v52  ;;  %v4429_v61 = vld [vmem:[#allocation5 + $0x1e0] sm:$0xf]  ;;  %v6298_v63 = vld [vmem:[#allocation5 + $0x1f4] sm:$0xf0]  ;;  %v4238_v4 = vor.u32 %v6250_v60, %v4237_v59 }
  0x2f   :  { %1885 = vmatpush.bf16.msra.mxu0 %v4286_v44  ;;  %v4838_v62 = vor.u32 %v6400_v55, %v4837_v54  ;;  %v4621_v0 = vld [vmem:[#allocation5 + $0x360] sm:$0xf]  ;;  %v6346_v1 = vld [vmem:[#allocation5 + $0x374] sm:$0xf0]  ;;  %v4430_v5 = vor.u32 %v6298_v63, %v4429_v61  ;;  %v4213_v7 = vld [vmem:[#allocation5 + $0x30] sm:$0xf] }
  0x30   :  { %1898 = vmatpush.bf16.msra.mxu1 %v4478_v45  ;;  %v4813_v2 = vld [vmem:[#allocation5 + $0x4e0] sm:$0xf]  ;;  %v6394_v3 = vld [vmem:[#allocation5 + $0x4f4] sm:$0xf0]  ;;  %v4622_v6 = vor.u32 %v6346_v1, %v4621_v0  ;;  %v6244_v8 = vld [vmem:[#allocation5 + $0x44] sm:$0xf0] }
  0x31   :  { %1911 = vmatpush.bf16.msra.mxu2 %v4670_v46  ;;  %v4405_v9 = vld [vmem:[#allocation5 + $0x1b0] sm:$0xf]  ;;  %v4814_v10 = vor.u32 %v6394_v3, %v4813_v2  ;;  %v6292_v11 = vld [vmem:[#allocation5 + $0x1c4] sm:$0xf0]  ;;  %v4214_v16 = vor.u32 %v6244_v8, %v4213_v7  ;;  %v4189_v17 = vld [vmem:[#allocation5] sm:$0xf] }
  0x32   :  { %1924 = vmatpush.bf16.msra.mxu3 %v4862_v50  ;;  %v4597_v12 = vld [vmem:[#allocation5 + $0x330] sm:$0xf]  ;;  %v6340_v13 = vld [vmem:[#allocation5 + $0x344] sm:$0xf0]  ;;  %v6238_v18 = vld [vmem:[#allocation5 + $0x14] sm:$0xf0]  ;;  %v4406_v19 = vor.u32 %v6292_v11, %v4405_v9 }
  0x33   :  { %1886 = vmatpush.bf16.msra.mxu0 %v4262_v56  ;;  %v4789_v14 = vld [vmem:[#allocation5 + $0x4b0] sm:$0xf]  ;;  %v6388_v15 = vld [vmem:[#allocation5 + $0x4c4] sm:$0xf0]  ;;  %v4598_v20 = vor.u32 %v6340_v13, %v4597_v12  ;;  %v4381_v21 = vld [vmem:[#allocation5 + $0x180] sm:$0xf]  ;;  %v4190_v31 = vor.u32 %v6238_v18, %v4189_v17 }
  0x34   :  { %1899 = vmatpush.bf16.msra.mxu1 %v4454_v57  ;;  %v6286_v22 = vld [vmem:[#allocation5 + $0x194] sm:$0xf0]  ;;  %v4573_v23 = vld [vmem:[#allocation5 + $0x300] sm:$0xf]  ;;  %v4790_v24 = vor.u32 %v6388_v15, %v4789_v14  ;;  %v5125_v28 = vld [vmem:[#allocation5 + $0x750] sm:$0xf] }
  0x35   :  { %1912 = vmatpush.bf16.msra.mxu2 %v4646_v58  ;;  %v6334_v25 = vld [vmem:[#allocation5 + $0x314] sm:$0xf0]  ;;  %v4765_v26 = vld [vmem:[#allocation5 + $0x480] sm:$0xf]  ;;  %v6472_v29 = vld [vmem:[#allocation5 + $0x764] sm:$0xf0]  ;;  %v4382_v35 = vor.u32 %v6286_v22, %v4381_v21 }
  0x36   :  { %1925 = vmatpush.bf16.msra.mxu3 %v4838_v62  ;;  %v6382_v27 = vld [vmem:[#allocation5 + $0x494] sm:$0xf0]  ;;  %v5317_v30 = vld [vmem:[#allocation5 + $0x8d0] sm:$0xf]  ;;  %v6520_v32 = vld [vmem:[#allocation5 + $0x8e4] sm:$0xf0]  ;;  %v4574_v36 = vor.u32 %v6334_v25, %v4573_v23  ;;  %v5126_v40 = vor.u32 %v6472_v29, %v5125_v28 }
  0x37   :  { %1887 = vmatpush.bf16.msra.mxu0 %v4238_v4  ;;  %v6277_v33 = vld [vmem:[#allocation5 + $0x154] sm:$0xf]  ;;  %v4359_v34 = vld [vmem:[#allocation5 + $0x168] sm:$0xf0]  ;;  %v4766_v39 = vor.u32 %v6382_v27, %v4765_v26  ;;  %v5318_v41 = vor.u32 %v6520_v32, %v5317_v30  ;;  %v5101_v43 = vld [vmem:[#allocation5 + $0x720] sm:$0xf] }
  0x38   :  { %1900 = vmatpush.bf16.msra.mxu1 %v4430_v5  ;;  %v6325_v37 = vld [vmem:[#allocation5 + $0x2d4] sm:$0xf]  ;;  %v4551_v38 = vld [vmem:[#allocation5 + $0x2e8] sm:$0xf0]  ;;  %v4362_v42 = vor.u32 %v6277_v33, %v4359_v34  ;;  %v6466_v44 = vld [vmem:[#allocation5 + $0x734] sm:$0xf0] }
  0x39   :  { %1913 = vmatpush.bf16.msra.mxu2 %v4622_v6  ;;  %v5293_v45 = vld [vmem:[#allocation5 + $0x8a0] sm:$0xf]  ;;  %v4554_v46 = vor.u32 %v6325_v37, %v4551_v38  ;;  %v6514_v47 = vld [vmem:[#allocation5 + $0x8b4] sm:$0xf0]  ;;  %v6271_v48 = vld [vmem:[#allocation5 + $0x124] sm:$0xf]  ;;  %v5102_v52 = vor.u32 %v6466_v44, %v5101_v43 }
  0x3a   :  { %1926 = vmatpush.bf16.msra.mxu3 %v4814_v10  ;;  %v4335_v49 = vld [vmem:[#allocation5 + $0x138] sm:$0xf0]  ;;  %v6319_v50 = vld [vmem:[#allocation5 + $0x2a4] sm:$0xf]  ;;  %v5077_v53 = vld [vmem:[#allocation5 + $0x6f0] sm:$0xf]  ;;  %v5294_v54 = vor.u32 %v6514_v47, %v5293_v45 }
  0x3b   :  { %1888 = vmatpush.bf16.msra.mxu0 %v4214_v16  ;;  %v4527_v51 = vld [vmem:[#allocation5 + $0x2b8] sm:$0xf0]  ;;  %v4338_v55 = vor.u32 %v6271_v48, %v4335_v49  ;;  %v6460_v56 = vld [vmem:[#allocation5 + $0x704] sm:$0xf0]  ;;  %v5269_v57 = vld [vmem:[#allocation5 + $0x870] sm:$0xf] }
  0x3c   :  { %1901 = vmatpush.bf16.msra.mxu1 %v4406_v19  ;;  %v6508_v58 = vld [vmem:[#allocation5 + $0x884] sm:$0xf0]  ;;  %v4530_v59 = vor.u32 %v6319_v50, %v4527_v51  ;;  %v6265_v60 = vld [vmem:[#allocation5 + $0xf4] sm:$0xf]  ;;  %v4311_v61 = vld [vmem:[#allocation5 + $0x108] sm:$0xf0]  ;;  %v5078_v0 = vor.u32 %v6460_v56, %v5077_v53 }
  0x3d   :  { %1914 = vmatpush.bf16.msra.mxu2 %v4598_v20  ;;  %v6313_v62 = vld [vmem:[#allocation5 + $0x274] sm:$0xf]  ;;  %v4503_v63 = vld [vmem:[#allocation5 + $0x288] sm:$0xf0]  ;;  %v5270_v1 = vor.u32 %v6508_v58, %v5269_v57  ;;  %v5053_v2 = vld [vmem:[#allocation5 + $0x6c0] sm:$0xf]  ;;  %v4314_v5 = vor.u32 %v6265_v60, %v4311_v61 }
  0x3e   :  { %1927 = vmatpush.bf16.msra.mxu3 %v4790_v24  ;;  %v130_v3 = vld [vmem:[#allocation2 + $0x10] sm:$0xff]  ;;  %v128_v4 = vld [vmem:[#allocation2] sm:$0xff]  ;;  %v6454_v6 = vld [vmem:[#allocation5 + $0x6d4] sm:$0xf0]  ;;  %v4506_v11 = vor.u32 %v6313_v62, %v4503_v63  ;;  %s6994_s4 = smov [#allocation14]   ;;  %s4174_s15 = sshll.u32 %s7229_s7, 4  ;;  %s4175_s15 = int_to_ptr.hbm [resolvable:$true] %s4174_s15 }
  0x3f   :  { %1889 = vmatpush.bf16.msra.mxu0 %v4190_v31  ;;  %v5245_v7 = vld [vmem:[#allocation5 + $0x840] sm:$0xf]  ;;  %v7056_v8 = vpack.c.bf16 %v130_v3, %v130_v3  ;;  %v7058_v9 = vpack.c.bf16 %v128_v4, %v128_v4  ;;  %v131_v10 = vld [vmem:[#allocation2 + $0x18] sm:$0xff]  ;;  %v6502_v12 = vld [vmem:[#allocation5 + $0x854] sm:$0xf0]  ;;  %v5054_v18 = vor.u32 %v6454_v6, %v5053_v2  ;;  %s4172_s6 = sshll.u32 %s6994_s4, 4  ;;  %s4173_s6 = int_to_ptr.vmem [resolvable:$true] %s4172_s6 }
  0x40   :  { %1902 = vmatpush.bf16.msra.mxu1 %v4382_v35  ;;  %v6259_v13 = vld [vmem:[#allocation5 + $0xc4] sm:$0xf]  ;;  %v4287_v14 = vld [vmem:[#allocation5 + $0xd8] sm:$0xf0]  ;;  %v7060_v15 = vpack.c.bf16 %v131_v10, %v131_v10  ;;  %v5246_v20 = vor.u32 %v6502_v12, %v5245_v7  ;;  %v5029_v22 = vld [vmem:[#allocation5 + $0x690] sm:$0xf] }
  0x41   :  { %1915 = vmatpush.bf16.msra.mxu2 %v4574_v36  ;;  %v6307_v16 = vld [vmem:[#allocation5 + $0x244] sm:$0xf]  ;;  %v4479_v17 = vld [vmem:[#allocation5 + $0x258] sm:$0xf0]  ;;  %v4290_v21 = vor.u32 %v6259_v13, %v4287_v14  ;;  %v6448_v23 = vld [vmem:[#allocation5 + $0x6a4] sm:$0xf0] }
  0x42   :  { %1928 = vmatpush.bf16.msra.mxu3 %v4766_v39  ;;  %1890 = vmatmul.bf16.vlgmr.msra.gmra.mxu0 %v7058_v9  ;;  %v129_v19 = vld [vmem:[#allocation2 + $0x8] sm:$0xff]  ;;  %v5221_v24 = vld [vmem:[#allocation5 + $0x810] sm:$0xf]  ;;  %v4482_v26 = vor.u32 %v6307_v16, %v4479_v17  ;;  %v6496_v27 = vld [vmem:[#allocation5 + $0x824] sm:$0xf0]  ;;  %v5030_v32 = vor.u32 %v6448_v23, %v5029_v22 }
  0x43   :  { %1934 = vmatpush.bf16.msrb.mxu0 %v5126_v40  ;;  %v7065_v25 = vpack.c.bf16 %v129_v19, %v129_v19  ;;  %v6253_v28 = vld [vmem:[#allocation5 + $0x94] sm:$0xf]  ;;  %v4263_v29 = vld [vmem:[#allocation5 + $0xa8] sm:$0xf0]  ;;  %v5222_v33 = vor.u32 %v6496_v27, %v5221_v24  ;;  %v5005_v35 = vld [vmem:[#allocation5 + $0x660] sm:$0xf] }
  0x44   :  { %1947 = vmatpush.bf16.msrb.mxu1 %v5318_v41  ;;  %1916 = vmatmul.bf16.vlgmr.msra.gmra.mxu2 %v7056_v8  ;;  %v6301_v30 = vld [vmem:[#allocation5 + $0x214] sm:$0xf]  ;;  %v4455_v31 = vld [vmem:[#allocation5 + $0x228] sm:$0xf0]  ;;  %v4266_v34 = vor.u32 %v6253_v28, %v4263_v29  ;;  %v6442_v36 = vld [vmem:[#allocation5 + $0x674] sm:$0xf0] }
  0x45   :  { %1960 = vmatpush.bf16.msrb.mxu2 %v4362_v42  ;;  %1929 = vmatmul.bf16.vlgmr.msra.gmra.mxu3 %v7060_v15  ;;  %v5197_v37 = vld [vmem:[#allocation5 + $0x7e0] sm:$0xf]  ;;  %v4458_v38 = vor.u32 %v6301_v30, %v4455_v31  ;;  %v6490_v39 = vld [vmem:[#allocation5 + $0x7f4] sm:$0xf0]  ;;  %v6247_v40 = vld [vmem:[#allocation5 + $0x64] sm:$0xf]  ;;  %v5006_v44 = vor.u32 %v6442_v36, %v5005_v35 }
  0x46   :  { %1973 = vmatpush.bf16.msrb.mxu3 %v4554_v46  ;;  %1903 = vmatmul.bf16.vlgmr.msra.gmra.mxu1 %v7065_v25  ;;  %v4239_v41 = vld [vmem:[#allocation5 + $0x78] sm:$0xf0]  ;;  %v6295_v42 = vld [vmem:[#allocation5 + $0x1e4] sm:$0xf]  ;;  %v5198_v45 = vor.u32 %v6490_v39, %v5197_v37  ;;  %v4981_v47 = vld [vmem:[#allocation5 + $0x630] sm:$0xf] }
  0x47   :  { %1935 = vmatpush.bf16.msrb.mxu0 %v5102_v52  ;;  %v4431_v43 = vld [vmem:[#allocation5 + $0x1f8] sm:$0xf0]  ;;  %v4242_v46 = vor.u32 %v6247_v40, %v4239_v41  ;;  %v6436_v48 = vld [vmem:[#allocation5 + $0x644] sm:$0xf0]  ;;  %v5173_v49 = vld [vmem:[#allocation5 + $0x7b0] sm:$0xf] }
  0x48   :  { %1948 = vmatpush.bf16.msrb.mxu1 %v5294_v54  ;;  %v4434_v50 = vor.u32 %v6295_v42, %v4431_v43  ;;  %v6484_v51 = vld [vmem:[#allocation5 + $0x7c4] sm:$0xf0]  ;;  %v6241_v52 = vld [vmem:[#allocation5 + $0x34] sm:$0xf]  ;;  %v4215_v53 = vld [vmem:[#allocation5 + $0x48] sm:$0xf0]  ;;  %v4982_v56 = vor.u32 %v6436_v48, %v4981_v47 }
  0x49   :  { %1961 = vmatpush.bf16.msrb.mxu2 %v4338_v55  ;;  %v6289_v54 = vld [vmem:[#allocation5 + $0x1b4] sm:$0xf]  ;;  %v4407_v55 = vld [vmem:[#allocation5 + $0x1c8] sm:$0xf0]  ;;  %v4957_v57 = vld [vmem:[#allocation5 + $0x600] sm:$0xf]  ;;  %v4218_v60 = vor.u32 %v6241_v52, %v4215_v53 }
  0x4a   :  { %1974 = vmatpush.bf16.msrb.mxu3 %v4530_v59  ;;  %v6430_v58 = vld [vmem:[#allocation5 + $0x614] sm:$0xf0]  ;;  %v5174_v59 = vor.u32 %v6484_v51, %v5173_v49  ;;  %v5149_v61 = vld [vmem:[#allocation5 + $0x780] sm:$0xf]  ;;  %v6235_v63 = vld [vmem:[#allocation5 + $0x4] sm:$0xf] }
  0x4b   :  { %1936 = vmatpush.bf16.msrb.mxu0 %v5078_v0  ;;  %v6478_v62 = vld [vmem:[#allocation5 + $0x794] sm:$0xf0]  ;;  %v4410_v0 = vor.u32 %v6289_v54, %v4407_v55  ;;  %v6283_v2 = vld [vmem:[#allocation5 + $0x184] sm:$0xf]  ;;  %v4383_v3 = vld [vmem:[#allocation5 + $0x198] sm:$0xf0]  ;;  %v4958_v7 = vor.u32 %v6430_v58, %v4957_v57 }
  0x4c   :  { %1949 = vmatpush.bf16.msrb.mxu1 %v5270_v1  ;;  %v4191_v1 = vld [vmem:[#allocation5 + $0x18] sm:$0xf0]  ;;  %v6373_v4 = vld [vmem:[#allocation5 + $0x454] sm:$0xf]  ;;  %v4935_v10 = vld [vmem:[#allocation5 + $0x5e8] sm:$0xf0]  ;;  %v5150_v13 = vor.u32 %v6478_v62, %v5149_v61  ;;  %v4386_v19 = vor.u32 %v6283_v2, %v4383_v3 }
  0x4d   :  { %1962 = vmatpush.bf16.msrb.mxu2 %v4314_v5  ;;  %v4743_v5 = vld [vmem:[#allocation5 + $0x468] sm:$0xf0]  ;;  %v6421_v6 = vld [vmem:[#allocation5 + $0x5d4] sm:$0xf]  ;;  %v4194_v14 = vor.u32 %v6235_v63, %v4191_v1  ;;  %v6367_v24 = vld [vmem:[#allocation5 + $0x424] sm:$0xf] }
  0x4e   :  { %1975 = vmatpush.bf16.msrb.mxu3 %v4506_v11  ;;  %v6469_v11 = vld [vmem:[#allocation5 + $0x754] sm:$0xf]  ;;  %v5127_v12 = vld [vmem:[#allocation5 + $0x768] sm:$0xf0]  ;;  %v4938_v22 = vor.u32 %v6421_v6, %v4935_v10  ;;  %v6415_v27 = vld [vmem:[#allocation5 + $0x5a4] sm:$0xf] }
  0x4f   :  { %1937 = vmatpush.bf16.msrb.mxu0 %v5054_v18  ;;  %v6517_v16 = vld [vmem:[#allocation5 + $0x8d4] sm:$0xf]  ;;  %v5319_v17 = vld [vmem:[#allocation5 + $0x8e8] sm:$0xf0]  ;;  %v5130_v23 = vor.u32 %v6469_v11, %v5127_v12  ;;  %v4911_v29 = vld [vmem:[#allocation5 + $0x5b8] sm:$0xf0] }
  0x50   :  { %1950 = vmatpush.bf16.msrb.mxu1 %v5246_v20  ;;  %v132_v18 = vld [vmem:[#allocation2 + $0x20] sm:$0xff]  ;;  %v4746_v20 = vor.u32 %v6373_v4, %v4743_v5  ;;  %v5322_v28 = vor.u32 %v6517_v16, %v5319_v17  ;;  %v6463_v30 = vld [vmem:[#allocation5 + $0x724] sm:$0xf]  ;;  %v5103_v31 = vld [vmem:[#allocation5 + $0x738] sm:$0xf0]  ;;  %v4914_v37 = vor.u32 %v6415_v27, %v4911_v29 }
  0x51   :  { %1963 = vmatpush.bf16.msrb.mxu2 %v4290_v21  ;;  %v133_v21 = vld [vmem:[#allocation2 + $0x28] sm:$0xff]  ;;  %v6361_v39 = vld [vmem:[#allocation5 + $0x3f4] sm:$0xf]  ;;  %v4695_v40 = vld [vmem:[#allocation5 + $0x408] sm:$0xf0] }
  0x52   :  { %1976 = vmatpush.bf16.msrb.mxu3 %v4482_v26  ;;  %v4719_v26 = vld [vmem:[#allocation5 + $0x438] sm:$0xf0]  ;;  %v7070_v35 = vpack.c.bf16 %v133_v21, %v133_v21  ;;  %v6409_v41 = vld [vmem:[#allocation5 + $0x574] sm:$0xf]  ;;  %v4887_v43 = vld [vmem:[#allocation5 + $0x588] sm:$0xf0]  ;;  %v4698_v48 = vor.u32 %v6361_v39, %v4695_v40 }
  0x53   :  { %1938 = vmatpush.bf16.msrb.mxu0 %v5030_v32  ;;  %v7068_v32 = vpack.c.bf16 %v132_v18, %v132_v18  ;;  %v4722_v36 = vor.u32 %v6367_v24, %v4719_v26  ;;  %v5271_v47 = vld [vmem:[#allocation5 + $0x888] sm:$0xf0]  ;;  %v4890_v49 = vor.u32 %v6409_v41, %v4887_v43  ;;  %v6355_v51 = vld [vmem:[#allocation5 + $0x3c4] sm:$0xf]  ;;  %v4671_v52 = vld [vmem:[#allocation5 + $0x3d8] sm:$0xf0] }
  0x54   :  { %1951 = vmatpush.bf16.msrb.mxu1 %v5222_v33  ;;  %v6511_v33 = vld [vmem:[#allocation5 + $0x8a4] sm:$0xf]  ;;  %v4863_v55 = vld [vmem:[#allocation5 + $0x558] sm:$0xf0]  ;;  %v6349_v63 = vld [vmem:[#allocation5 + $0x394] sm:$0xf] }
  0x55   :  { %1964 = vmatpush.bf16.msrb.mxu2 %v4266_v34  ;;  %v5295_v34 = vld [vmem:[#allocation5 + $0x8b8] sm:$0xf0]  ;;  %v6403_v53 = vld [vmem:[#allocation5 + $0x544] sm:$0xf]  ;;  %v6397_v1 = vld [vmem:[#allocation5 + $0x514] sm:$0xf] }
  0x56   :  { %1977 = vmatpush.bf16.msrb.mxu3 %v4458_v38  ;;  %v5106_v38 = vor.u32 %v6463_v30, %v5103_v31  ;;  %v5298_v42 = vor.u32 %v6511_v33, %v5295_v34  ;;  %v5055_v57 = vld [vmem:[#allocation5 + $0x6d8] sm:$0xf0]  ;;  %v6499_v58 = vld [vmem:[#allocation5 + $0x844] sm:$0xf]  ;;  %v4866_v61 = vor.u32 %v6403_v53, %v4863_v55  ;;  %v4839_v3 = vld [vmem:[#allocation5 + $0x528] sm:$0xf0] }
  0x57   :  { %1939 = vmatpush.bf16.msrb.mxu0 %v5006_v44  ;;  %v6457_v44 = vld [vmem:[#allocation5 + $0x6f4] sm:$0xf]  ;;  %v5031_v5 = vld [vmem:[#allocation5 + $0x6a8] sm:$0xf0]  ;;  %v4842_v11 = vor.u32 %v6397_v1, %v4839_v3  ;;  %v6391_v16 = vld [vmem:[#allocation5 + $0x4e4] sm:$0xf] }
  0x58   :  { %1952 = vmatpush.bf16.msrb.mxu1 %v5198_v45  ;;  %v5079_v45 = vld [vmem:[#allocation5 + $0x708] sm:$0xf0]  ;;  %v6445_v4 = vld [vmem:[#allocation5 + $0x694] sm:$0xf]  ;;  %v4815_v18 = vld [vmem:[#allocation5 + $0x4f8] sm:$0xf0] }
  0x59   :  { %1965 = vmatpush.bf16.msrb.mxu2 %v4242_v46  ;;  %v6505_v46 = vld [vmem:[#allocation5 + $0x874] sm:$0xf]  ;;  %v5034_v12 = vor.u32 %v6445_v4, %v5031_v5  ;;  %v6487_v21 = vld [vmem:[#allocation5 + $0x7e4] sm:$0xf]  ;;  %v4818_v24 = vor.u32 %v6391_v16, %v4815_v18  ;;  %v4791_v31 = vld [vmem:[#allocation5 + $0x4c8] sm:$0xf0] }
  0x5a   :  { %1978 = vmatpush.bf16.msrb.mxu3 %v4434_v50  ;;  %v5082_v50 = vor.u32 %v6457_v44, %v5079_v45  ;;  %v5274_v54 = vor.u32 %v6505_v46, %v5271_v47  ;;  %v6493_v6 = vld [vmem:[#allocation5 + $0x814] sm:$0xf]  ;;  %v4983_v34 = vld [vmem:[#allocation5 + $0x648] sm:$0xf0]  ;;  %v6331_v39 = vld [vmem:[#allocation5 + $0x304] sm:$0xf] }
  0x5b   :  { %1940 = vmatpush.bf16.msrb.mxu0 %v4982_v56  ;;  %v6451_v56 = vld [vmem:[#allocation5 + $0x6c4] sm:$0xf]  ;;  %v6337_v27 = vld [vmem:[#allocation5 + $0x334] sm:$0xf]  ;;  %v4575_v40 = vld [vmem:[#allocation5 + $0x318] sm:$0xf0] }
  0x5c   :  { %1953 = vmatpush.bf16.msrb.mxu1 %v5174_v59  ;;  %v5247_v59 = vld [vmem:[#allocation5 + $0x858] sm:$0xf0]  ;;  %v5058_v62 = vor.u32 %v6451_v56, %v5055_v57  ;;  %v6385_v29 = vld [vmem:[#allocation5 + $0x4b4] sm:$0xf]  ;;  %v6379_v43 = vld [vmem:[#allocation5 + $0x484] sm:$0xf]  ;;  %v4578_v53 = vor.u32 %v6331_v39, %v4575_v40 }
  0x5d   :  { %1966 = vmatpush.bf16.msrb.mxu2 %v4218_v60  ;;  %v4674_v60 = vor.u32 %v6355_v51, %v4671_v52  ;;  %v5250_v2 = vor.u32 %v6499_v58, %v5247_v59  ;;  %v6433_v33 = vld [vmem:[#allocation5 + $0x634] sm:$0xf]  ;;  %v4794_v41 = vor.u32 %v6385_v29, %v4791_v31  ;;  %v4767_v44 = vld [vmem:[#allocation5 + $0x498] sm:$0xf0]  ;;  %v6427_v45 = vld [vmem:[#allocation5 + $0x604] sm:$0xf] }
  0x5e   :  { %1979 = vmatpush.bf16.msrb.mxu3 %v4410_v0  ;;  %v4647_v0 = vld [vmem:[#allocation5 + $0x3a8] sm:$0xf0]  ;;  %v4959_v47 = vld [vmem:[#allocation5 + $0x618] sm:$0xf0]  ;;  %v6281_v51 = vld [vmem:[#allocation5 + $0x16c] sm:$0xf0]  ;;  %v4770_v57 = vor.u32 %v6379_v43, %v4767_v44 }
  0x5f   :  { %1941 = vmatpush.bf16.msrb.mxu0 %v4958_v7  ;;  %v5223_v7 = vld [vmem:[#allocation5 + $0x828] sm:$0xf0]  ;;  %v4650_v10 = vor.u32 %v6349_v63, %v4647_v0  ;;  %v4557_v52 = vld [vmem:[#allocation5 + $0x2d8] sm:$0xf]  ;;  %v6377_v56 = vld [vmem:[#allocation5 + $0x46c] sm:$0xf0]  ;;  %v4962_v58 = vor.u32 %v6427_v45, %v4959_v47 }
  0x60   :  { %1954 = vmatpush.bf16.msrb.mxu1 %v5150_v13  ;;  %v6343_v13 = vld [vmem:[#allocation5 + $0x364] sm:$0xf]  ;;  %v5226_v17 = vor.u32 %v6493_v6, %v5223_v7  ;;  %v4749_v55 = vld [vmem:[#allocation5 + $0x458] sm:$0xf]  ;;  %v4341_v1 = vld [vmem:[#allocation5 + $0x128] sm:$0xf] }
  0x61   :  { %1967 = vmatpush.bf16.msrb.mxu2 %v4194_v14  ;;  %v4623_v14 = vld [vmem:[#allocation5 + $0x378] sm:$0xf0]  ;;  %v4941_v59 = vld [vmem:[#allocation5 + $0x5d8] sm:$0xf]  ;;  %v4750_v0 = vor.u32 %v6377_v56, %v4749_v55  ;;  %v4533_v3 = vld [vmem:[#allocation5 + $0x2a8] sm:$0xf] }
  0x62   :  { %1980 = vmatpush.bf16.msrb.mxu3 %v4386_v19  ;;  %1942 = vmatmul.bf16.vlgmr.msrb.gmra.mxu0 %v7068_v32  ;;  %v6439_v19 = vld [vmem:[#allocation5 + $0x664] sm:$0xf]  ;;  %v6323_v5 = vld [vmem:[#allocation5 + $0x2bc] sm:$0xf0]  ;;  %v4725_v6 = vld [vmem:[#allocation5 + $0x428] sm:$0xf] }
  0x63   :  { %1986 = vmatpush.bf16.msra.mxu0 %v4746_v20  ;;  %1955 = vmatmul.bf16.vlgmr.msrb.gmra.mxu1 %v7070_v35  ;;  %v5007_v20 = vld [vmem:[#allocation5 + $0x678] sm:$0xf0]  ;;  %v6371_v7 = vld [vmem:[#allocation5 + $0x43c] sm:$0xf0]  ;;  %v4317_v16 = vld [vmem:[#allocation5 + $0xf8] sm:$0xf] }
  0x64   :  { %1999 = vmatpush.bf16.msra.mxu1 %v4938_v22  ;;  %1968 = vmatmul.bf16.vlgmr.msrb.gmra.mxu2 %v7058_v9  ;;  %v5199_v22 = vld [vmem:[#allocation5 + $0x7f8] sm:$0xf0]  ;;  %v5010_v26 = vor.u32 %v6439_v19, %v5007_v20  ;;  %v4509_v18 = vld [vmem:[#allocation5 + $0x278] sm:$0xf]  ;;  %v6317_v20 = vld [vmem:[#allocation5 + $0x28c] sm:$0xf0] }
  0x65   :  { %2012 = vmatpush.bf16.msra.mxu2 %v5130_v23  ;;  %1981 = vmatmul.bf16.vlgmr.msrb.gmra.mxu3 %v7065_v25  ;;  %v4626_v23 = vor.u32 %v6343_v13, %v4623_v14  ;;  %v5202_v30 = vor.u32 %v6487_v21, %v5199_v22  ;;  %v4534_v13 = vor.u32 %v6323_v5, %v4533_v3  ;;  %v4701_v21 = vld [vmem:[#allocation5 + $0x3f8] sm:$0xf]  ;;  %v6365_v22 = vld [vmem:[#allocation5 + $0x40c] sm:$0xf0]  ;;  %v4293_v29 = vld [vmem:[#allocation5 + $0xc8] sm:$0xf] }
  0x66   :  { %2025 = vmatpush.bf16.msra.mxu3 %v5322_v28  ;;  %v4599_v28 = vld [vmem:[#allocation5 + $0x348] sm:$0xf0]  ;;  %v4726_v14 = vor.u32 %v6371_v7, %v4725_v6  ;;  %v4485_v31 = vld [vmem:[#allocation5 + $0x248] sm:$0xf]  ;;  %v6407_v39 = vld [vmem:[#allocation5 + $0x55c] sm:$0xf0] }
  0x67   :  { %1987 = vmatpush.bf16.msra.mxu0 %v4722_v36  ;;  %v6481_v36 = vld [vmem:[#allocation5 + $0x7b4] sm:$0xf]  ;;  %v4269_v43 = vld [vmem:[#allocation5 + $0x98] sm:$0xf]  ;;  %v6257_v44 = vld [vmem:[#allocation5 + $0xac] sm:$0xf0] }
  0x68   :  { %2000 = vmatpush.bf16.msra.mxu1 %v4914_v37  ;;  %v5175_v37 = vld [vmem:[#allocation5 + $0x7c8] sm:$0xf0]  ;;  %v4461_v45 = vld [vmem:[#allocation5 + $0x218] sm:$0xf]  ;;  %v6305_v47 = vld [vmem:[#allocation5 + $0x22c] sm:$0xf0] }
  0x69   :  { %2013 = vmatpush.bf16.msra.mxu2 %v5106_v38  ;;  %v4602_v38 = vor.u32 %v6337_v27, %v4599_v28  ;;  %v5178_v46 = vor.u32 %v6481_v36, %v5175_v37  ;;  %v4510_v27 = vor.u32 %v6317_v20, %v4509_v18  ;;  %v4702_v28 = vor.u32 %v6365_v22, %v4701_v21  ;;  %v4677_v36 = vld [vmem:[#allocation5 + $0x3c8] sm:$0xf]  ;;  %v6359_v37 = vld [vmem:[#allocation5 + $0x3dc] sm:$0xf0]  ;;  %v4221_v3 = vld [vmem:[#allocation5 + $0x38] sm:$0xf] }
  0x6a   :  { %2026 = vmatpush.bf16.msra.mxu3 %v5298_v42  ;;  %v4986_v42 = vor.u32 %v6433_v33, %v4983_v34  ;;  %v6311_v34 = vld [vmem:[#allocation5 + $0x25c] sm:$0xf0]  ;;  %v4245_v55 = vld [vmem:[#allocation5 + $0x68] sm:$0xf]  ;;  %v4413_v5 = vld [vmem:[#allocation5 + $0x1b8] sm:$0xf] }
  0x6b   :  { %1988 = vmatpush.bf16.msra.mxu0 %v4698_v48  ;;  %v6475_v48 = vld [vmem:[#allocation5 + $0x784] sm:$0xf]  ;;  %v6251_v56 = vld [vmem:[#allocation5 + $0x7c] sm:$0xf0]  ;;  %v6293_v7 = vld [vmem:[#allocation5 + $0x1cc] sm:$0xf0] }
  0x6c   :  { %2001 = vmatpush.bf16.msra.mxu1 %v4890_v49  ;;  %v5151_v49 = vld [vmem:[#allocation5 + $0x798] sm:$0xf0]  ;;  %v4414_v18 = vor.u32 %v6293_v7, %v4413_v5  ;;  %v4389_v20 = vld [vmem:[#allocation5 + $0x188] sm:$0xf]  ;;  %v6287_v21 = vld [vmem:[#allocation5 + $0x19c] sm:$0xf0] }
  0x6d   :  { %2014 = vmatpush.bf16.msra.mxu2 %v5082_v50  ;;  %v4365_v50 = vld [vmem:[#allocation5 + $0x158] sm:$0xf]  ;;  %v4581_v22 = vld [vmem:[#allocation5 + $0x308] sm:$0xf] }
  0x6e   :  { %2027 = vmatpush.bf16.msra.mxu3 %v5274_v54  ;;  %v6329_v54 = vld [vmem:[#allocation5 + $0x2ec] sm:$0xf0]  ;;  %v5061_v5 = vld [vmem:[#allocation5 + $0x6c8] sm:$0xf] }
  0x6f   :  { %1989 = vmatpush.bf16.msra.mxu0 %v4674_v60  ;;  %v6425_v60 = vld [vmem:[#allocation5 + $0x5ec] sm:$0xf0]  ;;  %v4558_v63 = vor.u32 %v6329_v54, %v4557_v52  ;;  %v4270_v52 = vor.u32 %v6257_v44, %v4269_v43  ;;  %v5253_v7 = vld [vmem:[#allocation5 + $0x848] sm:$0xf] }
  0x70   :  { %2002 = vmatpush.bf16.msra.mxu1 %v4866_v61  ;;  %v5154_v61 = vor.u32 %v6475_v48, %v5151_v49  ;;  %v4942_v4 = vor.u32 %v6425_v60, %v4941_v59  ;;  %v4653_v48 = vld [vmem:[#allocation5 + $0x398] sm:$0xf]  ;;  %v6353_v49 = vld [vmem:[#allocation5 + $0x3ac] sm:$0xf0]  ;;  %v6299_v59 = vld [vmem:[#allocation5 + $0x1fc] sm:$0xf0] }
  0x71   :  { %2015 = vmatpush.bf16.msra.mxu2 %v5058_v62  ;;  %v4366_v62 = vor.u32 %v6281_v51, %v4365_v50  ;;  %v4845_v50 = vld [vmem:[#allocation5 + $0x518] sm:$0xf]  ;;  %v6401_v51 = vld [vmem:[#allocation5 + $0x52c] sm:$0xf0]  ;;  %v4654_v54 = vor.u32 %v6353_v49, %v4653_v48  ;;  %v4629_v60 = vld [vmem:[#allocation5 + $0x368] sm:$0xf] }
  0x72   :  { %2028 = vmatpush.bf16.msra.mxu3 %v5250_v2  ;;  %v6275_v2 = vld [vmem:[#allocation5 + $0x13c] sm:$0xf0] }
  0x73   :  { %1990 = vmatpush.bf16.msra.mxu0 %v4650_v10  ;;  %v4917_v10 = vld [vmem:[#allocation5 + $0x5a8] sm:$0xf]  ;;  %v6515_v49 = vld [vmem:[#allocation5 + $0x8bc] sm:$0xf0] }
  0x74   :  { %2003 = vmatpush.bf16.msra.mxu1 %v4842_v11  ;;  %v6419_v11 = vld [vmem:[#allocation5 + $0x5bc] sm:$0xf0] }
  0x75   :  { %2016 = vmatpush.bf16.msra.mxu2 %v5034_v12  ;;  %v4342_v12 = vor.u32 %v6275_v2, %v4341_v1  ;;  %v4918_v19 = vor.u32 %v6419_v11, %v4917_v10  ;;  %v4605_v10 = vld [vmem:[#allocation5 + $0x338] sm:$0xf]  ;;  %v6341_v11 = vld [vmem:[#allocation5 + $0x34c] sm:$0xf0] }
  0x76   :  { %2029 = vmatpush.bf16.msra.mxu3 %v5226_v17  ;;  %v6269_v17 = vld [vmem:[#allocation5 + $0x10c] sm:$0xf0] }
  0x77   :  { %1991 = vmatpush.bf16.msra.mxu0 %v4626_v23  ;;  %v4893_v23 = vld [vmem:[#allocation5 + $0x578] sm:$0xf] }
  0x78   :  { %2004 = vmatpush.bf16.msra.mxu1 %v4818_v24  ;;  %v6413_v24 = vld [vmem:[#allocation5 + $0x58c] sm:$0xf0] }
  0x79   :  { %2017 = vmatpush.bf16.msra.mxu2 %v5010_v26  ;;  %v4318_v26 = vor.u32 %v6269_v17, %v4317_v16  ;;  %v4894_v33 = vor.u32 %v6413_v24, %v4893_v23  ;;  %v4197_v16 = vld [vmem:[#allocation5 + $0x8] sm:$0xf]  ;;  %v6239_v17 = vld [vmem:[#allocation5 + $0x1c] sm:$0xf0] }
  0x7a   :  { %2030 = vmatpush.bf16.msra.mxu3 %v5202_v30  ;;  %v6263_v30 = vld [vmem:[#allocation5 + $0xdc] sm:$0xf0] }
  0x7b   :  { %1992 = vmatpush.bf16.msra.mxu0 %v4602_v38  ;;  %v4869_v38 = vld [vmem:[#allocation5 + $0x548] sm:$0xf]  ;;  %v4294_v40 = vor.u32 %v6263_v30, %v4293_v29  ;;  %v6335_v24 = vld [vmem:[#allocation5 + $0x31c] sm:$0xf0]  ;;  %v6473_v29 = vld [vmem:[#allocation5 + $0x76c] sm:$0xf0] }
  0x7c   :  { %2005 = vmatpush.bf16.msra.mxu1 %v4794_v41  ;;  %v4486_v41 = vor.u32 %v6311_v34, %v4485_v31  ;;  %v5325_v30 = vld [vmem:[#allocation5 + $0x8d8] sm:$0xf]  ;;  %v4198_v31 = vor.u32 %v6239_v17, %v4197_v16  ;;  %v6278_v34 = vld [vmem:[#allocation5 + $0x15c] sm:$0xf]  ;;  %v4487_v16 = vld [vmem:[#allocation5 + $0x260] sm:$0xf0] }
  0x7d   :  { %2018 = vmatpush.bf16.msra.mxu2 %v4986_v42  ;;  %v4678_v42 = vor.u32 %v6359_v37, %v4677_v36  ;;  %v4367_v36 = vld [vmem:[#allocation5 + $0x170] sm:$0xf0]  ;;  %v4390_v37 = vor.u32 %v6287_v21, %v4389_v20  ;;  %v5037_v20 = vld [vmem:[#allocation5 + $0x698] sm:$0xf]  ;;  %v6449_v21 = vld [vmem:[#allocation5 + $0x6ac] sm:$0xf0] }
  0x7e   :  { %2031 = vmatpush.bf16.msra.mxu3 %v5178_v46  ;;  %v4870_v46 = vor.u32 %v6407_v39, %v4869_v38  ;;  %v4582_v38 = vor.u32 %v6335_v24, %v4581_v22  ;;  %v6326_v39 = vld [vmem:[#allocation5 + $0x2dc] sm:$0xf]  ;;  %v4370_v44 = vor.u32 %v6278_v34, %v4367_v36  ;;  %v5229_v22 = vld [vmem:[#allocation5 + $0x818] sm:$0xf]  ;;  %v6497_v24 = vld [vmem:[#allocation5 + $0x82c] sm:$0xf0] }
  0x7f   :  { %1993 = vmatpush.bf16.msra.mxu0 %v4578_v53  ;;  %v4462_v53 = vor.u32 %v6305_v47, %v4461_v45  ;;  %v5109_v45 = vld [vmem:[#allocation5 + $0x728] sm:$0xf]  ;;  %v6443_v36 = vld [vmem:[#allocation5 + $0x67c] sm:$0xf0] }
  0x80   :  { %2006 = vmatpush.bf16.msra.mxu1 %v4770_v57  ;;  %v4437_v57 = vld [vmem:[#allocation5 + $0x1e8] sm:$0xf] }
  0x81   :  { %2019 = vmatpush.bf16.msra.mxu2 %v4962_v58  ;;  %v4846_v58 = vor.u32 %v6401_v51, %v4845_v50  ;;  %v4438_v1 = vor.u32 %v6299_v59, %v4437_v57  ;;  %v5301_v47 = vld [vmem:[#allocation5 + $0x8a8] sm:$0xf]  ;;  %v6272_v50 = vld [vmem:[#allocation5 + $0x12c] sm:$0xf]  ;;  %v4343_v51 = vld [vmem:[#allocation5 + $0x140] sm:$0xf0] }
  0x82   :  { %2032 = vmatpush.bf16.msra.mxu3 %v5154_v61  ;;  %1994 = vmatmul.bf16.vlgmr.msra.gmra.mxu0 %v7056_v8  ;;  %v6347_v61 = vld [vmem:[#allocation5 + $0x37c] sm:$0xf0]  ;;  %v5085_v57 = vld [vmem:[#allocation5 + $0x6f8] sm:$0xf]  ;;  %v5013_v34 = vld [vmem:[#allocation5 + $0x668] sm:$0xf] }
  0x83   :  { %2038 = vmatpush.bf16.msrb.mxu0 %v4366_v62  ;;  %2007 = vmatmul.bf16.vlgmr.msra.gmra.mxu1 %v7060_v15  ;;  %v4821_v62 = vld [vmem:[#allocation5 + $0x4e8] sm:$0xf]  ;;  %v4630_v2 = vor.u32 %v6347_v61, %v4629_v60  ;;  %v5277_v59 = vld [vmem:[#allocation5 + $0x878] sm:$0xf]  ;;  %v6509_v61 = vld [vmem:[#allocation5 + $0x88c] sm:$0xf0] }
  0x84   :  { %2051 = vmatpush.bf16.msrb.mxu1 %v4558_v63  ;;  %2020 = vmatmul.bf16.vlgmr.msra.gmra.mxu2 %v7068_v32  ;;  %v6395_v63 = vld [vmem:[#allocation5 + $0x4fc] sm:$0xf0] }
  0x85   :  { %2064 = vmatpush.bf16.msrb.mxu2 %v4750_v0  ;;  %2033 = vmatmul.bf16.vlgmr.msra.gmra.mxu3 %v7070_v35  ;;  %v4246_v0 = vor.u32 %v6251_v56, %v4245_v55  ;;  %v4822_v6 = vor.u32 %v6395_v63, %v4821_v62  ;;  %v5302_v55 = vor.u32 %v6515_v49, %v5301_v47  ;;  %v6266_v62 = vld [vmem:[#allocation5 + $0xfc] sm:$0xf]  ;;  %v4319_v63 = vld [vmem:[#allocation5 + $0x110] sm:$0xf0]  ;;  %v4989_v47 = vld [vmem:[#allocation5 + $0x638] sm:$0xf] }
  0x86   :  { %2077 = vmatpush.bf16.msrb.mxu3 %v4942_v4  ;;  %v6245_v4 = vld [vmem:[#allocation5 + $0x4c] sm:$0xf0]  ;;  %v4346_v56 = vor.u32 %v6272_v50, %v4343_v51  ;;  %v5181_v49 = vld [vmem:[#allocation5 + $0x7b8] sm:$0xf] }
  0x87   :  { %2039 = vmatpush.bf16.msrb.mxu0 %v4342_v12  ;;  %v4797_v12 = vld [vmem:[#allocation5 + $0x4b8] sm:$0xf]  ;;  %v6485_v51 = vld [vmem:[#allocation5 + $0x7cc] sm:$0xf0] }
  0x88   :  { %2052 = vmatpush.bf16.msrb.mxu1 %v4534_v13  ;;  %v6389_v13 = vld [vmem:[#allocation5 + $0x4cc] sm:$0xf0] }
  0x89   :  { %2065 = vmatpush.bf16.msrb.mxu2 %v4726_v14  ;;  %v4222_v14 = vor.u32 %v6245_v4, %v4221_v3  ;;  %v4798_v23 = vor.u32 %v6389_v13, %v4797_v12  ;;  %v5278_v3 = vor.u32 %v6509_v61, %v5277_v59  ;;  %v4322_v4 = vor.u32 %v6266_v62, %v4319_v63  ;;  %v6260_v12 = vld [vmem:[#allocation5 + $0xcc] sm:$0xf]  ;;  %v4295_v13 = vld [vmem:[#allocation5 + $0xe0] sm:$0xf0]  ;;  %v5157_v61 = vld [vmem:[#allocation5 + $0x788] sm:$0xf] }
  0x8a   :  { %2078 = vmatpush.bf16.msrb.mxu3 %v4918_v19  ;;  %v4606_v19 = vor.u32 %v6341_v11, %v4605_v10  ;;  %v6503_v11 = vld [vmem:[#allocation5 + $0x85c] sm:$0xf0]  ;;  %v5182_v59 = vor.u32 %v6485_v51, %v5181_v49  ;;  %v6236_v63 = vld [vmem:[#allocation5 + $0xc] sm:$0xf] }
  0x8b   :  { %2040 = vmatpush.bf16.msrb.mxu0 %v4318_v26  ;;  %v4773_v26 = vld [vmem:[#allocation5 + $0x488] sm:$0xf]  ;;  %v6479_v62 = vld [vmem:[#allocation5 + $0x79c] sm:$0xf0]  ;;  %v6404_v51 = vld [vmem:[#allocation5 + $0x54c] sm:$0xf] }
  0x8c   :  { %2053 = vmatpush.bf16.msrb.mxu1 %v4510_v27  ;;  %v6383_v27 = vld [vmem:[#allocation5 + $0x49c] sm:$0xf0] }
  0x8d   :  { %2066 = vmatpush.bf16.msrb.mxu2 %v4702_v28  ;;  %v5133_v28 = vld [vmem:[#allocation5 + $0x758] sm:$0xf] }
  0x8e   :  { %2079 = vmatpush.bf16.msrb.mxu3 %v4894_v33  ;;  %v6521_v33 = vld [vmem:[#allocation5 + $0x8ec] sm:$0xf0] }
  0x8f   :  { %2041 = vmatpush.bf16.msrb.mxu0 %v4294_v40  ;;  %v4559_v40 = vld [vmem:[#allocation5 + $0x2f0] sm:$0xf0]  ;;  %v5326_v43 = vor.u32 %v6521_v33, %v5325_v30  ;;  %v5038_v30 = vor.u32 %v6449_v21, %v5037_v20 }
  0x90   :  { %2054 = vmatpush.bf16.msrb.mxu1 %v4486_v41  ;;  %v4774_v41 = vor.u32 %v6383_v27, %v4773_v26  ;;  %v4562_v48 = vor.u32 %v6326_v39, %v4559_v40  ;;  %v6254_v26 = vld [vmem:[#allocation5 + $0x9c] sm:$0xf]  ;;  %v4271_v27 = vld [vmem:[#allocation5 + $0xb0] sm:$0xf0]  ;;  %v6491_v39 = vld [vmem:[#allocation5 + $0x7fc] sm:$0xf0] }
  0x91   :  { %2067 = vmatpush.bf16.msrb.mxu2 %v4678_v42  ;;  %v5134_v42 = vor.u32 %v6473_v29, %v5133_v28  ;;  %v6302_v28 = vld [vmem:[#allocation5 + $0x21c] sm:$0xf]  ;;  %v4463_v29 = vld [vmem:[#allocation5 + $0x230] sm:$0xf0]  ;;  %v4274_v33 = vor.u32 %v6254_v26, %v4271_v27  ;;  %v6248_v40 = vld [vmem:[#allocation5 + $0x6c] sm:$0xf] }
  0x92   :  { %2080 = vmatpush.bf16.msrb.mxu3 %v4870_v46  ;;  %v6467_v46 = vld [vmem:[#allocation5 + $0x73c] sm:$0xf0]  ;;  %v4919_v27 = vld [vmem:[#allocation5 + $0x5c0] sm:$0xf0] }
  0x93   :  { %2042 = vmatpush.bf16.msrb.mxu0 %v4270_v52  ;;  %v6320_v52 = vld [vmem:[#allocation5 + $0x2ac] sm:$0xf] }
  0x94   :  { %2055 = vmatpush.bf16.msrb.mxu1 %v4462_v53  ;;  %v4535_v53 = vld [vmem:[#allocation5 + $0x2c0] sm:$0xf0] }
  0x95   :  { %2068 = vmatpush.bf16.msrb.mxu2 %v4654_v54  ;;  %v5110_v54 = vor.u32 %v6467_v46, %v5109_v45  ;;  %v4538_v60 = vor.u32 %v6320_v52, %v4535_v53  ;;  %v6242_v52 = vld [vmem:[#allocation5 + $0x3c] sm:$0xf]  ;;  %v4223_v53 = vld [vmem:[#allocation5 + $0x50] sm:$0xf0] }
  0x96   :  { %2081 = vmatpush.bf16.msrb.mxu3 %v4846_v58  ;;  %v6461_v58 = vld [vmem:[#allocation5 + $0x70c] sm:$0xf0] }
  0x97   :  { %2043 = vmatpush.bf16.msrb.mxu0 %v4246_v0  ;;  %v6314_v0 = vld [vmem:[#allocation5 + $0x27c] sm:$0xf] }
  0x98   :  { %2056 = vmatpush.bf16.msrb.mxu1 %v4438_v1  ;;  %v4511_v1 = vld [vmem:[#allocation5 + $0x290] sm:$0xf0] }
  0x99   :  { %2069 = vmatpush.bf16.msrb.mxu2 %v4630_v2  ;;  %v5086_v2 = vor.u32 %v6461_v58, %v5085_v57  ;;  %v4514_v10 = vor.u32 %v6314_v0, %v4511_v1  ;;  %v4965_v57 = vld [vmem:[#allocation5 + $0x608] sm:$0xf]  ;;  %v6431_v58 = vld [vmem:[#allocation5 + $0x61c] sm:$0xf0]  ;;  %v4199_v1 = vld [vmem:[#allocation5 + $0x20] sm:$0xf0] }
  0x9a   :  { %2082 = vmatpush.bf16.msrb.mxu3 %v4822_v6  ;;  %v6455_v6 = vld [vmem:[#allocation5 + $0x6dc] sm:$0xf0] }
  0x9b   :  { %2044 = vmatpush.bf16.msrb.mxu0 %v4222_v14  ;;  %v6308_v14 = vld [vmem:[#allocation5 + $0x24c] sm:$0xf]  ;;  %v5062_v17 = vor.u32 %v6455_v6, %v5061_v5  ;;  %v4751_v5 = vld [vmem:[#allocation5 + $0x470] sm:$0xf0]  ;;  %v6422_v6 = vld [vmem:[#allocation5 + $0x5dc] sm:$0xf] }
  0x9c   :  { %2057 = vmatpush.bf16.msrb.mxu1 %v4414_v18  ;;  %v5254_v18 = vor.u32 %v6503_v11, %v5253_v7  ;;  %v4966_v7 = vor.u32 %v6431_v58, %v4965_v57  ;;  %v6470_v11 = vld [vmem:[#allocation5 + $0x75c] sm:$0xf]  ;;  %v6500_v57 = vld [vmem:[#allocation5 + $0x84c] sm:$0xf]  ;;  %v5255_v58 = vld [vmem:[#allocation5 + $0x860] sm:$0xf0] }
  0x9d   :  { %2070 = vmatpush.bf16.msrb.mxu2 %v4606_v19  ;;  %v4298_v19 = vor.u32 %v6260_v12, %v4295_v13  ;;  %v5135_v12 = vld [vmem:[#allocation5 + $0x770] sm:$0xf0]  ;;  %v5158_v13 = vor.u32 %v6479_v62, %v5157_v61 }
  0x9e   :  { %2083 = vmatpush.bf16.msrb.mxu3 %v4798_v23  ;;  %v4490_v23 = vor.u32 %v6308_v14, %v4487_v16  ;;  %v4202_v14 = vor.u32 %v6236_v63, %v4199_v1  ;;  %v6518_v16 = vld [vmem:[#allocation5 + $0x8dc] sm:$0xf]  ;;  %v5138_v21 = vor.u32 %v6470_v11, %v5135_v12  ;;  %v4655_v63 = vld [vmem:[#allocation5 + $0x3b0] sm:$0xf0] }
  0x9f   :  { %2045 = vmatpush.bf16.msrb.mxu0 %v4198_v31  ;;  %v5230_v31 = vor.u32 %v6497_v24, %v5229_v22  ;;  %v6368_v22 = vld [vmem:[#allocation5 + $0x42c] sm:$0xf] }
  0xa0   :  { %2058 = vmatpush.bf16.msrb.mxu1 %v4390_v37  ;;  %v5205_v37 = vld [vmem:[#allocation5 + $0x7e8] sm:$0xf]  ;;  %v6416_v24 = vld [vmem:[#allocation5 + $0x5ac] sm:$0xf] }
  0xa1   :  { %2071 = vmatpush.bf16.msrb.mxu2 %v4582_v38  ;;  %v4466_v38 = vor.u32 %v6302_v28, %v4463_v29  ;;  %v5206_v45 = vor.u32 %v6491_v39, %v5205_v37  ;;  %v6464_v28 = vld [vmem:[#allocation5 + $0x72c] sm:$0xf]  ;;  %v5111_v29 = vld [vmem:[#allocation5 + $0x740] sm:$0xf0]  ;;  %v6362_v37 = vld [vmem:[#allocation5 + $0x3fc] sm:$0xf] }
  0xa2   :  { %2084 = vmatpush.bf16.msrb.mxu3 %v4774_v41  ;;  %2046 = vmatmul.bf16.vlgmr.msrb.gmra.mxu0 %v7058_v9  ;;  %v4247_v41 = vld [vmem:[#allocation5 + $0x80] sm:$0xf0]  ;;  %v6410_v39 = vld [vmem:[#allocation5 + $0x57c] sm:$0xf] }
  0xa3   :  { %2090 = vmatpush.bf16.msra.mxu0 %v5134_v42  ;;  %2059 = vmatmul.bf16.vlgmr.msrb.gmra.mxu1 %v7065_v25  ;;  %v6296_v42 = vld [vmem:[#allocation5 + $0x1ec] sm:$0xf]  ;;  %v4250_v46 = vor.u32 %v6248_v40, %v4247_v41  ;;  %v4895_v41 = vld [vmem:[#allocation5 + $0x590] sm:$0xf0] }
  0xa4   :  { %2103 = vmatpush.bf16.msra.mxu1 %v5326_v43  ;;  %2072 = vmatmul.bf16.vlgmr.msrb.gmra.mxu2 %v7056_v8  ;;  %v4439_v43 = vld [vmem:[#allocation5 + $0x200] sm:$0xf0] }
  0xa5   :  { %2116 = vmatpush.bf16.msra.mxu2 %v4370_v44  ;;  %2085 = vmatmul.bf16.vlgmr.msrb.gmra.mxu3 %v7060_v15  ;;  %v5014_v44 = vor.u32 %v6443_v36, %v5013_v34  ;;  %v4442_v50 = vor.u32 %v6296_v42, %v4439_v43  ;;  %v4922_v34 = vor.u32 %v6416_v24, %v4919_v27  ;;  %v6458_v42 = vld [vmem:[#allocation5 + $0x6fc] sm:$0xf]  ;;  %v5087_v43 = vld [vmem:[#allocation5 + $0x710] sm:$0xf0]  ;;  %v5207_v24 = vld [vmem:[#allocation5 + $0x800] sm:$0xf0] }
  0xa6   :  { %2129 = vmatpush.bf16.msra.mxu3 %v4562_v48  ;;  %v6437_v48 = vld [vmem:[#allocation5 + $0x64c] sm:$0xf0]  ;;  %v5114_v36 = vor.u32 %v6464_v28, %v5111_v29  ;;  %v5090_v49 = vor.u32 %v6458_v42, %v5087_v43  ;;  %v5183_v42 = vld [vmem:[#allocation5 + $0x7d0] sm:$0xf0] }
  0xa7   :  { %2091 = vmatpush.bf16.msra.mxu0 %v5110_v54  ;;  %v6290_v54 = vld [vmem:[#allocation5 + $0x1bc] sm:$0xf] }
  0xa8   :  { %2104 = vmatpush.bf16.msra.mxu1 %v5302_v55  ;;  %v4415_v55 = vld [vmem:[#allocation5 + $0x1d0] sm:$0xf0] }
  0xa9   :  { %2117 = vmatpush.bf16.msra.mxu2 %v4346_v56  ;;  %v4990_v56 = vor.u32 %v6437_v48, %v4989_v47  ;;  %v4418_v0 = vor.u32 %v6290_v54, %v4415_v55  ;;  %v6356_v47 = vld [vmem:[#allocation5 + $0x3cc] sm:$0xf]  ;;  %v4898_v48 = vor.u32 %v6410_v39, %v4895_v41  ;;  %v5063_v55 = vld [vmem:[#allocation5 + $0x6e0] sm:$0xf0]  ;;  %v4991_v39 = vld [vmem:[#allocation5 + $0x650] sm:$0xf0] }
  0xaa   :  { %2130 = vmatpush.bf16.msra.mxu3 %v4538_v60  ;;  %v4226_v60 = vor.u32 %v6242_v52, %v4223_v53  ;;  %v4871_v52 = vld [vmem:[#allocation5 + $0x560] sm:$0xf0]  ;;  %v6452_v54 = vld [vmem:[#allocation5 + $0x6cc] sm:$0xf]  ;;  %v6482_v41 = vld [vmem:[#allocation5 + $0x7bc] sm:$0xf] }
  0xab   :  { %2092 = vmatpush.bf16.msra.mxu0 %v5086_v2  ;;  %v6284_v2 = vld [vmem:[#allocation5 + $0x18c] sm:$0xf]  ;;  %v4874_v61 = vor.u32 %v6404_v51, %v4871_v52  ;;  %v5066_v62 = vor.u32 %v6452_v54, %v5063_v55  ;;  %v4775_v52 = vld [vmem:[#allocation5 + $0x4a0] sm:$0xf0]  ;;  %v5186_v55 = vor.u32 %v6482_v41, %v5183_v42 }
  0xac   :  { %2105 = vmatpush.bf16.msra.mxu1 %v5278_v3  ;;  %v4391_v3 = vld [vmem:[#allocation5 + $0x1a0] sm:$0xf0]  ;;  %v6380_v51 = vld [vmem:[#allocation5 + $0x48c] sm:$0xf] }
  0xad   :  { %2118 = vmatpush.bf16.msra.mxu2 %v4322_v4  ;;  %v6374_v4 = vld [vmem:[#allocation5 + $0x45c] sm:$0xf] }
  0xae   :  { %2131 = vmatpush.bf16.msra.mxu3 %v4514_v10  ;;  %v4943_v10 = vld [vmem:[#allocation5 + $0x5f0] sm:$0xf0] }
  0xaf   :  { %2093 = vmatpush.bf16.msra.mxu0 %v5062_v17  ;;  %v5327_v17 = vld [vmem:[#allocation5 + $0x8f0] sm:$0xf0]  ;;  %v4946_v20 = vor.u32 %v6422_v6, %v4943_v10  ;;  %v6494_v6 = vld [vmem:[#allocation5 + $0x81c] sm:$0xf] }
  0xb0   :  { %2106 = vmatpush.bf16.msra.mxu1 %v5254_v18  ;;  %v4394_v18 = vor.u32 %v6284_v2, %v4391_v3  ;;  %v5330_v26 = vor.u32 %v6518_v16, %v5327_v17  ;;  %v5258_v2 = vor.u32 %v6500_v57, %v5255_v58  ;;  %v4847_v3 = vld [vmem:[#allocation5 + $0x530] sm:$0xf0]  ;;  %v4631_v16 = vld [vmem:[#allocation5 + $0x380] sm:$0xf0]  ;;  %v6392_v17 = vld [vmem:[#allocation5 + $0x4ec] sm:$0xf] }
  0xb1   :  { %2119 = vmatpush.bf16.msra.mxu2 %v4298_v19  ;;  %v4754_v19 = vor.u32 %v6374_v4, %v4751_v5  ;;  %v6446_v4 = vld [vmem:[#allocation5 + $0x69c] sm:$0xf]  ;;  %v5039_v5 = vld [vmem:[#allocation5 + $0x6b0] sm:$0xf0]  ;;  %v4967_v57 = vld [vmem:[#allocation5 + $0x620] sm:$0xf0] }
  0xb2   :  { %2132 = vmatpush.bf16.msra.mxu3 %v4490_v23  ;;  %v4727_v23 = vld [vmem:[#allocation5 + $0x440] sm:$0xf0]  ;;  %v6476_v58 = vld [vmem:[#allocation5 + $0x78c] sm:$0xf] }
  0xb3   :  { %2094 = vmatpush.bf16.msra.mxu0 %v5038_v30  ;;  %v6512_v30 = vld [vmem:[#allocation5 + $0x8ac] sm:$0xf] }
  0xb4   :  { %2107 = vmatpush.bf16.msra.mxu1 %v5230_v31  ;;  %v5303_v31 = vld [vmem:[#allocation5 + $0x8c0] sm:$0xf0] }
  0xb5   :  { %2120 = vmatpush.bf16.msra.mxu2 %v4274_v33  ;;  %v4730_v33 = vor.u32 %v6368_v22, %v4727_v23  ;;  %v5306_v40 = vor.u32 %v6512_v30, %v5303_v31  ;;  %v5015_v22 = vld [vmem:[#allocation5 + $0x680] sm:$0xf0]  ;;  %v6488_v23 = vld [vmem:[#allocation5 + $0x7ec] sm:$0xf]  ;;  %v6338_v30 = vld [vmem:[#allocation5 + $0x33c] sm:$0xf] }
  0xb6   :  { %2133 = vmatpush.bf16.msra.mxu3 %v4466_v38  ;;  %v4703_v38 = vld [vmem:[#allocation5 + $0x410] sm:$0xf0] }
  0xb7   :  { %2095 = vmatpush.bf16.msra.mxu0 %v5014_v44  ;;  %v6506_v44 = vld [vmem:[#allocation5 + $0x87c] sm:$0xf]  ;;  %v4607_v31 = vld [vmem:[#allocation5 + $0x350] sm:$0xf0] }
  0xb8   :  { %2108 = vmatpush.bf16.msra.mxu1 %v5206_v45  ;;  %v5279_v45 = vld [vmem:[#allocation5 + $0x890] sm:$0xf0] }
  0xb9   :  { %2121 = vmatpush.bf16.msra.mxu2 %v4250_v46  ;;  %v4706_v46 = vor.u32 %v6362_v37, %v4703_v38  ;;  %v5282_v53 = vor.u32 %v6506_v44, %v5279_v45  ;;  %v4799_v37 = vld [vmem:[#allocation5 + $0x4d0] sm:$0xf0]  ;;  %v6434_v38 = vld [vmem:[#allocation5 + $0x63c] sm:$0xf]  ;;  %v4610_v45 = vor.u32 %v6338_v30, %v4607_v31  ;;  %v4325_v30 = vld [vmem:[#allocation5 + $0x100] sm:$0xf] }
  0xba   :  { %2134 = vmatpush.bf16.msra.mxu3 %v4442_v50  ;;  %v4679_v50 = vld [vmem:[#allocation5 + $0x3e0] sm:$0xf0]  ;;  %v6270_v31 = vld [vmem:[#allocation5 + $0x114] sm:$0xf0] }
  0xbb   :  { %2096 = vmatpush.bf16.msra.mxu0 %v4990_v56  ;;  %v7088_v56 = vld [vmem:[#allocation7] sm:$0x3f]  ;;  %v4326_v41 = vor.u32 %v6270_v31, %v4325_v30 }
  0xbc   :  { %2109 = vmatpush.bf16.msra.mxu1 %v5182_v59  ;;  %v4682_v59 = vor.u32 %v6356_v47, %v4679_v50  ;;  %v430_v1 = vperm.slane %v7088_v56, 0  ;;  %v4583_v47 = vld [vmem:[#allocation5 + $0x320] sm:$0xf0]  ;;  %v4994_v50 = vor.u32 %v6434_v38, %v4991_v39  ;;  %v6366_v38 = vld [vmem:[#allocation5 + $0x414] sm:$0xf0] }
  0xbd   :  { %2122 = vmatpush.bf16.msra.mxu2 %v4226_v60  ;;  %v6350_v60 = vld [vmem:[#allocation5 + $0x39c] sm:$0xf]  ;;  %v4901_v39 = vld [vmem:[#allocation5 + $0x580] sm:$0xf] }
  0xbe   :  { %2135 = vmatpush.bf16.msra.mxu3 %v4418_v0  ;;  %v6398_v0 = vld [vmem:[#allocation5 + $0x51c] sm:$0xf]  ;;  %v4658_v10 = vor.u32 %v6350_v60, %v4655_v63  ;;  %v4373_v60 = vld [vmem:[#allocation5 + $0x160] sm:$0xf] }
  0xbf   :  { %2097 = vmatpush.bf16.msra.mxu0 %v4966_v7  ;;  %v5231_v7 = vld [vmem:[#allocation5 + $0x830] sm:$0xf0]  ;;  %v1891_v11 = vpop.f32.mrf.mxu0  ;;  %v4850_v12 = vor.u32 %v6398_v0, %v4847_v3  ;;  %v6330_v0 = vld [vmem:[#allocation5 + $0x2f4] sm:$0xf0]  ;;  %v4229_v31 = vld [vmem:[#allocation5 + $0x40] sm:$0xf] }
  0xc0   :  { %2110 = vmatpush.bf16.msra.mxu1 %v5158_v13  ;;  %v5042_v13 = vor.u32 %v6446_v4, %v5039_v5  ;;  %v4778_v4 = vor.u32 %v6380_v51, %v4775_v52  ;;  %v4877_v51 = vld [vmem:[#allocation5 + $0x550] sm:$0xf]  ;;  %v6408_v52 = vld [vmem:[#allocation5 + $0x564] sm:$0xf0] }
  0xc1   :  { %2123 = vmatpush.bf16.msra.mxu2 %v4202_v14  ;;  %v6344_v14 = vld [vmem:[#allocation5 + $0x36c] sm:$0xf] }
  0xc2   :  { %2136 = vmatpush.bf16.msra.mxu3 %v4394_v18  ;;  %2098 = vmatmul.bf16.vlgmr.msra.gmra.mxu0 %v7068_v32  ;;  %v1892_v18 = vadd.f32 %v1891_v11, %v430_v1  ;;  %v4757_v1 = vld [vmem:[#allocation5 + $0x460] sm:$0xf] }
  0xc3   :  { %2142 = vmatpush.bf16.msrb.mxu0 %v4754_v19  ;;  %2111 = vmatmul.bf16.vlgmr.msra.gmra.mxu1 %v7070_v35  ;;  %v5234_v19 = vor.u32 %v6494_v6, %v5231_v7  ;;  %v1904_v27 = vpop.f32.mrf.mxu1  ;;  %v4949_v6 = vld [vmem:[#allocation5 + $0x5e0] sm:$0xf]  ;;  %v6426_v7 = vld [vmem:[#allocation5 + $0x5f4] sm:$0xf0] }
  0xc4   :  { %2155 = vmatpush.bf16.msrb.mxu1 %v4946_v20  ;;  %2124 = vmatmul.bf16.vlgmr.msra.gmra.mxu2 %v7058_v9  ;;  %v4823_v20 = vld [vmem:[#allocation5 + $0x500] sm:$0xf0] }
  0xc5   :  { %2168 = vmatpush.bf16.msrb.mxu2 %v5138_v21  ;;  %2137 = vmatmul.bf16.vlgmr.msra.gmra.mxu3 %v7065_v25  ;;  %v6440_v21 = vld [vmem:[#allocation5 + $0x66c] sm:$0xf]  ;;  %v4826_v28 = vor.u32 %v6392_v17, %v4823_v20  ;;  %v6276_v17 = vld [vmem:[#allocation5 + $0x144] sm:$0xf0]  ;;  %v4950_v20 = vor.u32 %v6426_v7, %v4949_v6  ;;  %v6402_v6 = vld [vmem:[#allocation5 + $0x534] sm:$0xf0] }
  0xc6   :  { %2181 = vmatpush.bf16.msrb.mxu3 %v5330_v26  ;;  %v4634_v26 = vor.u32 %v6344_v14, %v4631_v16  ;;  %v5018_v29 = vor.u32 %v6440_v21, %v5015_v22  ;;  %v4349_v16 = vld [vmem:[#allocation5 + $0x130] sm:$0xf]  ;;  %v6324_v21 = vld [vmem:[#allocation5 + $0x2c4] sm:$0xf0]  ;;  %v431_v7 = vperm.slane %v7088_v56, 1 }
  0xc7   :  { %2143 = vmatpush.bf16.msrb.mxu0 %v4730_v33  ;;  %v6386_v33 = vld [vmem:[#allocation5 + $0x4bc] sm:$0xf]  ;;  %v4733_v22 = vld [vmem:[#allocation5 + $0x430] sm:$0xf] }
  0xc8   :  { %2156 = vmatpush.bf16.msrb.mxu1 %v4922_v34  ;;  %v1905_v34 = vadd.f32 %v1904_v27, %v1892_v18  ;;  %v1930_v44 = vpop.f32.mrf.mxu3  ;;  %v4541_v18 = vld [vmem:[#allocation5 + $0x2b0] sm:$0xf]  ;;  %v4350_v27 = vor.u32 %v6276_v17, %v4349_v16  ;;  %v6300_v17 = vld [vmem:[#allocation5 + $0x204] sm:$0xf0] }
  0xc9   :  { %2169 = vmatpush.bf16.msrb.mxu2 %v5114_v36  ;;  %v5210_v36 = vor.u32 %v6488_v23, %v5207_v24  ;;  %v6372_v23 = vld [vmem:[#allocation5 + $0x444] sm:$0xf0]  ;;  %v4925_v24 = vld [vmem:[#allocation5 + $0x5b0] sm:$0xf] }
  0xca   :  { %2182 = vmatpush.bf16.msrb.mxu3 %v5306_v40  ;;  %v1917_v40 = vpop.f32.mrf.mxu2 }
  0xcb   :  { %2144 = vmatpush.bf16.msrb.mxu0 %v4706_v46  ;;  %v1918_v43 = vadd.f32 %v1917_v40, %v1905_v34  ;;  %v6332_v46 = vld [vmem:[#allocation5 + $0x30c] sm:$0xf]  ;;  %v1906_v3 = vpop.f32.mrf.mxu1  ;;  %v6414_v40 = vld [vmem:[#allocation5 + $0x594] sm:$0xf0] }
  0xcc   :  { %2157 = vmatpush.bf16.msrb.mxu1 %v4898_v48  ;;  %v1893_v48 = vpop.f32.mrf.mxu0  ;;  %v4586_v63 = vor.u32 %v6332_v46, %v4583_v47  ;;  %v4493_v46 = vld [vmem:[#allocation5 + $0x250] sm:$0xf]  ;;  %v4902_v47 = vor.u32 %v6414_v40, %v4901_v39  ;;  %v6354_v3 = vld [vmem:[#allocation5 + $0x3b4] sm:$0xf0]  ;;  %v4613_v39 = vld [vmem:[#allocation5 + $0x340] sm:$0xf] }
  0xcd   :  { %2170 = vmatpush.bf16.msrb.mxu2 %v5090_v49  ;;  %v4802_v49 = vor.u32 %v6386_v33, %v4799_v37  ;;  %v7091_v54 = vadd.f32 %v1930_v44, %v1918_v43  ;;  %v4517_v33 = vld [vmem:[#allocation5 + $0x280] sm:$0xf]  ;;  %v4301_v44 = vld [vmem:[#allocation5 + $0xd0] sm:$0xf]  ;;  %v6312_v48 = vld [vmem:[#allocation5 + $0x264] sm:$0xf0] }
  0xce   :  { %2183 = vmatpush.bf16.msrb.mxu3 %v5282_v53  ;;  %v6428_v53 = vld [vmem:[#allocation5 + $0x60c] sm:$0xf]  ;;  %v4709_v37 = vld [vmem:[#allocation5 + $0x400] sm:$0xf]  ;;  %v6342_v40 = vld [vmem:[#allocation5 + $0x354] sm:$0xf0] }
  0xcf   :  { %2145 = vmatpush.bf16.msrb.mxu0 %v4682_v59  ;;  %v5159_v59 = vld [vmem:[#allocation5 + $0x7a0] sm:$0xf0]  ;;  %v4970_v5 = vor.u32 %v6428_v53, %v4967_v57  ;;  %v4710_v43 = vor.u32 %v6366_v38, %v4709_v37  ;;  %v6294_v38 = vld [vmem:[#allocation5 + $0x1d4] sm:$0xf0] }
  0xd0   :  { %2158 = vmatpush.bf16.msrb.mxu1 %v4874_v61  ;;  %v6282_v61 = vld [vmem:[#allocation5 + $0x174] sm:$0xf0] }
  0xd1   :  { %2171 = vmatpush.bf16.msrb.mxu2 %v5066_v62  ;;  %v4565_v62 = vld [vmem:[#allocation5 + $0x2e0] sm:$0xf]  ;;  %v4374_v11 = vor.u32 %v6282_v61, %v4373_v60 }
  0xd2   :  { %2184 = vmatpush.bf16.msrb.mxu3 %v5258_v2  ;;  %v6378_v2 = vld [vmem:[#allocation5 + $0x474] sm:$0xf0]  ;;  %v4277_v61 = vld [vmem:[#allocation5 + $0xa0] sm:$0xf] }
  0xd3   :  { %2146 = vmatpush.bf16.msrb.mxu0 %v4658_v10  ;;  %v5162_v10 = vor.u32 %v6476_v58, %v5159_v59  ;;  %v4758_v14 = vor.u32 %v6378_v2, %v4757_v1  ;;  %v4494_v59 = vor.u32 %v6312_v48, %v4493_v46  ;;  %v6306_v1 = vld [vmem:[#allocation5 + $0x234] sm:$0xf0]  ;;  %v4661_v2 = vld [vmem:[#allocation5 + $0x3a0] sm:$0xf]  ;;  %v4397_v48 = vld [vmem:[#allocation5 + $0x190] sm:$0xf] }
  0xd4   :  { %2159 = vmatpush.bf16.msrb.mxu1 %v4850_v12  ;;  %v1919_v12 = vpop.f32.mrf.mxu2 }
  0xd5   :  { %2172 = vmatpush.bf16.msrb.mxu2 %v5042_v13  ;;  %v4566_v13 = vor.u32 %v6330_v0, %v4565_v62  ;;  %v6258_v62 = vld [vmem:[#allocation5 + $0xb4] sm:$0xf0]  ;;  %v4878_v0 = vor.u32 %v6408_v52, %v4877_v51  ;;  %v4253_v12 = vld [vmem:[#allocation5 + $0x70] sm:$0xf]  ;;  %v6336_v52 = vld [vmem:[#allocation5 + $0x324] sm:$0xf0] }
  0xd6   :  { %2185 = vmatpush.bf16.msrb.mxu3 %v5234_v19  ;;  %v1932_v19 = vpop.f32.mrf.mxu3 }
  0xd7   :  { %2147 = vmatpush.bf16.msrb.mxu0 %v4634_v26  ;;  %v6420_v26 = vld [vmem:[#allocation5 + $0x5c4] sm:$0xf0] }
  0xd8   :  { %2160 = vmatpush.bf16.msrb.mxu1 %v4826_v28  ;;  %v4542_v28 = vor.u32 %v6324_v21, %v4541_v18  ;;  %v4926_v34 = vor.u32 %v6420_v26, %v4925_v24  ;;  %v4637_v18 = vld [vmem:[#allocation5 + $0x370] sm:$0xf]  ;;  %v6348_v19 = vld [vmem:[#allocation5 + $0x384] sm:$0xf0] }
  0xd9   :  { %2173 = vmatpush.bf16.msrb.mxu2 %v5018_v29  ;;  %v4734_v29 = vor.u32 %v6372_v23, %v4733_v22  ;;  %v4829_v21 = vld [vmem:[#allocation5 + $0x4f0] sm:$0xf]  ;;  %v6396_v22 = vld [vmem:[#allocation5 + $0x504] sm:$0xf0]  ;;  %v4638_v30 = vor.u32 %v6348_v19, %v4637_v18  ;;  %v6273_v18 = vld [vmem:[#allocation5 + $0x134] sm:$0xf] }
  0xda   :  { %2186 = vmatpush.bf16.msrb.mxu3 %v5210_v36  ;;  %v6318_v36 = vld [vmem:[#allocation5 + $0x294] sm:$0xf0]  ;;  %v4830_v37 = vor.u32 %v6396_v22, %v4829_v21  ;;  %v4351_v19 = vld [vmem:[#allocation5 + $0x148] sm:$0xf0] }
  0xdb   :  { %2148 = vmatpush.bf16.msrb.mxu0 %v4610_v45  ;;  %v4518_v42 = vor.u32 %v6318_v36, %v4517_v33  ;;  %v6264_v45 = vld [vmem:[#allocation5 + $0xe4] sm:$0xf0]  ;;  %v6246_v33 = vld [vmem:[#allocation5 + $0x54] sm:$0xf0]  ;;  %v4543_v21 = vld [vmem:[#allocation5 + $0x2c8] sm:$0xf0] }
  0xdc   :  { %2161 = vmatpush.bf16.msrb.mxu1 %v4802_v49  ;;  %v4685_v49 = vld [vmem:[#allocation5 + $0x3d0] sm:$0xf] }
  0xdd   :  { %2174 = vmatpush.bf16.msrb.mxu2 %v4994_v50  ;;  %v6360_v50 = vld [vmem:[#allocation5 + $0x3e4] sm:$0xf0] }
  0xde   :  { %2187 = vmatpush.bf16.msrb.mxu3 %v5186_v55  ;;  %v4302_v55 = vor.u32 %v6264_v45, %v4301_v44  ;;  %v4686_v60 = vor.u32 %v6360_v50, %v4685_v49  ;;  %v4205_v44 = vld [vmem:[#allocation5 + $0x10] sm:$0xf]  ;;  %v6240_v45 = vld [vmem:[#allocation5 + $0x24] sm:$0xf0] }
  0xdf   :  { %2149 = vmatpush.bf16.msrb.mxu0 %v4586_v63  ;;  %v1943_v53 = vpop.f32.mrf.mxu0  ;;  %v4469_v63 = vld [vmem:[#allocation5 + $0x220] sm:$0xf]  ;;  %v6288_v49 = vld [vmem:[#allocation5 + $0x1a4] sm:$0xf0]  ;;  %v4589_v50 = vld [vmem:[#allocation5 + $0x310] sm:$0xf] }
  0xe0   :  { %2162 = vmatpush.bf16.msrb.mxu1 %v4778_v4  ;;  %v1944_v57 = vadd.f32 %v1943_v53, %v7091_v54  ;;  %v1956_v58 = vpop.f32.mrf.mxu1  ;;  %v4278_v54 = vor.u32 %v6258_v62, %v4277_v61  ;;  %v4781_v53 = vld [vmem:[#allocation5 + $0x490] sm:$0xf]  ;;  %v4206_v62 = vor.u32 %v6240_v45, %v4205_v44  ;;  %v6504_v45 = vld [vmem:[#allocation5 + $0x864] sm:$0xf0] }
  0xe1   :  { %2175 = vmatpush.bf16.msrb.mxu2 %v4970_v5  ;;  %v4853_v5 = vld [vmem:[#allocation5 + $0x520] sm:$0xf] }
  0xe2   :  { %2188 = vmatpush.bf16.msrb.mxu3 %v5162_v10  ;;  %2150 = vmatmul.bf16.vlgmr.msrb.gmra.mxu0 %v7056_v8  ;;  %v7098_v4 = vadd.f32 %v1956_v58, %v1944_v57  ;;  %v4470_v10 = vor.u32 %v6306_v1, %v4469_v63  ;;  %v4854_v16 = vor.u32 %v6402_v6, %v4853_v5  ;;  %v5141_v58 = vld [vmem:[#allocation5 + $0x760] sm:$0xf]  ;;  %v6522_v63 = vld [vmem:[#allocation5 + $0x8f4] sm:$0xf0]  ;;  %v4375_v1 = vld [vmem:[#allocation5 + $0x178] sm:$0xf0] }
  0xe3   :  { %2194 = vmatpush.bf16.msra.mxu0 %v4374_v11  ;;  %2163 = vmatmul.bf16.vlgmr.msrb.gmra.mxu1 %v7060_v15  ;;  %v4662_v11 = vor.u32 %v6354_v3, %v4661_v2  ;;  %v4398_v2 = vor.u32 %v6288_v49, %v4397_v48  ;;  %v4590_v3 = vor.u32 %v6336_v52, %v4589_v50  ;;  %v6327_v5 = vld [vmem:[#allocation5 + $0x2e4] sm:$0xf]  ;;  %v4567_v6 = vld [vmem:[#allocation5 + $0x2f8] sm:$0xf0]  ;;  %v6309_v48 = vld [vmem:[#allocation5 + $0x254] sm:$0xf] }
  0xe4   :  { %2207 = vmatpush.bf16.msra.mxu1 %v4566_v13  ;;  %2176 = vmatmul.bf16.vlgmr.msrb.gmra.mxu2 %v7068_v32  ;;  %v6252_v13 = vld [vmem:[#allocation5 + $0x84] sm:$0xf0]  ;;  %v4495_v49 = vld [vmem:[#allocation5 + $0x268] sm:$0xf0] }
  0xe5   :  { %2220 = vmatpush.bf16.msra.mxu2 %v4758_v14  ;;  %2189 = vmatmul.bf16.vlgmr.msrb.gmra.mxu3 %v7070_v35  ;;  %v4445_v14 = vld [vmem:[#allocation5 + $0x1f0] sm:$0xf] }
  0xe6   :  { %2233 = vmatpush.bf16.msra.mxu3 %v4950_v20 }
  0xe7   :  { %2195 = vmatpush.bf16.msra.mxu0 %v4350_v27  ;;  %v1969_v20 = vpop.f32.mrf.mxu2  ;;  %v1945_v26 = vpop.f32.mrf.mxu0  ;;  %v4254_v27 = vor.u32 %v6252_v13, %v4253_v12  ;;  %v5117_v12 = vld [vmem:[#allocation5 + $0x730] sm:$0xf]  ;;  %v6468_v13 = vld [vmem:[#allocation5 + $0x744] sm:$0xf0] }
  0xe8   :  { %2208 = vmatpush.bf16.msra.mxu1 %v4542_v28  ;;  %v1970_v23 = vadd.f32 %v1969_v20, %v431_v7  ;;  %v1982_v24 = vpop.f32.mrf.mxu3  ;;  %v1958_v28 = vpop.f32.mrf.mxu1  ;;  %v6321_v20 = vld [vmem:[#allocation5 + $0x2b4] sm:$0xf]  ;;  %v5118_v22 = vor.u32 %v6468_v13, %v5117_v12  ;;  %v5093_v26 = vld [vmem:[#allocation5 + $0x700] sm:$0xf]  ;;  %v6492_v13 = vld [vmem:[#allocation5 + $0x804] sm:$0xf0] }
  0xe9   :  { %2221 = vmatpush.bf16.msra.mxu2 %v4734_v29  ;;  %v4446_v29 = vor.u32 %v6300_v17, %v4445_v14  ;;  %v5309_v14 = vld [vmem:[#allocation5 + $0x8b0] sm:$0xf]  ;;  %v6516_v17 = vld [vmem:[#allocation5 + $0x8c4] sm:$0xf0]  ;;  %v5285_v28 = vld [vmem:[#allocation5 + $0x880] sm:$0xf] }
  0xea   :  { %2234 = vmatpush.bf16.msra.mxu3 %v4926_v34  ;;  %v4421_v34 = vld [vmem:[#allocation5 + $0x1c0] sm:$0xf]  ;;  %v7101_v36 = vadd.f32 %v1982_v24, %v1970_v23  ;;  %v5310_v23 = vor.u32 %v6516_v17, %v5309_v14  ;;  %v4354_v24 = vor.u32 %v6273_v18, %v4351_v19  ;;  %v6249_v14 = vld [vmem:[#allocation5 + $0x74] sm:$0xf] }
  0xeb   :  { %2196 = vmatpush.bf16.msra.mxu0 %v4326_v41  ;;  %v4805_v41 = vld [vmem:[#allocation5 + $0x4c0] sm:$0xf]  ;;  %v4422_v46 = vor.u32 %v6294_v38, %v4421_v34  ;;  %v6315_v34 = vld [vmem:[#allocation5 + $0x284] sm:$0xf]  ;;  %v6297_v19 = vld [vmem:[#allocation5 + $0x1f4] sm:$0xf] }
  0xec   :  { %2209 = vmatpush.bf16.msra.mxu1 %v4518_v42  ;;  %v6390_v42 = vld [vmem:[#allocation5 + $0x4d4] sm:$0xf0] }
  0xed   :  { %2222 = vmatpush.bf16.msra.mxu2 %v4710_v43  ;;  %v4230_v43 = vor.u32 %v6246_v33, %v4229_v31  ;;  %v4806_v51 = vor.u32 %v6390_v42, %v4805_v41  ;;  %v6267_v31 = vld [vmem:[#allocation5 + $0x104] sm:$0xf]  ;;  %v4327_v33 = vld [vmem:[#allocation5 + $0x118] sm:$0xf0]  ;;  %v5069_v41 = vld [vmem:[#allocation5 + $0x6d0] sm:$0xf] }
  0xee   :  { %2235 = vmatpush.bf16.msra.mxu3 %v4902_v47  ;;  %v4614_v47 = vor.u32 %v6342_v40, %v4613_v39  ;;  %v4330_v40 = vor.u32 %v6267_v31, %v4327_v33  ;;  %v6456_v42 = vld [vmem:[#allocation5 + $0x6e4] sm:$0xf0]  ;;  %v6486_v33 = vld [vmem:[#allocation5 + $0x7d4] sm:$0xf0] }
  0xef   :  { %2197 = vmatpush.bf16.msra.mxu0 %v4302_v55  ;;  %v6384_v55 = vld [vmem:[#allocation5 + $0x4a4] sm:$0xf0]  ;;  %v1971_v57 = vpop.f32.mrf.mxu2  ;;  %v5070_v50 = vor.u32 %v6456_v42, %v5069_v41  ;;  %v4973_v41 = vld [vmem:[#allocation5 + $0x610] sm:$0xf] }
  0xf0   :  { %2210 = vmatpush.bf16.msra.mxu1 %v4494_v59  ;;  %v6474_v59 = vld [vmem:[#allocation5 + $0x774] sm:$0xf0]  ;;  %v1984_v61 = vpop.f32.mrf.mxu3  ;;  %v4782_v7 = vor.u32 %v6384_v55, %v4781_v53  ;;  %v5045_v55 = vld [vmem:[#allocation5 + $0x6a0] sm:$0xf]  ;;  %v6432_v42 = vld [vmem:[#allocation5 + $0x624] sm:$0xf0] }
  0xf1   :  { %2223 = vmatpush.bf16.msra.mxu2 %v4686_v60  ;;  %v5333_v60 = vld [vmem:[#allocation5 + $0x8e0] sm:$0xf]  ;;  %v6450_v57 = vld [vmem:[#allocation5 + $0x6b4] sm:$0xf0]  ;;  %v4498_v61 = vor.u32 %v6309_v48, %v4495_v49 }
  0xf2   :  { %2236 = vmatpush.bf16.msra.mxu3 %v4878_v0  ;;  %v6279_v0 = vld [vmem:[#allocation5 + $0x164] sm:$0xf] }
  0xf3   :  { %2198 = vmatpush.bf16.msra.mxu0 %v4278_v54  ;;  %v5142_v54 = vor.u32 %v6474_v59, %v5141_v58  ;;  %v5237_v58 = vld [vmem:[#allocation5 + $0x820] sm:$0xf] }
  0xf4   :  { %2211 = vmatpush.bf16.msra.mxu1 %v4470_v10  ;;  %v5334_v10 = vor.u32 %v6522_v63, %v5333_v60  ;;  %v6255_v63 = vld [vmem:[#allocation5 + $0xa4] sm:$0xf] }
  0xf5   :  { %2224 = vmatpush.bf16.msra.mxu2 %v4662_v11  ;;  %v4378_v11 = vor.u32 %v6279_v0, %v4375_v1  ;;  %v4279_v0 = vld [vmem:[#allocation5 + $0xb8] sm:$0xf0]  ;;  %v6303_v1 = vld [vmem:[#allocation5 + $0x224] sm:$0xf] }
  0xf6   :  { %2237 = vmatpush.bf16.msra.mxu3 %v4854_v16  ;;  %v4570_v16 = vor.u32 %v6327_v5, %v4567_v6  ;;  %v5046_v5 = vor.u32 %v6450_v57, %v5045_v55  ;;  %v6375_v55 = vld [vmem:[#allocation5 + $0x464] sm:$0xf]  ;;  %v4759_v57 = vld [vmem:[#allocation5 + $0x478] sm:$0xf0] }
  0xf7   :  { %2199 = vmatpush.bf16.msra.mxu0 %v4254_v27  ;;  %v6462_v27 = vld [vmem:[#allocation5 + $0x714] sm:$0xf0] }
  0xf8   :  { %2212 = vmatpush.bf16.msra.mxu1 %v4446_v29  ;;  %v4546_v29 = vor.u32 %v6321_v20, %v4543_v21  ;;  %v5094_v38 = vor.u32 %v6462_v27, %v5093_v26  ;;  %v4447_v20 = vld [vmem:[#allocation5 + $0x208] sm:$0xf0]  ;;  %v4997_v27 = vld [vmem:[#allocation5 + $0x640] sm:$0xf] }
  0xf9   :  { %2225 = vmatpush.bf16.msra.mxu2 %v4638_v30  ;;  %v6510_v30 = vld [vmem:[#allocation5 + $0x894] sm:$0xf0]  ;;  %v4450_v31 = vor.u32 %v6297_v19, %v4447_v20 }
  0xfa   :  { %2238 = vmatpush.bf16.msra.mxu3 %v4830_v37  ;;  %v4519_v37 = vld [vmem:[#allocation5 + $0x298] sm:$0xf0]  ;;  %v5286_v39 = vor.u32 %v6510_v30, %v5285_v28  ;;  %v6438_v28 = vld [vmem:[#allocation5 + $0x654] sm:$0xf0] }
  0xfb   :  { %2200 = vmatpush.bf16.msra.mxu0 %v4230_v43  ;;  %v5261_v43 = vld [vmem:[#allocation5 + $0x850] sm:$0xf]  ;;  %v4522_v44 = vor.u32 %v6315_v34, %v4519_v37  ;;  %v6243_v34 = vld [vmem:[#allocation5 + $0x44] sm:$0xf]  ;;  %v4231_v37 = vld [vmem:[#allocation5 + $0x58] sm:$0xf0] }
  0xfc   :  { %2213 = vmatpush.bf16.msra.mxu1 %v4422_v46  ;;  %v6261_v46 = vld [vmem:[#allocation5 + $0xd4] sm:$0xf]  ;;  %v5262_v52 = vor.u32 %v6504_v45, %v5261_v43  ;;  %v5165_v45 = vld [vmem:[#allocation5 + $0x790] sm:$0xf] }
  0xfd   :  { %2226 = vmatpush.bf16.msra.mxu2 %v4614_v47  ;;  %v4303_v47 = vld [vmem:[#allocation5 + $0xe8] sm:$0xf0] }
  0xfe   :  { %2239 = vmatpush.bf16.msra.mxu3 %v4806_v51  ;;  %v4306_v53 = vor.u32 %v6261_v46, %v4303_v47  ;;  %v6480_v46 = vld [vmem:[#allocation5 + $0x7a4] sm:$0xf0]  ;;  %v6237_v47 = vld [vmem:[#allocation5 + $0x14] sm:$0xf] }
  0xff   :  { %2201 = vmatpush.bf16.msra.mxu0 %v4206_v62  ;;  %v1995_v51 = vpop.f32.mrf.mxu0  ;;  %v6498_v62 = vld [vmem:[#allocation5 + $0x834] sm:$0xf0] }
 0x100   :  { %2214 = vmatpush.bf16.msra.mxu1 %v4398_v2  ;;  %v1996_v59 = vadd.f32 %v1995_v51, %v7101_v36  ;;  %v2008_v60 = vpop.f32.mrf.mxu1  ;;  %v4471_v2 = vld [vmem:[#allocation5 + $0x238] sm:$0xf0]  ;;  %v5238_v6 = vor.u32 %v6498_v62, %v5237_v58  ;;  %v6285_v51 = vld [vmem:[#allocation5 + $0x194] sm:$0xf]  ;;  %v6423_v58 = vld [vmem:[#allocation5 + $0x5e4] sm:$0xf] }
 0x101   :  { %2227 = vmatpush.bf16.msra.mxu2 %v4590_v3  ;;  %v4474_v36 = vor.u32 %v6303_v1, %v4471_v2  ;;  %v5143_v62 = vld [vmem:[#allocation5 + $0x778] sm:$0xf0]  ;;  %v6519_v1 = vld [vmem:[#allocation5 + $0x8e4] sm:$0xf] }
 0x102   :  { %2240 = vmatpush.bf16.msra.mxu3 %v4782_v7  ;;  %2202 = vmatmul.bf16.vlgmr.msra.gmra.mxu0 %v7058_v9  ;;  %v2009_v3 = vadd.f32 %v2008_v60, %v1996_v59  ;;  %v4282_v7 = vor.u32 %v6255_v63, %v4279_v0  ;;  %v4974_v59 = vor.u32 %v6432_v42, %v4973_v41  ;;  %v4951_v60 = vld [vmem:[#allocation5 + $0x5f8] sm:$0xf0]  ;;  %v4879_v42 = vld [vmem:[#allocation5 + $0x568] sm:$0xf0] }
 0x103   :  { %2246 = vmatpush.bf16.msrb.mxu0 %v5142_v54  ;;  %2215 = vmatmul.bf16.vlgmr.msra.gmra.mxu1 %v7065_v25  ;;  %v5021_v54 = vld [vmem:[#allocation5 + $0x670] sm:$0xf]  ;;  %v5166_v63 = vor.u32 %v6480_v46, %v5165_v45  ;;  %v5335_v2 = vld [vmem:[#allocation5 + $0x8f8] sm:$0xf0]  ;;  %v6501_v45 = vld [vmem:[#allocation5 + $0x854] sm:$0xf] }
 0x104   :  { %2259 = vmatpush.bf16.msrb.mxu1 %v5334_v10  ;;  %2228 = vmatmul.bf16.vlgmr.msra.gmra.mxu2 %v7056_v8  ;;  %v6444_v10 = vld [vmem:[#allocation5 + $0x684] sm:$0xf0] }
 0x105   :  { %2272 = vmatpush.bf16.msrb.mxu2 %v4378_v11  ;;  %2241 = vmatmul.bf16.vlgmr.msra.gmra.mxu3 %v7060_v15  ;;  %v5213_v11 = vld [vmem:[#allocation5 + $0x7f0] sm:$0xf]  ;;  %v5022_v21 = vor.u32 %v6444_v10, %v5021_v54  ;;  %v6369_v54 = vld [vmem:[#allocation5 + $0x434] sm:$0xf]  ;;  %v4735_v10 = vld [vmem:[#allocation5 + $0x448] sm:$0xf0] }
 0x106   :  { %2285 = vmatpush.bf16.msrb.mxu3 %v4570_v16  ;;  %v4255_v16 = vld [vmem:[#allocation5 + $0x88] sm:$0xf0] }
 0x107   :  { %2247 = vmatpush.bf16.msrb.mxu0 %v5118_v22  ;;  %v2021_v12 = vpop.f32.mrf.mxu2  ;;  %v4258_v26 = vor.u32 %v6249_v14, %v4255_v16  ;;  %v5119_v14 = vld [vmem:[#allocation5 + $0x748] sm:$0xf0]  ;;  %v6513_v16 = vld [vmem:[#allocation5 + $0x8b4] sm:$0xf] }
 0x108   :  { %2260 = vmatpush.bf16.msrb.mxu1 %v5310_v23  ;;  %v2022_v17 = vadd.f32 %v2021_v12, %v2009_v3  ;;  %v2034_v18 = vpop.f32.mrf.mxu3  ;;  %v1997_v23 = vpop.f32.mrf.mxu0  ;;  %v5338_v12 = vor.u32 %v6519_v1, %v5335_v2  ;;  %v4639_v1 = vld [vmem:[#allocation5 + $0x388] sm:$0xf0]  ;;  %v6393_v2 = vld [vmem:[#allocation5 + $0x4f4] sm:$0xf] }
 0x109   :  { %2273 = vmatpush.bf16.msrb.mxu2 %v4354_v24  ;;  %v5214_v24 = vor.u32 %v6492_v13, %v5213_v11  ;;  %v2010_v30 = vpop.f32.mrf.mxu1  ;;  %v6417_v11 = vld [vmem:[#allocation5 + $0x5b4] sm:$0xf]  ;;  %v4711_v23 = vld [vmem:[#allocation5 + $0x418] sm:$0xf0] }
 0x10a   :  { %2286 = vmatpush.bf16.msrb.mxu3 %v4546_v29  ;;  %v7108_v22 = vadd.f32 %v2034_v18, %v2022_v17  ;;  %v5189_v29 = vld [vmem:[#allocation5 + $0x7c0] sm:$0xf]  ;;  %v6465_v13 = vld [vmem:[#allocation5 + $0x734] sm:$0xf]  ;;  %v5311_v17 = vld [vmem:[#allocation5 + $0x8c8] sm:$0xf0]  ;;  %v4738_v18 = vor.u32 %v6369_v54, %v4735_v10 }
 0x10b   :  { %2248 = vmatpush.bf16.msrb.mxu0 %v5094_v38  ;;  %v6291_v38 = vld [vmem:[#allocation5 + $0x1c4] sm:$0xf]  ;;  %v5190_v43 = vor.u32 %v6486_v33, %v5189_v29  ;;  %v5122_v20 = vor.u32 %v6465_v13, %v5119_v14  ;;  %v5095_v29 = vld [vmem:[#allocation5 + $0x718] sm:$0xf0]  ;;  %v6489_v10 = vld [vmem:[#allocation5 + $0x7f4] sm:$0xf] }
 0x10c   :  { %2261 = vmatpush.bf16.msrb.mxu1 %v5286_v39  ;;  %v4423_v39 = vld [vmem:[#allocation5 + $0x1d8] sm:$0xf0]  ;;  %v6507_v30 = vld [vmem:[#allocation5 + $0x884] sm:$0xf] }
 0x10d   :  { %2274 = vmatpush.bf16.msrb.mxu2 %v4330_v40  ;;  %v4998_v40 = vor.u32 %v6438_v28, %v4997_v27  ;;  %v4426_v49 = vor.u32 %v6291_v38, %v4423_v39  ;;  %v4903_v27 = vld [vmem:[#allocation5 + $0x598] sm:$0xf0]  ;;  %v6459_v28 = vld [vmem:[#allocation5 + $0x704] sm:$0xf]  ;;  %v6357_v38 = vld [vmem:[#allocation5 + $0x3d4] sm:$0xf] }
 0x10e   :  { %2287 = vmatpush.bf16.msrb.mxu3 %v4522_v44  ;;  %v4234_v44 = vor.u32 %v6243_v34, %v4231_v37  ;;  %v5098_v37 = vor.u32 %v6459_v28, %v5095_v29  ;;  %v4687_v39 = vld [vmem:[#allocation5 + $0x3e8] sm:$0xf0]  ;;  %v5191_v28 = vld [vmem:[#allocation5 + $0x7d8] sm:$0xf0] }
 0x10f   :  { %2249 = vmatpush.bf16.msrb.mxu0 %v5070_v50  ;;  %v2023_v48 = vpop.f32.mrf.mxu2  ;;  %v4207_v50 = vld [vmem:[#allocation5 + $0x28] sm:$0xf0] }
 0x110   :  { %2262 = vmatpush.bf16.msrb.mxu1 %v5262_v52  ;;  %v4399_v52 = vld [vmem:[#allocation5 + $0x1a8] sm:$0xf0]  ;;  %v4210_v0 = vor.u32 %v6237_v47, %v4207_v50  ;;  %v4690_v47 = vor.u32 %v6357_v38, %v4687_v39  ;;  %v6351_v50 = vld [vmem:[#allocation5 + $0x3a4] sm:$0xf]  ;;  %v6429_v39 = vld [vmem:[#allocation5 + $0x614] sm:$0xf] }
 0x111   :  { %2275 = vmatpush.bf16.msrb.mxu2 %v4306_v53  ;;  %v2036_v53 = vpop.f32.mrf.mxu3  ;;  %v4402_v3 = vor.u32 %v6285_v51, %v4399_v52  ;;  %v4663_v51 = vld [vmem:[#allocation5 + $0x3b8] sm:$0xf0]  ;;  %v6399_v52 = vld [vmem:[#allocation5 + $0x524] sm:$0xf]  ;;  %v4783_v38 = vld [vmem:[#allocation5 + $0x4a8] sm:$0xf0] }
 0x112   :  { %2288 = vmatpush.bf16.msrb.mxu3 %v4498_v61  ;;  %v6471_v61 = vld [vmem:[#allocation5 + $0x764] sm:$0xf] }
 0x113   :  { %2250 = vmatpush.bf16.msrb.mxu0 %v5046_v5  ;;  %v4762_v5 = vor.u32 %v6375_v55, %v4759_v57  ;;  %v4855_v55 = vld [vmem:[#allocation5 + $0x538] sm:$0xf0]  ;;  %v6447_v57 = vld [vmem:[#allocation5 + $0x6a4] sm:$0xf] }
 0x114   :  { %2263 = vmatpush.bf16.msrb.mxu1 %v5238_v6  ;;  %v4954_v6 = vor.u32 %v6423_v58, %v4951_v60  ;;  %v5047_v58 = vld [vmem:[#allocation5 + $0x6b8] sm:$0xf0] }
 0x115   :  { %2276 = vmatpush.bf16.msrb.mxu2 %v4282_v7  ;;  %v5146_v7 = vor.u32 %v6471_v61, %v5143_v62  ;;  %v5239_v60 = vld [vmem:[#allocation5 + $0x838] sm:$0xf0]  ;;  %v4666_v61 = vor.u32 %v6351_v50, %v4663_v51  ;;  %v4858_v62 = vor.u32 %v6399_v52, %v4855_v55  ;;  %v6585_v51 = vld [vmem:[#allocation8 + $0x1ec] sm:$0xf0]  ;;  %v5709_v52 = vld [vmem:[#allocation8 + $0x2e0] sm:$0xf] }
 0x116   :  { %2289 = vmatpush.bf16.msrb.mxu3 %v4474_v36  ;;  %v4927_v36 = vld [vmem:[#allocation5 + $0x5c8] sm:$0xf0] }
 0x117   :  { %2251 = vmatpush.bf16.msrb.mxu0 %v5022_v21  ;;  %v4930_v19 = vor.u32 %v6417_v11, %v4927_v36  ;;  %v6363_v21 = vld [vmem:[#allocation5 + $0x404] sm:$0xf]  ;;  %v5215_v11 = vld [vmem:[#allocation5 + $0x808] sm:$0xf0] }
 0x118   :  { %2264 = vmatpush.bf16.msrb.mxu1 %v5214_v24  ;;  %v6411_v24 = vld [vmem:[#allocation5 + $0x584] sm:$0xf]  ;;  %v4714_v33 = vor.u32 %v6363_v21, %v4711_v23  ;;  %v5218_v21 = vor.u32 %v6489_v10, %v5215_v11  ;;  %v4807_v23 = vld [vmem:[#allocation5 + $0x4d8] sm:$0xf0]  ;;  %v6545_v11 = vld [vmem:[#allocation8 + $0xac] sm:$0xf0] }
 0x119   :  { %2277 = vmatpush.bf16.msrb.mxu2 %v4258_v26  ;;  %v5314_v26 = vor.u32 %v6513_v16, %v5311_v17  ;;  %v4906_v34 = vor.u32 %v6411_v24, %v4903_v27  ;;  %v6435_v24 = vld [vmem:[#allocation5 + $0x644] sm:$0xf] }
 0x11a   :  { %2290 = vmatpush.bf16.msrb.mxu3 %v4450_v31  ;;  %v5287_v31 = vld [vmem:[#allocation5 + $0x898] sm:$0xf0]  ;;  %v6483_v27 = vld [vmem:[#allocation5 + $0x7c4] sm:$0xf] }
 0x11b   :  { %2252 = vmatpush.bf16.msrb.mxu0 %v4998_v40  ;;  %v6405_v40 = vld [vmem:[#allocation5 + $0x554] sm:$0xf]  ;;  %v5290_v41 = vor.u32 %v6507_v30, %v5287_v31  ;;  %v4591_v31 = vld [vmem:[#allocation5 + $0x328] sm:$0xf0]  ;;  %v5421_v10 = vld [vmem:[#allocation8 + $0xa0] sm:$0xf] }
 0x11c   :  { %2265 = vmatpush.bf16.msrb.mxu1 %v5190_v43  ;;  %v6453_v43 = vld [vmem:[#allocation5 + $0x6d4] sm:$0xf] }
 0x11d   :  { %2278 = vmatpush.bf16.msrb.mxu2 %v4234_v44  ;;  %v5071_v44 = vld [vmem:[#allocation5 + $0x6e8] sm:$0xf0]  ;;  %v6333_v30 = vld [vmem:[#allocation5 + $0x314] sm:$0xf] }
 0x11e   :  { %2291 = vmatpush.bf16.msrb.mxu3 %v4426_v49  ;;  %v5074_v49 = vor.u32 %v6453_v43, %v5071_v44  ;;  %v6477_v43 = vld [vmem:[#allocation5 + $0x794] sm:$0xf]  ;;  %v5167_v44 = vld [vmem:[#allocation5 + $0x7a8] sm:$0xf0]  ;;  %v4594_v50 = vor.u32 %v6333_v30, %v4591_v31 }
 0x11f   :  { %2253 = vmatpush.bf16.msrb.mxu0 %v4974_v59  ;;  %v7114_v46 = vpop.f32.mrf.mxu0  ;;  %v6495_v59 = vld [vmem:[#allocation5 + $0x824] sm:$0xf]  ;;  %v6641_v30 = vld [vmem:[#allocation8 + $0x3ac] sm:$0xf0] }
 0x120   :  { %2266 = vmatpush.bf16.msrb.mxu1 %v5166_v63  ;;  %v7116_v48 = vpop.f32.mrf.mxu1  ;;  %v5050_v63 = vor.u32 %v6447_v57, %v5047_v58  ;;  %v5170_v58 = vor.u32 %v6477_v43, %v5167_v44  ;;  %v6573_v31 = vld [vmem:[#allocation8 + $0x18c] sm:$0xf0]  ;;  %v5517_v43 = vld [vmem:[#allocation8 + $0x160] sm:$0xf] }
 0x121   :  { %2279 = vmatpush.bf16.msrb.mxu2 %v4210_v0  ;;  %v6345_v0 = vld [vmem:[#allocation5 + $0x374] sm:$0xf]  ;;  %v5789_v44 = vld [vmem:[#allocation8 + $0x380] sm:$0xf] }
 0x122   :  { %2292 = vmatpush.bf16.msrb.mxu3 %v4402_v3  ;;  %2254 = vmatmul.bf16.vlgmr.msrb.gmra.mxu0 %v7068_v32  ;;  %v5242_v3 = vor.u32 %v6495_v59, %v5239_v60  ;;  %v4642_v13 = vor.u32 %v6345_v0, %v4639_v1  ;;  %v5437_v60 = vld [vmem:[#allocation8 + $0xc0] sm:$0xf] }
 0x123   :  { %2298 = vmatpush.bf16.msra.mxu0 %v4762_v5  ;;  %2267 = vmatmul.bf16.vlgmr.msrb.gmra.mxu1 %v7070_v35  ;;  %v4831_v5 = vld [vmem:[#allocation5 + $0x508] sm:$0xf0]  ;;  %v5565_v0 = vld [vmem:[#allocation8 + $0x1c0] sm:$0xf] }
 0x124   :  { %2311 = vmatpush.bf16.msra.mxu1 %v4954_v6  ;;  %2280 = vmatmul.bf16.vlgmr.msrb.gmra.mxu2 %v7058_v9  ;;  %v5263_v9 = vld [vmem:[#allocation5 + $0x868] sm:$0xf0]  ;;  %v6441_v6 = vld [vmem:[#allocation5 + $0x674] sm:$0xf]  ;;  %v4834_v16 = vor.u32 %v6393_v2, %v4831_v5  ;;  %v5837_v1 = vld [vmem:[#allocation8 + $0x3e0] sm:$0xf] }
 0x125   :  { %2324 = vmatpush.bf16.msra.mxu2 %v5146_v7  ;;  %2293 = vmatmul.bf16.vlgmr.msrb.gmra.mxu3 %v7065_v25  ;;  %v4882_v25 = vor.u32 %v6405_v40, %v4879_v42  ;;  %v5266_v53 = vor.u32 %v6501_v45, %v5263_v9  ;;  %v5023_v7 = vld [vmem:[#allocation5 + $0x688] sm:$0xf0]  ;;  %v432_v40 = vperm.slane %v7088_v56, 2  ;;  %v5453_v9 = vld [vmem:[#allocation8 + $0xe0] sm:$0xf] }
 0x126   :  { %2337 = vmatpush.bf16.msra.mxu3 %v5338_v12  ;;  %v5026_v17 = vor.u32 %v6441_v6, %v5023_v7  ;;  %v4975_v42 = vld [vmem:[#allocation5 + $0x628] sm:$0xf0]  ;;  %v6649_v2 = vld [vmem:[#allocation8 + $0x3ec] sm:$0xf0]  ;;  %v5693_v5 = vld [vmem:[#allocation8 + $0x2c0] sm:$0xf] }
 0x127   :  { %2299 = vmatpush.bf16.msra.mxu0 %v4738_v18  ;;  %v7118_v54 = vpop.f32.mrf.mxu2  ;;  %v2049_v12 = vpop.f32.mrf.mxu0  ;;  %v6339_v18 = vld [vmem:[#allocation5 + $0x344] sm:$0xf]  ;;  %v4978_v57 = vor.u32 %v6429_v39, %v4975_v42  ;;  %v2048_v56 = vadd.f32 %v7114_v46, %v432_v40  ;;  %v6613_v6 = vld [vmem:[#allocation8 + $0x2cc] sm:$0xf0] }
 0x128   :  { %2312 = vmatpush.bf16.msra.mxu1 %v4930_v19  ;;  %v7120_v36 = vpop.f32.mrf.mxu3  ;;  %v2062_v14 = vpop.f32.mrf.mxu1  ;;  %v4615_v19 = vld [vmem:[#allocation5 + $0x358] sm:$0xf0]  ;;  %v5838_v12 = vor.u32 %v6649_v2, %v5837_v1 }
 0x129   :  { %2325 = vmatpush.bf16.msra.mxu2 %v5122_v20  ;;  %v6387_v20 = vld [vmem:[#allocation5 + $0x4c4] sm:$0xf]  ;;  %v4618_v29 = vor.u32 %v6339_v18, %v4615_v19  ;;  %v2061_v7 = vadd.f32 %v7116_v48, %v2048_v56  ;;  %v5694_v14 = vor.u32 %v6613_v6, %v5693_v5  ;;  %v6645_v18 = vld [vmem:[#allocation8 + $0x3cc] sm:$0xf0] }
 0x12a   :  { %2338 = vmatpush.bf16.msra.mxu3 %v5314_v26  ;;  %v4999_v26 = vld [vmem:[#allocation5 + $0x658] sm:$0xf0]  ;;  %v6577_v19 = vld [vmem:[#allocation8 + $0x1ac] sm:$0xf0]  ;;  %v5773_v56 = vld [vmem:[#allocation8 + $0x360] sm:$0xf] }
 0x12b   :  { %2300 = vmatpush.bf16.msra.mxu0 %v4714_v33  ;;  %v6381_v33 = vld [vmem:[#allocation5 + $0x494] sm:$0xf] }
 0x12c   :  { %2313 = vmatpush.bf16.msra.mxu1 %v4906_v34  ;;  %v4810_v34 = vor.u32 %v6387_v20, %v4807_v23  ;;  %v4786_v55 = vor.u32 %v6381_v33, %v4783_v38  ;;  %v5677_v20 = vld [vmem:[#allocation8 + $0x2a0] sm:$0xf]  ;;  %v6609_v48 = vld [vmem:[#allocation8 + $0x2ac] sm:$0xf0]  ;;  %v5422_v23 = vor.u32 %v6545_v11, %v5421_v10 }
 0x12d   :  { %2326 = vmatpush.bf16.msra.mxu2 %v5098_v37  ;;  %v5002_v37 = vor.u32 %v6435_v24, %v4999_v26  ;;  %v5405_v24 = vld [vmem:[#allocation8 + $0x80] sm:$0xf]  ;;  %v6541_v26 = vld [vmem:[#allocation8 + $0x8c] sm:$0xf0] }
 0x12e   :  { %2339 = vmatpush.bf16.msra.mxu3 %v5290_v41  ;;  %v5194_v41 = vor.u32 %v6483_v27, %v5191_v28  ;;  %v5678_v28 = vor.u32 %v6609_v48, %v5677_v20  ;;  %v5661_v33 = vld [vmem:[#allocation8 + $0x280] sm:$0xf]  ;;  %v6537_v38 = vld [vmem:[#allocation8 + $0x6c] sm:$0xf0] }
 0x12f   :  { %2301 = vmatpush.bf16.msra.mxu0 %v4690_v47  ;;  %v2075_v45 = vpop.f32.mrf.mxu2  ;;  %v6553_v47 = vld [vmem:[#allocation8 + $0xec] sm:$0xf0]  ;;  %v5485_v11 = vld [vmem:[#allocation8 + $0x120] sm:$0xf] }
 0x130   :  { %2314 = vmatpush.bf16.msra.mxu1 %v4882_v25  ;;  %v5581_v25 = vld [vmem:[#allocation8 + $0x1e0] sm:$0xf]  ;;  %v5454_v59 = vor.u32 %v6553_v47, %v5453_v9  ;;  %v6637_v45 = vld [vmem:[#allocation8 + $0x38c] sm:$0xf0] }
 0x131   :  { %2327 = vmatpush.bf16.msra.mxu2 %v5074_v49  ;;  %v2088_v49 = vpop.f32.mrf.mxu3  ;;  %v6569_v9 = vld [vmem:[#allocation8 + $0x16c] sm:$0xf0]  ;;  %v5645_v47 = vld [vmem:[#allocation8 + $0x260] sm:$0xf] }
 0x132   :  { %2340 = vmatpush.bf16.msra.mxu3 %v5266_v53  ;;  %v6617_v53 = vld [vmem:[#allocation8 + $0x2ec] sm:$0xf0]  ;;  %v5469_v48 = vld [vmem:[#allocation8 + $0x100] sm:$0xf] }
 0x133   :  { %2302 = vmatpush.bf16.msra.mxu0 %v4666_v61  ;;  %v6549_v61 = vld [vmem:[#allocation8 + $0xcc] sm:$0xf0] }
 0x134   :  { %2315 = vmatpush.bf16.msra.mxu1 %v4858_v62  ;;  %v5582_v62 = vor.u32 %v6585_v51, %v5581_v25  ;;  %v5438_v46 = vor.u32 %v6549_v61, %v5437_v60  ;;  %v6601_v25 = vld [vmem:[#allocation8 + $0x26c] sm:$0xf0]  ;;  %v5629_v60 = vld [vmem:[#allocation8 + $0x240] sm:$0xf] }
 0x135   :  { %2328 = vmatpush.bf16.msra.mxu2 %v5050_v63  ;;  %v5710_v63 = vor.u32 %v6617_v53, %v5709_v52  ;;  %v6533_v51 = vld [vmem:[#allocation8 + $0x4c] sm:$0xf0]  ;;  %v5790_v52 = vor.u32 %v6637_v45, %v5789_v44  ;;  %v5518_v53 = vor.u32 %v6569_v9, %v5517_v43  ;;  %v5725_v43 = vld [vmem:[#allocation8 + $0x300] sm:$0xf] }
 0x136   :  { %2341 = vmatpush.bf16.msra.mxu3 %v5242_v3  ;;  %v6581_v3 = vld [vmem:[#allocation8 + $0x1cc] sm:$0xf0] }
 0x137   :  { %2303 = vmatpush.bf16.msra.mxu0 %v4642_v13  ;;  %v5566_v13 = vor.u32 %v6581_v3, %v5565_v0  ;;  %v6597_v61 = vld [vmem:[#allocation8 + $0x24c] sm:$0xf0]  ;;  %v5357_v3 = vld [vmem:[#allocation8 + $0x20] sm:$0xf] }
 0x138   :  { %2316 = vmatpush.bf16.msra.mxu1 %v4834_v16  ;;  %v5549_v16 = vld [vmem:[#allocation8 + $0x1a0] sm:$0xf]  ;;  %v6529_v5 = vld [vmem:[#allocation8 + $0x2c] sm:$0xf0]  ;;  %v5630_v10 = vor.u32 %v6597_v61, %v5629_v60  ;;  %v5423_v60 = vld [vmem:[#allocation8 + $0xb0] sm:$0xf0] }
 0x139   :  { %2329 = vmatpush.bf16.msra.mxu2 %v5026_v17  ;;  %v5821_v17 = vld [vmem:[#allocation8 + $0x3c0] sm:$0xf]  ;;  %v6525_v20 = vld [vmem:[#allocation8 + $0xc] sm:$0xf0]  ;;  %v6579_v61 = vld [vmem:[#allocation8 + $0x1c4] sm:$0xf] }
 0x13a   :  { %2342 = vmatpush.bf16.msra.mxu3 %v5218_v21  ;;  %v2074_v21 = vadd.f32 %v7118_v54, %v2061_v7  ;;  %v5822_v27 = vor.u32 %v6645_v18, %v5821_v17  ;;  %v5406_v54 = vor.u32 %v6541_v26, %v5405_v24  ;;  %v6593_v17 = vld [vmem:[#allocation8 + $0x22c] sm:$0xf0]  ;;  %v5358_v18 = vor.u32 %v6529_v5, %v5357_v3 }
 0x13b   :  { %2304 = vmatpush.bf16.msra.mxu0 %v4618_v29  ;;  %v5805_v29 = vld [vmem:[#allocation8 + $0x3a0] sm:$0xf]  ;;  %v6557_v26 = vld [vmem:[#allocation8 + $0x10c] sm:$0xf0] }
 0x13c   :  { %2317 = vmatpush.bf16.msra.mxu1 %v4810_v34  ;;  %v5806_v40 = vor.u32 %v6641_v30, %v5805_v29  ;;  %v6551_v29 = vld [vmem:[#allocation8 + $0xe4] sm:$0xf]  ;;  %v5455_v30 = vld [vmem:[#allocation8 + $0xf0] sm:$0xf0]  ;;  %v6621_v44 = vld [vmem:[#allocation8 + $0x30c] sm:$0xf0] }
 0x13d   :  { %2330 = vmatpush.bf16.msra.mxu2 %v5002_v37  ;;  %v5389_v37 = vld [vmem:[#allocation8 + $0x60] sm:$0xf]  ;;  %v6673_v3 = vld [vmem:[#allocation8 + $0x4ac] sm:$0xf0] }
 0x13e   :  { %2343 = vmatpush.bf16.msra.mxu3 %v5194_v41 }
 0x13f   :  { %2305 = vmatpush.bf16.msra.mxu0 %v4594_v50  ;;  %v2099_v34 = vpop.f32.mrf.mxu0  ;;  %v5373_v50 = vld [vmem:[#allocation8 + $0x40] sm:$0xf] }
 0x140   :  { %2318 = vmatpush.bf16.msra.mxu1 %v4786_v55  ;;  %v2112_v39 = vpop.f32.mrf.mxu1  ;;  %v5646_v55 = vor.u32 %v6601_v25, %v5645_v47  ;;  %v5374_v2 = vor.u32 %v6533_v51, %v5373_v50  ;;  %v5439_v47 = vld [vmem:[#allocation8 + $0xd0] sm:$0xf0]  ;;  %v6583_v25 = vld [vmem:[#allocation8 + $0x1e4] sm:$0xf]  ;;  %v5949_v50 = vld [vmem:[#allocation8 + $0x4c0] sm:$0xf] }
 0x141   :  { %2331 = vmatpush.bf16.msra.mxu2 %v4978_v57  ;;  %v5501_v57 = vld [vmem:[#allocation8 + $0x140] sm:$0xf]  ;;  %v6677_v51 = vld [vmem:[#allocation8 + $0x4cc] sm:$0xf0] }
 0x142   :  { %2344 = vmatpush.bf16.msra.mxu3 %v5170_v58  ;;  %2306 = vmatmul.bf16.vlgmr.msra.gmra.mxu0 %v7056_v8  ;;  %v5550_v8 = vor.u32 %v6577_v19, %v5549_v16  ;;  %v6633_v58 = vld [vmem:[#allocation8 + $0x36c] sm:$0xf0]  ;;  %v5613_v16 = vld [vmem:[#allocation8 + $0x220] sm:$0xf] }
 0x143   :  { %3524 = vmatpush.bf16.msrb.mxu0 %v5454_v59  ;;  %2319 = vmatmul.bf16.vlgmr.msra.gmra.mxu1 %v7060_v15  ;;  %v5533_v15 = vld [vmem:[#allocation8 + $0x180] sm:$0xf]  ;;  %v6565_v59 = vld [vmem:[#allocation8 + $0x14c] sm:$0xf0]  ;;  %v5774_v6 = vor.u32 %v6633_v58, %v5773_v56  ;;  %v5614_v24 = vor.u32 %v6593_v17, %v5613_v16  ;;  %v6543_v56 = vld [vmem:[#allocation8 + $0xa4] sm:$0xf] }
 0x144   :  { %3537 = vmatpush.bf16.msrb.mxu1 %v5582_v62  ;;  %2332 = vmatmul.bf16.vlgmr.msra.gmra.mxu2 %v7068_v32  ;;  %v6605_v32 = vld [vmem:[#allocation8 + $0x28c] sm:$0xf0]  ;;  %v5534_v41 = vor.u32 %v6573_v31, %v5533_v15  ;;  %v5341_v19 = vld [vmem:[#allocation8] sm:$0xf]  ;;  %v5426_v5 = vor.u32 %v6543_v56, %v5423_v60  ;;  %v6679_v56 = vld [vmem:[#allocation8 + $0x4e4] sm:$0xf] }
 0x145   :  { %3550 = vmatpush.bf16.msrb.mxu2 %v5710_v63  ;;  %2345 = vmatmul.bf16.vlgmr.msra.gmra.mxu3 %v7070_v35  ;;  %v2087_v35 = vadd.f32 %v7120_v36, %v2074_v21  ;;  %v5662_v42 = vor.u32 %v6605_v32, %v5661_v33  ;;  %v5390_v36 = vor.u32 %v6537_v38, %v5389_v37  ;;  %v6589_v15 = vld [vmem:[#allocation8 + $0x20c] sm:$0xf0]  ;;  %v5965_v33 = vld [vmem:[#allocation8 + $0x4e0] sm:$0xf]  ;;  %v7137_v38 = vld [vmem:[#allocation7] sm:$0x3f] }
 0x146   :  { %3563 = vmatpush.bf16.msrb.mxu3 %v5838_v12  ;;  %v5757_v12 = vld [vmem:[#allocation8 + $0x340] sm:$0xf]  ;;  %v6681_v32 = vld [vmem:[#allocation8 + $0x4ec] sm:$0xf0] }
 0x147   :  { %3525 = vmatpush.bf16.msrb.mxu0 %v5438_v46  ;;  %v2100_v49 = vadd.f32 %v2099_v34, %v2087_v35  ;;  %v7131_v62 = vpop.f32.mrf.mxu2  ;;  %v2101_v1 = vpop.f32.mrf.mxu0  ;;  %v5502_v46 = vor.u32 %v6565_v59, %v5501_v57  ;;  %v5342_v35 = vor.u32 %v6525_v20, %v5341_v19  ;;  %v5966_v45 = vor.u32 %v6681_v32, %v5965_v33  ;;  %v5519_v33 = vld [vmem:[#allocation8 + $0x170] sm:$0xf0] }
 0x148   :  { %3538 = vmatpush.bf16.msrb.mxu1 %v5566_v13  ;;  %v7133_v0 = vpop.f32.mrf.mxu3  ;;  %v2114_v7 = vpop.f32.mrf.mxu1  ;;  %v6629_v13 = vld [vmem:[#allocation8 + $0x34c] sm:$0xf0]  ;;  %v5950_v1 = vor.u32 %v6677_v51, %v5949_v50  ;;  %v6523_v51 = vld [vmem:[#allocation8 + $0x4] sm:$0xf] }
 0x149   :  { %3551 = vmatpush.bf16.msrb.mxu2 %v5694_v14  ;;  %v2113_v63 = vadd.f32 %v2112_v39, %v2100_v49  ;;  %v6561_v14 = vld [vmem:[#allocation8 + $0x12c] sm:$0xf0]  ;;  %v5758_v21 = vor.u32 %v6629_v13, %v5757_v12  ;;  %v433_v39 = vperm.slane %v7137_v38, 3  ;;  %v5583_v49 = vld [vmem:[#allocation8 + $0x1f0] sm:$0xf0] }
 0x14a   :  { %3564 = vmatpush.bf16.msrb.mxu3 %v5822_v27  ;;  %v5741_v27 = vld [vmem:[#allocation8 + $0x320] sm:$0xf]  ;;  %v5586_v58 = vor.u32 %v6583_v25, %v5583_v49  ;;  %v6657_v49 = vld [vmem:[#allocation8 + $0x42c] sm:$0xf0] }
 0x14b   :  { %3526 = vmatpush.bf16.msrb.mxu0 %v5422_v23  ;;  %6762 = vtanh.f32 %v2113_v63  ;;  %v5486_v23 = vor.u32 %v6561_v14, %v5485_v11  ;;  %v2126_v59 = vadd.f32 %v7131_v62, %v433_v39  ;;  %v5567_v63 = vld [vmem:[#allocation8 + $0x1d0] sm:$0xf0]  ;;  %v5917_v13 = vld [vmem:[#allocation8 + $0x480] sm:$0xf]  ;;  %v6669_v14 = vld [vmem:[#allocation8 + $0x48c] sm:$0xf0] }
 0x14c   :  { %3539 = vmatpush.bf16.msrb.mxu1 %v5550_v8  ;;  %6764 = vtanh.f32 %v7098_v4  ;;  %v6625_v8 = vld [vmem:[#allocation8 + $0x32c] sm:$0xf0]  ;;  %v5570_v7 = vor.u32 %v6579_v61, %v5567_v63  ;;  %v5551_v11 = vld [vmem:[#allocation8 + $0x1b0] sm:$0xf0]  ;;  %v5869_v25 = vld [vmem:[#allocation8 + $0x420] sm:$0xf] }
 0x14d   :  { %3552 = vmatpush.bf16.msrb.mxu2 %v5678_v28  ;;  %6766 = vtanh.f32 %v7108_v22  ;;  %v5597_v28 = vld [vmem:[#allocation8 + $0x200] sm:$0xf]  ;;  %v5742_v34 = vor.u32 %v6625_v8, %v5741_v27  ;;  %v2139_v62 = vadd.f32 %v7133_v0, %v2126_v59  ;;  %v5918_v0 = vor.u32 %v6669_v14, %v5917_v13  ;;  %v6665_v27 = vld [vmem:[#allocation8 + $0x46c] sm:$0xf0]  ;;  %v5487_v59 = vld [vmem:[#allocation8 + $0x130] sm:$0xf0] }
 0x14e   :  { %3565 = vmatpush.bf16.msrb.mxu3 %v5806_v40  ;;  %v5598_v37 = vor.u32 %v6589_v15, %v5597_v28  ;;  %v6531_v15 = vld [vmem:[#allocation8 + $0x44] sm:$0xf]  ;;  %v5870_v61 = vor.u32 %v6657_v49, %v5869_v25  ;;  %v5967_v63 = vld [vmem:[#allocation8 + $0x4f0] sm:$0xf0] }
 0x14f   :  { %3527 = vmatpush.bf16.msrb.mxu0 %v5406_v54  ;;  %v2127_v4 = vpop.f32.mrf.mxu2  ;;  %v5470_v54 = vor.u32 %v6557_v26, %v5469_v48  ;;  %v5901_v26 = vld [vmem:[#allocation8 + $0x460] sm:$0xf]  ;;  %v5970_v13 = vor.u32 %v6679_v56, %v5967_v63  ;;  %v5471_v14 = vld [vmem:[#allocation8 + $0x110] sm:$0xf0]  ;;  %v6663_v49 = vld [vmem:[#allocation8 + $0x464] sm:$0xf] }
 0x150   :  { %3540 = vmatpush.bf16.msrb.mxu1 %v5534_v41  ;;  %v2140_v31 = vpop.f32.mrf.mxu3  ;;  %v5458_v41 = vor.u32 %v6551_v29, %v5455_v30  ;;  %v5375_v30 = vld [vmem:[#allocation8 + $0x50] sm:$0xf0]  ;;  %v5902_v32 = vor.u32 %v6665_v27, %v5901_v26 }
 0x151   :  { %3553 = vmatpush.bf16.msrb.mxu2 %v5662_v42  ;;  %v6763_v22 = vpop.eup %6762  ;;  %v6547_v42 = vld [vmem:[#allocation8 + $0xc4] sm:$0xf]  ;;  %v5378_v39 = vor.u32 %v6531_v15, %v5375_v30  ;;  %v6077_v15 = vld [vmem:[#allocation8 + $0x5c0] sm:$0xf]  ;;  %v5903_v56 = vld [vmem:[#allocation8 + $0x470] sm:$0xf0] }
 0x152   :  { %3566 = vmatpush.bf16.msrb.mxu3 %v5790_v52  ;;  %v6765_v40 = vpop.eup %6764  ;;  %v5442_v57 = vor.u32 %v6547_v42, %v5439_v47  ;;  %v6567_v31 = vld [vmem:[#allocation8 + $0x164] sm:$0xf]  ;;  %v6047_v63 = vld [vmem:[#allocation8 + $0x590] sm:$0xf0] }
 0x153   :  { %3528 = vmatpush.bf16.msrb.mxu0 %v5390_v36  ;;  %v6767_v9 = vpop.eup %6766  ;;  %v7140_v36 = vpack.c.bf16 %v6763_v22, %v6763_v22  ;;  %v7142_v52 = vpack.c.bf16 %v6765_v40, %v6765_v40  ;;  %v5885_v22 = vld [vmem:[#allocation8 + $0x440] sm:$0xf]  ;;  %v6527_v40 = vld [vmem:[#allocation8 + $0x24] sm:$0xf] }
 0x154   :  { %3541 = vmatpush.bf16.msrb.mxu1 %v5518_v53  ;;  %v5726_v53 = vor.u32 %v6621_v44, %v5725_v43  ;;  %v5359_v43 = vld [vmem:[#allocation8 + $0x30] sm:$0xf0]  ;;  %v6563_v44 = vld [vmem:[#allocation8 + $0x144] sm:$0xf] }
 0x155   :  { %3554 = vmatpush.bf16.msrb.mxu2 %v5646_v55  ;;  %v7144_v55 = vpack.c.bf16 %v6767_v9, %v6767_v9  ;;  %v5362_v50 = vor.u32 %v6527_v40, %v5359_v43  ;;  %v6705_v40 = vld [vmem:[#allocation8 + $0x5ac] sm:$0xf0] }
 0x156   :  { %3567 = vmatpush.bf16.msrb.mxu3 %v5774_v6  ;;  %v6539_v6 = vld [vmem:[#allocation8 + $0x84] sm:$0xf] }
 0x157   :  { %3529 = vmatpush.bf16.msrb.mxu0 %v5374_v2  ;;  %v5933_v2 = vld [vmem:[#allocation8 + $0x4a0] sm:$0xf] }
 0x158   :  { %3542 = vmatpush.bf16.msrb.mxu1 %v5502_v46  ;;  %v5407_v46 = vld [vmem:[#allocation8 + $0x90] sm:$0xf0]  ;;  %v5934_v12 = vor.u32 %v6673_v3, %v5933_v2  ;;  %v5853_v2 = vld [vmem:[#allocation8 + $0x400] sm:$0xf]  ;;  %v6653_v3 = vld [vmem:[#allocation8 + $0x40c] sm:$0xf0] }
 0x159   :  { %3555 = vmatpush.bf16.msrb.mxu2 %v5630_v10  ;;  %v6575_v10 = vld [vmem:[#allocation8 + $0x1a4] sm:$0xf]  ;;  %v5410_v16 = vor.u32 %v6539_v6, %v5407_v46  ;;  %v5711_v6 = vld [vmem:[#allocation8 + $0x2f0] sm:$0xf0] }
 0x15a   :  { %3568 = vmatpush.bf16.msrb.mxu3 %v5758_v21  ;;  %v5554_v19 = vor.u32 %v6575_v10, %v5551_v11  ;;  %v5391_v21 = vld [vmem:[#allocation8 + $0x70] sm:$0xf0]  ;;  %v6675_v46 = vld [vmem:[#allocation8 + $0x4c4] sm:$0xf] }
 0x15b   :  { %3530 = vmatpush.bf16.msrb.mxu0 %v5358_v18  ;;  %v6535_v18 = vld [vmem:[#allocation8 + $0x64] sm:$0xf] }
 0x15c   :  { %3543 = vmatpush.bf16.msrb.mxu1 %v5486_v23  ;;  %v6571_v23 = vld [vmem:[#allocation8 + $0x184] sm:$0xf]  ;;  %v5394_v28 = vor.u32 %v6535_v18, %v5391_v21  ;;  %v6713_v18 = vld [vmem:[#allocation8 + $0x5ec] sm:$0xf0] }
 0x15d   :  { %3556 = vmatpush.bf16.msrb.mxu2 %v5614_v24  ;;  %v5535_v24 = vld [vmem:[#allocation8 + $0x190] sm:$0xf0]  ;;  %v6555_v11 = vld [vmem:[#allocation8 + $0x104] sm:$0xf] }
 0x15e   :  { %3569 = vmatpush.bf16.msrb.mxu3 %v5742_v34  ;;  %v5538_v29 = vor.u32 %v6571_v23, %v5535_v24  ;;  %v6711_v21 = vld [vmem:[#allocation8 + $0x5e4] sm:$0xf]  ;;  %v6095_v23 = vld [vmem:[#allocation8 + $0x5f0] sm:$0xf0]  ;;  %v5474_v26 = vor.u32 %v6555_v11, %v5471_v14 }
 0x15f   :  { %3531 = vmatpush.bf16.msrb.mxu0 %v5342_v35  ;;  %v2151_v17 = vpop.f32.mrf.mxu0  ;;  %v6611_v24 = vld [vmem:[#allocation8 + $0x2c4] sm:$0xf]  ;;  %v6031_v14 = vld [vmem:[#allocation8 + $0x570] sm:$0xf0] }
 0x160   :  { %3544 = vmatpush.bf16.msrb.mxu1 %v5470_v54  ;;  %v2152_v20 = vadd.f32 %v2151_v17, %v2139_v62  ;;  %v2164_v48 = vpop.f32.mrf.mxu1  ;;  %v6661_v54 = vld [vmem:[#allocation8 + $0x44c] sm:$0xf0]  ;;  %v6093_v17 = vld [vmem:[#allocation8 + $0x5e0] sm:$0xf] }
 0x161   :  { %3557 = vmatpush.bf16.msrb.mxu2 %v5598_v37  ;;  %v5886_v47 = vor.u32 %v6661_v54, %v5885_v22  ;;  %v6667_v54 = vld [vmem:[#allocation8 + $0x484] sm:$0xf] }
 0x162   :  { %3532 = vmatmul.bf16.vlgmr.msrb.gmra.mxu0 %v7142_v52  ;;  %3570 = vmatpush.bf16.msrb.mxu3 %v5726_v53  ;;  %v2165_v8 = vadd.f32 %v2164_v48, %v2152_v20  ;;  %v5343_v53 = vld [vmem:[#allocation8 + $0x10] sm:$0xf0]  ;;  %v6094_v48 = vor.u32 %v6713_v18, %v6093_v17 }
 0x163   :  { %3576 = vmatpush.bf16.msra.mxu0 %v5966_v45  ;;  %3545 = vmatmul.bf16.vlgmr.msrb.gmra.mxu1 %v7144_v55  ;;  %v5503_v45 = vld [vmem:[#allocation8 + $0x150] sm:$0xf0]  ;;  %v5346_v62 = vor.u32 %v6523_v51, %v5343_v53  ;;  %v6045_v53 = vld [vmem:[#allocation8 + $0x580] sm:$0xf] }
 0x164   :  { %3558 = vmatmul.bf16.vlgmr.msrb.gmra.mxu2 %v7140_v36  ;;  %3589 = vmatpush.bf16.msra.mxu1 %v6094_v48  ;;  %v5631_v17 = vld [vmem:[#allocation8 + $0x250] sm:$0xf0] }
 0x165   :  { %3602 = vmatpush.bf16.msra.mxu2 %v5458_v41  ;;  %v5522_v41 = vor.u32 %v6567_v31, %v5519_v33  ;;  %v6707_v33 = vld [vmem:[#allocation8 + $0x5c4] sm:$0xf] }
 0x166   :  { %3615 = vmatpush.bf16.msra.mxu3 %v5586_v58  ;;  %v6559_v58 = vld [vmem:[#allocation8 + $0x124] sm:$0xf] }
 0x167   :  { %3577 = vmatpush.bf16.msra.mxu0 %v5950_v1  ;;  %v2177_v4 = vpop.f32.mrf.mxu2  ;;  %v2153_v42 = vpop.f32.mrf.mxu0  ;;  %v5490_v10 = vor.u32 %v6559_v58, %v5487_v59 }
 0x168   :  { %v2178_v35 = vadd.f32 %v2177_v4, %v2165_v8  ;;  %v2190_v34 = vpop.f32.mrf.mxu3  ;;  %v2166_v9 = vpop.f32.mrf.mxu1  ;;  %v6671_v8 = vld [vmem:[#allocation8 + $0x4a4] sm:$0xf]  ;;  %v5935_v4 = vld [vmem:[#allocation8 + $0x4b0] sm:$0xf0] }
 0x169   :  { %3603 = vmatpush.bf16.msra.mxu2 %v5442_v57  ;;  %v5506_v57 = vor.u32 %v6563_v44, %v5503_v45  ;;  %v5938_v22 = vor.u32 %v6671_v8, %v5935_v4  ;;  %v6703_v44 = vld [vmem:[#allocation8 + $0x5a4] sm:$0xf]  ;;  %v6063_v45 = vld [vmem:[#allocation8 + $0x5b0] sm:$0xf0] }
 0x16a   :  { %3616 = vmatpush.bf16.msra.mxu3 %v5570_v7  ;;  %v2191_v37 = vadd.f32 %v2190_v34, %v2178_v35  ;;  %v6607_v35 = vld [vmem:[#allocation8 + $0x2a4] sm:$0xf]  ;;  %v5679_v34 = vld [vmem:[#allocation8 + $0x2b0] sm:$0xf0]  ;;  %v6066_v51 = vor.u32 %v6703_v44, %v6063_v45 }
 0x16b   :  { %3578 = vmatpush.bf16.msra.mxu0 %v5934_v12  ;;  %v5682_v42 = vor.u32 %v6607_v35, %v5679_v34  ;;  %v6603_v9 = vld [vmem:[#allocation8 + $0x284] sm:$0xf]  ;;  %v5855_v35 = vld [vmem:[#allocation8 + $0x410] sm:$0xf0] }
 0x16c   :  { %6768 = vtanh.f32 %v2191_v37  ;;  %v6591_v4 = vld [vmem:[#allocation8 + $0x224] sm:$0xf]  ;;  %v5599_v45 = vld [vmem:[#allocation8 + $0x210] sm:$0xf0] }
 0x16d   :  { %3604 = vmatpush.bf16.msra.mxu2 %v5426_v5  ;;  %v6615_v5 = vld [vmem:[#allocation8 + $0x2e4] sm:$0xf] }
 0x16e   :  { %3617 = vmatpush.bf16.msra.mxu3 %v5554_v19  ;;  %v5951_v19 = vld [vmem:[#allocation8 + $0x4d0] sm:$0xf0]  ;;  %v5714_v20 = vor.u32 %v6615_v5, %v5711_v6  ;;  %v6659_v5 = vld [vmem:[#allocation8 + $0x444] sm:$0xf] }
 0x16f   :  { %3579 = vmatpush.bf16.msra.mxu0 %v5918_v0  ;;  %v2179_v60 = vpop.f32.mrf.mxu2  ;;  %v5695_v0 = vld [vmem:[#allocation8 + $0x2d0] sm:$0xf0]  ;;  %v5954_v27 = vor.u32 %v6675_v46, %v5951_v19  ;;  %v6587_v44 = vld [vmem:[#allocation8 + $0x204] sm:$0xf] }
 0x170   :  { %v2192_v1 = vpop.f32.mrf.mxu3  ;;  %v5698_v30 = vor.u32 %v6611_v24, %v5695_v0  ;;  %v5887_v46 = vld [vmem:[#allocation8 + $0x450] sm:$0xf0]  ;;  %v6013_v24 = vld [vmem:[#allocation8 + $0x540] sm:$0xf]  ;;  %v6693_v0 = vld [vmem:[#allocation8 + $0x54c] sm:$0xf0] }
 0x171   :  { %3605 = vmatpush.bf16.msra.mxu2 %v5410_v16  ;;  %v5854_v16 = vor.u32 %v6653_v3, %v5853_v2  ;;  %v6599_v1 = vld [vmem:[#allocation8 + $0x264] sm:$0xf]  ;;  %v5647_v2 = vld [vmem:[#allocation8 + $0x270] sm:$0xf0]  ;;  %v5906_v3 = vor.u32 %v6663_v49, %v5903_v56  ;;  %v5890_v19 = vor.u32 %v6659_v5, %v5887_v46  ;;  %v5701_v49 = vld [vmem:[#allocation8 + $0x2c8] sm:$0xf] }
 0x172   :  { %3618 = vmatpush.bf16.msra.mxu3 %v5538_v29  ;;  %v6769_v7 = vpop.eup %6768  ;;  %v6709_v29 = vld [vmem:[#allocation8 + $0x5cc] sm:$0xf0]  ;;  %v5981_v56 = vld [vmem:[#allocation8 + $0x500] sm:$0xf]  ;;  %v5839_v5 = vld [vmem:[#allocation8 + $0x3f0] sm:$0xf0] }
 0x173   :  { %3580 = vmatpush.bf16.msra.mxu0 %v5902_v32  ;;  %v7151_v12 = vpack.c.bf16 %v6769_v7, %v6769_v7  ;;  %v6078_v31 = vor.u32 %v6709_v29, %v6077_v15  ;;  %v6079_v32 = vld [vmem:[#allocation8 + $0x5d0] sm:$0xf0]  ;;  %v6029_v7 = vld [vmem:[#allocation8 + $0x560] sm:$0xf]  ;;  %v6691_v15 = vld [vmem:[#allocation8 + $0x544] sm:$0xf] }
 0x174   :  { %v6082_v37 = vor.u32 %v6707_v33, %v6079_v32  ;;  %v6015_v29 = vld [vmem:[#allocation8 + $0x550] sm:$0xf0]  ;;  %v6651_v33 = vld [vmem:[#allocation8 + $0x404] sm:$0xf] }
 0x175   :  { %3606 = vmatpush.bf16.msra.mxu2 %v5394_v28  ;;  %3571 = vmatmul.bf16.vlgmr.msrb.gmra.mxu3 %v7151_v12  ;;  %v6098_v28 = vor.u32 %v6711_v21, %v6095_v23  ;;  %v6018_v34 = vor.u32 %v6691_v15, %v6015_v29  ;;  %v6642_v15 = vld [vmem:[#allocation8 + $0x3b4] sm:$0xf0] }
 0x176   :  { %3619 = vmatpush.bf16.msra.mxu3 %v5522_v41  ;;  %v5919_v41 = vld [vmem:[#allocation8 + $0x490] sm:$0xf0]  ;;  %3590 = vmatpush.bf16.msra.mxu1 %v6078_v31  ;;  %v434_v31 = vperm.slane %v7137_v38, 4 }
 0x177   :  { %3581 = vmatpush.bf16.msra.mxu0 %v5886_v47  ;;  %v5663_v47 = vld [vmem:[#allocation8 + $0x290] sm:$0xf0]  ;;  %v5922_v25 = vor.u32 %v6667_v54, %v5919_v41  ;;  %v6689_v54 = vld [vmem:[#allocation8 + $0x52c] sm:$0xf0]  ;;  %v6687_v41 = vld [vmem:[#allocation8 + $0x524] sm:$0xf] }
 0x178   :  { %v5666_v59 = vor.u32 %v6603_v9, %v5663_v47 }
 0x179   :  { %3607 = vmatpush.bf16.msra.mxu2 %v5378_v39  ;;  %v6061_v39 = vld [vmem:[#allocation8 + $0x5a0] sm:$0xf] }
 0x17a   :  { %3620 = vmatpush.bf16.msra.mxu3 %v5506_v57  ;;  %v6062_v43 = vor.u32 %v6705_v40, %v6061_v39  ;;  %v6701_v57 = vld [vmem:[#allocation8 + $0x58c] sm:$0xf0] }
 0x17b   :  { %3582 = vmatpush.bf16.msra.mxu0 %v5870_v61  ;;  %v6046_v60 = vor.u32 %v6701_v57, %v6045_v53  ;;  %v6699_v61 = vld [vmem:[#allocation8 + $0x584] sm:$0xf] }
 0x17c   :  { %3591 = vmatpush.bf16.msra.mxu1 %v6062_v43  ;;  %v6050_v6 = vor.u32 %v6699_v61, %v6047_v63  ;;  %v6618_v43 = vld [vmem:[#allocation8 + $0x2f4] sm:$0xf0]  ;;  %v5602_v61 = vor.u32 %v6587_v44, %v5599_v45  ;;  %v6683_v63 = vld [vmem:[#allocation8 + $0x504] sm:$0xf]  ;;  %v5775_v45 = vld [vmem:[#allocation8 + $0x370] sm:$0xf0] }
 0x17d   :  { %3608 = vmatpush.bf16.msra.mxu2 %v5362_v50  ;;  %v6631_v44 = vld [vmem:[#allocation8 + $0x364] sm:$0xf] }
 0x17e   :  { %3621 = vmatpush.bf16.msra.mxu3 %v5490_v10  ;;  %v5650_v10 = vor.u32 %v6599_v1, %v5647_v2  ;;  %v5983_v1 = vld [vmem:[#allocation8 + $0x510] sm:$0xf0]  ;;  %v6647_v2 = vld [vmem:[#allocation8 + $0x3e4] sm:$0xf] }
 0x17f   :  { %3583 = vmatpush.bf16.msra.mxu0 %v5854_v16  ;;  %v7155_v50 = vpop.f32.mrf.mxu0  ;;  %v6595_v16 = vld [vmem:[#allocation8 + $0x244] sm:$0xf]  ;;  %v5986_v46 = vor.u32 %v6683_v63, %v5983_v1  ;;  %v6594_v63 = vld [vmem:[#allocation8 + $0x234] sm:$0xf0]  ;;  %v5461_v1 = vld [vmem:[#allocation8 + $0xe8] sm:$0xf] }
 0x180   :  { %v7157_v58 = vpop.f32.mrf.mxu1  ;;  %3592 = vmatpush.bf16.msra.mxu1 %v6046_v60  ;;  %v5634_v8 = vor.u32 %v6595_v16, %v5631_v17  ;;  %v2204_v9 = vadd.f32 %v7155_v50, %v434_v31  ;;  %v5845_v50 = vld [vmem:[#allocation8 + $0x3e8] sm:$0xf]  ;;  %v5823_v16 = vld [vmem:[#allocation8 + $0x3d0] sm:$0xf0]  ;;  %v6610_v17 = vld [vmem:[#allocation8 + $0x2b4] sm:$0xf0] }
 0x181   :  { %3609 = vmatpush.bf16.msra.mxu2 %v5346_v62  ;;  %v6697_v62 = vld [vmem:[#allocation8 + $0x56c] sm:$0xf0] }
 0x182   :  { %3622 = vmatpush.bf16.msra.mxu3 %v5474_v26  ;;  %v6030_v11 = vor.u32 %v6697_v62, %v6029_v7  ;;  %v5871_v26 = vld [vmem:[#allocation8 + $0x430] sm:$0xf0]  ;;  %v2217_v7 = vadd.f32 %v7157_v58, %v2204_v9  ;;  %v5842_v62 = vor.u32 %v6647_v2, %v5839_v5  ;;  %v6598_v9 = vld [vmem:[#allocation8 + $0x254] sm:$0xf0] }
 0x183   :  { %3628 = vmatpush.bf16.msrb.mxu0 %v5714_v20  ;;  %v6655_v20 = vld [vmem:[#allocation8 + $0x424] sm:$0xf]  ;;  %v6554_v2 = vld [vmem:[#allocation8 + $0xf4] sm:$0xf0] }
 0x184   :  { %3610 = vmatmul.bf16.vlgmr.msra.gmra.mxu2 %v7142_v52  ;;  %3593 = vmatpush.bf16.msra.mxu1 %v6030_v11  ;;  %v5874_v32 = vor.u32 %v6655_v20, %v5871_v26  ;;  %v5685_v11 = vld [vmem:[#allocation8 + $0x2a8] sm:$0xf]  ;;  %v6646_v20 = vld [vmem:[#allocation8 + $0x3d4] sm:$0xf0]  ;;  %v6639_v26 = vld [vmem:[#allocation8 + $0x3a4] sm:$0xf] }
 0x185   :  { %3654 = vmatpush.bf16.msrb.mxu2 %v5970_v13  ;;  %v6695_v13 = vld [vmem:[#allocation8 + $0x564] sm:$0xf]  ;;  %3623 = vmatmul.bf16.vlgmr.msra.gmra.mxu3 %v7144_v55  ;;  %v5686_v58 = vor.u32 %v6610_v17, %v5685_v11  ;;  %v5462_v11 = vor.u32 %v6554_v2, %v5461_v1  ;;  %v6536_v1 = vld [vmem:[#allocation8 + $0x6c] sm:$0xf]  ;;  %v5399_v2 = vld [vmem:[#allocation8 + $0x78] sm:$0xf0] }
 0x186   :  { %3667 = vmatpush.bf16.msrb.mxu3 %v6098_v28  ;;  %v6034_v23 = vor.u32 %v6695_v13, %v6031_v14  ;;  %v6014_v28 = vor.u32 %v6693_v0, %v6013_v24  ;;  %v6643_v14 = vld [vmem:[#allocation8 + $0x3c4] sm:$0xf]  ;;  %v5669_v24 = vld [vmem:[#allocation8 + $0x288] sm:$0xf] }
 0x187   :  { %3629 = vmatpush.bf16.msrb.mxu0 %v5698_v30  ;;  %v7160_v18 = vpop.f32.mrf.mxu2  ;;  %v2205_v48 = vpop.f32.mrf.mxu0  ;;  %v5615_v30 = vld [vmem:[#allocation8 + $0x230] sm:$0xf0] }
 0x188   :  { %v7162_v21 = vpop.f32.mrf.mxu3  ;;  %v5618_v39 = vor.u32 %v6591_v4, %v5615_v30  ;;  %3594 = vmatpush.bf16.msra.mxu1 %v6014_v28  ;;  %v2230_v48 = vadd.f32 %v7160_v18, %v2217_v7  ;;  %v5813_v28 = vld [vmem:[#allocation8 + $0x3a8] sm:$0xf]  ;;  %v6630_v7 = vld [vmem:[#allocation8 + $0x354] sm:$0xf0] }
 0x189   :  { %3655 = vmatpush.bf16.msrb.mxu2 %v5954_v27  ;;  %v2218_v27 = vpop.f32.mrf.mxu1  ;;  %v5653_v18 = vld [vmem:[#allocation8 + $0x268] sm:$0xf]  ;;  %v5814_v31 = vor.u32 %v6642_v15, %v5813_v28  ;;  %v6619_v15 = vld [vmem:[#allocation8 + $0x304] sm:$0xf] }
 0x18a   :  { %3668 = vmatpush.bf16.msrb.mxu3 %v6082_v37  ;;  %v5717_v37 = vld [vmem:[#allocation8 + $0x2e8] sm:$0xf]  ;;  %v5807_v27 = vld [vmem:[#allocation8 + $0x3b0] sm:$0xf0]  ;;  %v2243_v29 = vadd.f32 %v7162_v21, %v2230_v48  ;;  %v6552_v48 = vld [vmem:[#allocation8 + $0xec] sm:$0xf] }
 0x18b   :  { %3630 = vmatpush.bf16.msrb.mxu0 %v5682_v42  ;;  %v5999_v42 = vld [vmem:[#allocation8 + $0x530] sm:$0xf0]  ;;  %v5718_v60 = vor.u32 %v6618_v43, %v5717_v37  ;;  %v5810_v4 = vor.u32 %v6639_v26, %v5807_v27  ;;  %v6626_v26 = vld [vmem:[#allocation8 + $0x334] sm:$0xf0] }
 0x18c   :  { %v6002_v57 = vor.u32 %v6687_v41, %v5999_v42  ;;  %v5637_v42 = vld [vmem:[#allocation8 + $0x248] sm:$0xf] }
 0x18d   :  { %3656 = vmatpush.bf16.msrb.mxu2 %v5938_v22  ;;  %v5997_v22 = vld [vmem:[#allocation8 + $0x520] sm:$0xf] }
 0x18e   :  { %3669 = vmatpush.bf16.msrb.mxu3 %v6066_v51  ;;  %v5998_v40 = vor.u32 %v6689_v54, %v5997_v22  ;;  %v6614_v51 = vld [vmem:[#allocation8 + $0x2d4] sm:$0xf0]  ;;  %v5797_v22 = vld [vmem:[#allocation8 + $0x388] sm:$0xf] }
 0x18f   :  { %3631 = vmatpush.bf16.msrb.mxu0 %v5666_v59  ;;  %v2231_v47 = vpop.f32.mrf.mxu2  ;;  %v6685_v59 = vld [vmem:[#allocation8 + $0x50c] sm:$0xf0]  ;;  %v6638_v54 = vld [vmem:[#allocation8 + $0x394] sm:$0xf0] }
 0x190   :  { %v2244_v53 = vpop.f32.mrf.mxu3  ;;  %3595 = vmatpush.bf16.msra.mxu1 %v5998_v40  ;;  %v5798_v43 = vor.u32 %v6638_v54, %v5797_v22  ;;  %v5781_v47 = vld [vmem:[#allocation8 + $0x368] sm:$0xf]  ;;  %v6622_v54 = vld [vmem:[#allocation8 + $0x314] sm:$0xf0] }
 0x191   :  { %3657 = vmatpush.bf16.msrb.mxu2 %v5922_v25  ;;  %v5858_v25 = vor.u32 %v6651_v33, %v5855_v35  ;;  %v6635_v33 = vld [vmem:[#allocation8 + $0x384] sm:$0xf]  ;;  %v5733_v22 = vld [vmem:[#allocation8 + $0x308] sm:$0xf] }
 0x192   :  { %3670 = vmatpush.bf16.msrb.mxu3 %v6050_v6  ;;  %v6650_v6 = vld [vmem:[#allocation8 + $0x3f4] sm:$0xf0] }
 0x193   :  { %3632 = vmatpush.bf16.msrb.mxu0 %v5650_v10  ;;  %v5702_v10 = vor.u32 %v6614_v51, %v5701_v49  ;;  %v5846_v13 = vor.u32 %v6650_v6, %v5845_v50  ;;  %v5778_v49 = vor.u32 %v6631_v44, %v5775_v45  ;;  %v5638_v51 = vor.u32 %v6598_v9, %v5637_v42  ;;  %v5765_v6 = vld [vmem:[#allocation8 + $0x348] sm:$0xf]  ;;  %v6544_v42 = vld [vmem:[#allocation8 + $0xac] sm:$0xf] }
 0x194   :  { %v435_v44 = vperm.slane %v7137_v38, 5 }
 0x195   :  { %3658 = vmatpush.bf16.msrb.mxu2 %v5906_v3  ;;  %v5982_v3 = vor.u32 %v6685_v59, %v5981_v56  ;;  %v6627_v59 = vld [vmem:[#allocation8 + $0x344] sm:$0xf] }
 0x196   :  { %3671 = vmatpush.bf16.msrb.mxu3 %v6034_v23  ;;  %v5826_v23 = vor.u32 %v6643_v14, %v5823_v16  ;;  %v6623_v14 = vld [vmem:[#allocation8 + $0x324] sm:$0xf]  ;;  %v5743_v16 = vld [vmem:[#allocation8 + $0x330] sm:$0xf0] }
 0x197   :  { %3633 = vmatpush.bf16.msrb.mxu0 %v5634_v8  ;;  %3596 = vmatpush.bf16.msra.mxu1 %v5982_v3  ;;  %v6606_v8 = vld [vmem:[#allocation8 + $0x294] sm:$0xf0] }
 0x198   :  { %v5670_v30 = vor.u32 %v6606_v8, %v5669_v24  ;;  %v5746_v24 = vor.u32 %v6623_v14, %v5743_v16  ;;  %v5349_v14 = vld [vmem:[#allocation8 + $0x8] sm:$0xf]  ;;  %v6526_v16 = vld [vmem:[#allocation8 + $0x14] sm:$0xf0] }
 0x199   :  { %3659 = vmatpush.bf16.msrb.mxu2 %v5890_v19  ;;  %v5829_v19 = vld [vmem:[#allocation8 + $0x3c8] sm:$0xf] }
 0x19a   :  { %3672 = vmatpush.bf16.msrb.mxu3 %v6018_v34  ;;  %v5830_v0 = vor.u32 %v6646_v20, %v5829_v19  ;;  %v6602_v34 = vld [vmem:[#allocation8 + $0x274] sm:$0xf0]  ;;  %v5445_v19 = vld [vmem:[#allocation8 + $0xc8] sm:$0xf] }
 0x19b   :  { %3634 = vmatpush.bf16.msrb.mxu0 %v5618_v39  ;;  %3641 = vmatpush.bf16.msrb.mxu1 %v5842_v62  ;;  %v5654_v21 = vor.u32 %v6602_v34, %v5653_v18  ;;  %v5605_v62 = vld [vmem:[#allocation8 + $0x208] sm:$0xf]  ;;  %v6550_v20 = vld [vmem:[#allocation8 + $0xd4] sm:$0xf0] }
 0x19c   :  { %v5446_v8 = vor.u32 %v6550_v20, %v5445_v19  ;;  %v5429_v18 = vld [vmem:[#allocation8 + $0xa8] sm:$0xf]  ;;  %v6528_v19 = vld [vmem:[#allocation8 + $0x2c] sm:$0xf] }
 0x19d   :  { %3660 = vmatpush.bf16.msrb.mxu2 %v5874_v32  ;;  %v5791_v32 = vld [vmem:[#allocation8 + $0x390] sm:$0xf0] }
 0x19e   :  { %3673 = vmatpush.bf16.msrb.mxu3 %v6002_v57  ;;  %v5794_v40 = vor.u32 %v6635_v33, %v5791_v32  ;;  %v5621_v57 = vld [vmem:[#allocation8 + $0x228] sm:$0xf]  ;;  %v6548_v33 = vld [vmem:[#allocation8 + $0xcc] sm:$0xf] }
 0x19f   :  { %3635 = vmatpush.bf16.msrb.mxu0 %v5602_v61  ;;  %3642 = vmatpush.bf16.msrb.mxu1 %v5826_v23  ;;  %v2255_v35 = vpop.f32.mrf.mxu0  ;;  %v5766_v23 = vor.u32 %v6630_v7, %v5765_v6  ;;  %v5365_v7 = vld [vmem:[#allocation8 + $0x28] sm:$0xf] }
 0x1a0   :  { %v2256_v37 = vadd.f32 %v2255_v35, %v2243_v29  ;;  %v2268_v39 = vpop.f32.mrf.mxu1  ;;  %v5727_v29 = vld [vmem:[#allocation8 + $0x310] sm:$0xf0]  ;;  %v5447_v35 = vld [vmem:[#allocation8 + $0xd8] sm:$0xf0] }
 0x1a1   :  { %3661 = vmatpush.bf16.msrb.mxu2 %v5858_v25  ;;  %v6634_v25 = vld [vmem:[#allocation8 + $0x374] sm:$0xf0]  ;;  %v5730_v34 = vor.u32 %v6619_v15, %v5727_v29 }
 0x1a2   :  { %3674 = vmatpush.bf16.msrb.mxu3 %v5986_v46  ;;  %v2269_v41 = vadd.f32 %v2268_v39, %v2256_v37  ;;  %v5782_v56 = vor.u32 %v6634_v25, %v5781_v47  ;;  %v5450_v39 = vor.u32 %v6548_v33, %v5447_v35  ;;  %v5397_v47 = vld [vmem:[#allocation8 + $0x68] sm:$0xf]  ;;  %v6538_v25 = vld [vmem:[#allocation8 + $0x74] sm:$0xf0]  ;;  %v6680_v33 = vld [vmem:[#allocation8 + $0x4ec] sm:$0xf] }
 0x1a3   :  { %3643 = vmatpush.bf16.msrb.mxu1 %v5810_v4 }
 0x1a4   :  { %6770 = vtanh.f32 %v2269_v41  ;;  %v6542_v41 = vld [vmem:[#allocation8 + $0x94] sm:$0xf0] }
 0x1a5   :  { %3706 = vmatpush.bf16.msra.mxu2 %v5718_v60  ;;  %v5759_v60 = vld [vmem:[#allocation8 + $0x350] sm:$0xf0] }
 0x1a6   :  { %3719 = vmatpush.bf16.msra.mxu3 %v5846_v13  ;;  %v5762_v50 = vor.u32 %v6627_v59, %v5759_v60  ;;  %v6590_v13 = vld [vmem:[#allocation8 + $0x214] sm:$0xf0]  ;;  %v5381_v60 = vld [vmem:[#allocation8 + $0x48] sm:$0xf] }
 0x1a7   :  { %3644 = vmatpush.bf16.msrb.mxu1 %v5794_v40  ;;  %v7169_v53 = vpop.f32.mrf.mxu2  ;;  %v2257_v3 = vpop.f32.mrf.mxu0  ;;  %v5606_v27 = vor.u32 %v6590_v13, %v5605_v62  ;;  %v5413_v40 = vld [vmem:[#allocation8 + $0x88] sm:$0xf]  ;;  %v6530_v62 = vld [vmem:[#allocation8 + $0x34] sm:$0xf0] }
 0x1a8   :  { %v7171_v61 = vpop.f32.mrf.mxu3  ;;  %v2270_v5 = vpop.f32.mrf.mxu1  ;;  %v5414_v45 = vor.u32 %v6542_v41, %v5413_v40  ;;  %v6586_v40 = vld [vmem:[#allocation8 + $0x1f4] sm:$0xf0]  ;;  %v6584_v41 = vld [vmem:[#allocation8 + $0x1ec] sm:$0xf] }
 0x1a9   :  { %3707 = vmatpush.bf16.msra.mxu2 %v5702_v10  ;;  %v5622_v10 = vor.u32 %v6594_v63, %v5621_v57  ;;  %v2282_v57 = vadd.f32 %v7169_v53, %v435_v44  ;;  %v6534_v63 = vld [vmem:[#allocation8 + $0x54] sm:$0xf0]  ;;  %v5402_v53 = vor.u32 %v6536_v1, %v5399_v2  ;;  %v6676_v44 = vld [vmem:[#allocation8 + $0x4cc] sm:$0xf]  ;;  %v5925_v1 = vld [vmem:[#allocation8 + $0x488] sm:$0xf] }
 0x1aa   :  { %3720 = vmatpush.bf16.msra.mxu3 %v5830_v0  ;;  %v6771_v46 = vpop.eup %6770  ;;  %v5749_v0 = vld [vmem:[#allocation8 + $0x328] sm:$0xf]  ;;  %v6670_v2 = vld [vmem:[#allocation8 + $0x494] sm:$0xf0] }
 0x1ab   :  { %3645 = vmatpush.bf16.msrb.mxu1 %v5778_v49  ;;  %v7173_v17 = vpack.c.bf16 %v6771_v46, %v6771_v46  ;;  %v5750_v32 = vor.u32 %v6626_v26, %v5749_v0  ;;  %v6540_v49 = vld [vmem:[#allocation8 + $0x8c] sm:$0xf]  ;;  %v2295_v38 = vadd.f32 %v7171_v61, %v2282_v57  ;;  %v5573_v57 = vld [vmem:[#allocation8 + $0x1c8] sm:$0xf] }
 0x1ac   :  { %v6532_v46 = vld [vmem:[#allocation8 + $0x4c] sm:$0xf] }
 0x1ad   :  { %3708 = vmatpush.bf16.msra.mxu2 %v5686_v58  ;;  %v5463_v58 = vld [vmem:[#allocation8 + $0xf8] sm:$0xf0]  ;;  %3584 = vmatmul.bf16.vlgmr.msra.gmra.mxu0 %v7173_v17 }
 0x1ae   :  { %3721 = vmatpush.bf16.msra.mxu3 %v5814_v31  ;;  %3662 = vmatmul.bf16.vlgmr.msrb.gmra.mxu2 %v7173_v17  ;;  %v5466_v4 = vor.u32 %v6552_v48, %v5463_v58  ;;  %v6546_v31 = vld [vmem:[#allocation8 + $0xb4] sm:$0xf0]  ;;  %v5973_v58 = vld [vmem:[#allocation8 + $0x4e8] sm:$0xf] }
 0x1af   :  { %3646 = vmatpush.bf16.msrb.mxu1 %v5762_v50  ;;  %3680 = vmatpush.bf16.msra.mxu0 %v5462_v11  ;;  %v2283_v28 = vpop.f32.mrf.mxu2  ;;  %v5430_v37 = vor.u32 %v6546_v31, %v5429_v18  ;;  %v5382_v50 = vor.u32 %v6534_v63, %v5381_v60  ;;  %v5366_v11 = vor.u32 %v6530_v62, %v5365_v7  ;;  %v5957_v18 = vld [vmem:[#allocation8 + $0x4c8] sm:$0xf]  ;;  %v6678_v31 = vld [vmem:[#allocation8 + $0x4d4] sm:$0xf0]  ;;  %v5575_v63 = vld [vmem:[#allocation8 + $0x1d8] sm:$0xf0] }
 0x1b0   :  { %v6578_v7 = vld [vmem:[#allocation8 + $0x1b4] sm:$0xf0]  ;;  %v6576_v62 = vld [vmem:[#allocation8 + $0x1ac] sm:$0xf] }
 0x1b1   :  { %3709 = vmatpush.bf16.msra.mxu2 %v5670_v30  ;;  %v2296_v30 = vpop.f32.mrf.mxu3 }
 0x1b2   :  { %3722 = vmatpush.bf16.msra.mxu3 %v5798_v43  ;;  %v5431_v43 = vld [vmem:[#allocation8 + $0xb8] sm:$0xf0] }
 0x1b3   :  { %3647 = vmatpush.bf16.msrb.mxu1 %v5746_v24  ;;  %3681 = vmatpush.bf16.msra.mxu0 %v5446_v8  ;;  %v5434_v9 = vor.u32 %v6544_v42, %v5431_v43  ;;  %v6682_v24 = vld [vmem:[#allocation8 + $0x4f4] sm:$0xf0]  ;;  %v5350_v8 = vor.u32 %v6526_v16, %v5349_v14  ;;  %v5351_v30 = vld [vmem:[#allocation8 + $0x18] sm:$0xf0]  ;;  %v5941_v42 = vld [vmem:[#allocation8 + $0x4a8] sm:$0xf] }
 0x1b4   :  { %v5974_v29 = vor.u32 %v6682_v24, %v5973_v58  ;;  %v6674_v43 = vld [vmem:[#allocation8 + $0x4b4] sm:$0xf0]  ;;  %v6668_v14 = vld [vmem:[#allocation8 + $0x48c] sm:$0xf]  ;;  %v5927_v16 = vld [vmem:[#allocation8 + $0x498] sm:$0xf0] }
 0x1b5   :  { %3710 = vmatpush.bf16.msra.mxu2 %v5654_v21  ;;  %v5734_v21 = vor.u32 %v6622_v54, %v5733_v22  ;;  %v6574_v58 = vld [vmem:[#allocation8 + $0x194] sm:$0xf0]  ;;  %v6572_v24 = vld [vmem:[#allocation8 + $0x18c] sm:$0xf] }
 0x1b6   :  { %3723 = vmatpush.bf16.msra.mxu3 %v5782_v56  ;;  %v5398_v56 = vor.u32 %v6538_v25, %v5397_v47 }
 0x1b7   :  { %3648 = vmatpush.bf16.msrb.mxu1 %v5730_v34  ;;  %3682 = vmatpush.bf16.msra.mxu0 %v5430_v37  ;;  %v5958_v34 = vor.u32 %v6678_v31, %v5957_v18 }
 0x1b9   :  { %3711 = vmatpush.bf16.msra.mxu2 %v5638_v51  ;;  %v5415_v51 = vld [vmem:[#allocation8 + $0x98] sm:$0xf0] }
 0x1ba   :  { %3724 = vmatpush.bf16.msra.mxu3 %v5766_v23  ;;  %v5418_v59 = vor.u32 %v6540_v49, %v5415_v51  ;;  %v5367_v23 = vld [vmem:[#allocation8 + $0x38] sm:$0xf0]  ;;  %v5942_v51 = vor.u32 %v6674_v43, %v5941_v42  ;;  %v5509_v43 = vld [vmem:[#allocation8 + $0x148] sm:$0xf] }
 0x1bb   :  { %3683 = vmatpush.bf16.msra.mxu0 %v5414_v45  ;;  %v5370_v15 = vor.u32 %v6528_v19, %v5367_v23  ;;  %v5959_v45 = vld [vmem:[#allocation8 + $0x4d8] sm:$0xf0]  ;;  %v5541_v23 = vld [vmem:[#allocation8 + $0x188] sm:$0xf] }
 0x1bc   :  { %v5962_v60 = vor.u32 %v6676_v44, %v5959_v45  ;;  %v5542_v18 = vor.u32 %v6574_v58, %v5541_v23  ;;  %v5477_v23 = vld [vmem:[#allocation8 + $0x108] sm:$0xf]  ;;  %v6558_v58 = vld [vmem:[#allocation8 + $0x114] sm:$0xf0] }
 0x1bd   :  { %3712 = vmatpush.bf16.msra.mxu2 %v5622_v10  ;;  %3636 = vmatmul.bf16.vlgmr.msrb.gmra.mxu0 %v7140_v36  ;;  %v5383_v10 = vld [vmem:[#allocation8 + $0x58] sm:$0xf0] }
 0x1be   :  { %3725 = vmatpush.bf16.msra.mxu3 %v5750_v32  ;;  %v5386_v61 = vor.u32 %v6532_v46, %v5383_v10  ;;  %v5975_v32 = vld [vmem:[#allocation8 + $0x4f8] sm:$0xf0]  ;;  %v7188_v46 = vld [vmem:[#allocation10] sm:$0xf] }
 0x1bf   :  { %v2307_v3 = vpop.f32.mrf.mxu0  ;;  %3684 = vmatpush.bf16.msra.mxu0 %v5398_v56  ;;  %v5978_v37 = vor.u32 %v6680_v33, %v5975_v32  ;;  %v6582_v56 = vld [vmem:[#allocation8 + $0x1d4] sm:$0xf0]  ;;  %v5525_v32 = vld [vmem:[#allocation8 + $0x168] sm:$0xf] }
 0x1c0   :  { %v2320_v5 = vpop.f32.mrf.mxu1  ;;  %v2308_v6 = vadd.f32 %v2307_v3, %v2295_v38  ;;  %v6672_v38 = vld [vmem:[#allocation8 + $0x4ac] sm:$0xf]  ;;  %v5943_v3 = vld [vmem:[#allocation8 + $0x4b8] sm:$0xf0] }
 0x1c1   :  { %3713 = vmatpush.bf16.msra.mxu2 %v5606_v27  ;;  %v5946_v10 = vor.u32 %v6672_v38, %v5943_v3  ;;  %v6616_v38 = vld [vmem:[#allocation8 + $0x2ec] sm:$0xf]  ;;  %v5719_v3 = vld [vmem:[#allocation8 + $0x2f8] sm:$0xf0] }
 0x1c2   :  { %3726 = vmatpush.bf16.msra.mxu3 %v5734_v21  ;;  %v2321_v13 = vadd.f32 %v2320_v5, %v2308_v6  ;;  %v5591_v21 = vld [vmem:[#allocation8 + $0x1f8] sm:$0xf0]  ;;  %v5574_v5 = vor.u32 %v6582_v56, %v5573_v57  ;;  %v5861_v56 = vld [vmem:[#allocation8 + $0x408] sm:$0xf] }
 0x1c3   :  { %3685 = vmatpush.bf16.msra.mxu0 %v5382_v50  ;;  %v5594_v49 = vor.u32 %v6584_v41, %v5591_v21  ;;  %v5557_v50 = vld [vmem:[#allocation8 + $0x1a8] sm:$0xf]  ;;  %v6660_v41 = vld [vmem:[#allocation8 + $0x44c] sm:$0xf]  ;;  %v5895_v21 = vld [vmem:[#allocation8 + $0x458] sm:$0xf0] }
 0x1c4   :  { %3714 = vmatmul.bf16.vlgmr.msra.gmra.mxu2 %v7140_v36  ;;  %v5558_v19 = vor.u32 %v6578_v7, %v5557_v50  ;;  %v5898_v57 = vor.u32 %v6660_v41, %v5895_v21  ;;  %v5493_v7 = vld [vmem:[#allocation8 + $0x128] sm:$0xf]  ;;  %v5671_v41 = vld [vmem:[#allocation8 + $0x298] sm:$0xf0] }
 0x1c5   :  { %3758 = vmatpush.bf16.msrb.mxu2 %v5466_v4  ;;  %v6524_v4 = vld [vmem:[#allocation8 + $0xc] sm:$0xf] }
 0x1c6   :  { %v5354_v35 = vor.u32 %v6524_v4, %v5351_v30 }
 0x1c7   :  { %v2333_v20 = vpop.f32.mrf.mxu2  ;;  %v2309_v26 = vpop.f32.mrf.mxu0  ;;  %3686 = vmatpush.bf16.msra.mxu0 %v5366_v11  ;;  %v5559_v11 = vld [vmem:[#allocation8 + $0x1b8] sm:$0xf0] }
 0x1c8   :  { %v2346_v48 = vpop.f32.mrf.mxu3  ;;  %v2334_v0 = vadd.f32 %v2333_v20, %v2321_v13  ;;  %v2322_v27 = vpop.f32.mrf.mxu1  ;;  %v5909_v13 = vld [vmem:[#allocation8 + $0x468] sm:$0xf]  ;;  %v5562_v20 = vor.u32 %v6576_v62, %v5559_v11  ;;  %v5543_v26 = vld [vmem:[#allocation8 + $0x198] sm:$0xf0]  ;;  %v6562_v62 = vld [vmem:[#allocation8 + $0x134] sm:$0xf0]  ;;  %v5722_v11 = vor.u32 %v6616_v38, %v5719_v3 }
 0x1c9   :  { %3759 = vmatpush.bf16.msrb.mxu2 %v5450_v39  ;;  %v5589_v39 = vld [vmem:[#allocation8 + $0x1e8] sm:$0xf]  ;;  %v5546_v31 = vor.u32 %v6572_v24, %v5543_v26  ;;  %v6556_v24 = vld [vmem:[#allocation8 + $0x10c] sm:$0xf]  ;;  %v5639_v3 = vld [vmem:[#allocation8 + $0x258] sm:$0xf0] }
 0x1ca   :  { %v2347_v28 = vadd.f32 %v2346_v48, %v2334_v0  ;;  %v5590_v47 = vor.u32 %v6586_v40, %v5589_v39  ;;  %v5930_v0 = vor.u32 %v6668_v14, %v5927_v16  ;;  %v5893_v27 = vld [vmem:[#allocation8 + $0x448] sm:$0xf]  ;;  %v6658_v40 = vld [vmem:[#allocation8 + $0x434] sm:$0xf0]  ;;  %v6652_v14 = vld [vmem:[#allocation8 + $0x40c] sm:$0xf] }
 0x1cb   :  { %3687 = vmatpush.bf16.msra.mxu0 %v5350_v8  ;;  %v6662_v8 = vld [vmem:[#allocation8 + $0x454] sm:$0xf0]  ;;  %v5877_v39 = vld [vmem:[#allocation8 + $0x428] sm:$0xf]  ;;  %v5863_v16 = vld [vmem:[#allocation8 + $0x418] sm:$0xf0] }
 0x1cc   :  { %6772 = vtanh.f32 %v2347_v28  ;;  %v5894_v33 = vor.u32 %v6662_v8, %v5893_v27  ;;  %v5878_v45 = vor.u32 %v6658_v40, %v5877_v39  ;;  %v5866_v26 = vor.u32 %v6652_v14, %v5863_v16  ;;  %v5479_v8 = vld [vmem:[#allocation8 + $0x118] sm:$0xf0]  ;;  %v6604_v40 = vld [vmem:[#allocation8 + $0x28c] sm:$0xf] }
 0x1cd   :  { %3760 = vmatpush.bf16.msrb.mxu2 %v5434_v9  ;;  %v6087_v39 = vld [vmem:[#allocation8 + $0x5d8] sm:$0xf0]  ;;  %v6596_v38 = vld [vmem:[#allocation8 + $0x24c] sm:$0xf] }
 0x1ce   :  { %3688 = vmatmul.bf16.vlgmr.msra.gmra.mxu0 %v7142_v52 }
 0x1cf   :  { %3732 = vmatpush.bf16.msrb.mxu0 %v5974_v29  ;;  %v2335_v22 = vpop.f32.mrf.mxu2  ;;  %v5911_v29 = vld [vmem:[#allocation8 + $0x478] sm:$0xf0] }
 0x1d0   :  { %v2348_v54 = vpop.f32.mrf.mxu3 }
 0x1d1   :  { %3761 = vmatpush.bf16.msrb.mxu2 %v5418_v59  ;;  %v6580_v59 = vld [vmem:[#allocation8 + $0x1cc] sm:$0xf] }
 0x1d2   :  { %v6773_v9 = vpop.eup %6772  ;;  %v5578_v6 = vor.u32 %v6580_v59, %v5575_v63  ;;  %v6654_v59 = vld [vmem:[#allocation8 + $0x414] sm:$0xf0] }
 0x1d3   :  { %3733 = vmatpush.bf16.msrb.mxu0 %v5958_v34  ;;  %v7183_v25 = vpack.c.bf16 %v6773_v9, %v6773_v9  ;;  %v6568_v34 = vld [vmem:[#allocation8 + $0x16c] sm:$0xf]  ;;  %v6566_v9 = vld [vmem:[#allocation8 + $0x154] sm:$0xf0] }
 0x1d4   :  { %v5510_v50 = vor.u32 %v6566_v9, %v5509_v43  ;;  %v6069_v43 = vld [vmem:[#allocation8 + $0x5a8] sm:$0xf]  ;;  %v6704_v9 = vld [vmem:[#allocation8 + $0x5ac] sm:$0xf] }
 0x1d5   :  { %3762 = vmatpush.bf16.msrb.mxu2 %v5402_v53  ;;  %3597 = vmatmul.bf16.vlgmr.msra.gmra.mxu1 %v7183_v25  ;;  %v5926_v53 = vor.u32 %v6670_v2, %v5925_v1  ;;  %v5879_v2 = vld [vmem:[#allocation8 + $0x438] sm:$0xf0] }
 0x1d6   :  { %3675 = vmatmul.bf16.vlgmr.msrb.gmra.mxu3 %v7183_v25  ;;  %3693 = vmatpush.bf16.msra.mxu1 %v5590_v47  ;;  %v6564_v47 = vld [vmem:[#allocation8 + $0x14c] sm:$0xf] }
 0x1d7   :  { %3771 = vmatpush.bf16.msrb.mxu3 %v5594_v49  ;;  %3734 = vmatpush.bf16.msrb.mxu0 %v5942_v51  ;;  %v5511_v49 = vld [vmem:[#allocation8 + $0x158] sm:$0xf0] }
 0x1d9   :  { %3763 = vmatpush.bf16.msrb.mxu2 %v5386_v61  ;;  %v6666_v61 = vld [vmem:[#allocation8 + $0x474] sm:$0xf0] }
 0x1da   :  { %3694 = vmatpush.bf16.msra.mxu1 %v5574_v5  ;;  %v5910_v48 = vor.u32 %v6666_v61, %v5909_v13  ;;  %v6560_v13 = vld [vmem:[#allocation8 + $0x12c] sm:$0xf]  ;;  %v5495_v61 = vld [vmem:[#allocation8 + $0x138] sm:$0xf0] }
 0x1db   :  { %3772 = vmatpush.bf16.msrb.mxu3 %v5578_v6  ;;  %3735 = vmatpush.bf16.msrb.mxu0 %v5926_v53  ;;  %v5514_v6 = vor.u32 %v6564_v47, %v5511_v49  ;;  %v5862_v53 = vor.u32 %v6654_v59, %v5861_v56  ;;  %v6071_v47 = vld [vmem:[#allocation8 + $0x5b8] sm:$0xf0]  ;;  %v6600_v49 = vld [vmem:[#allocation8 + $0x26c] sm:$0xf]  ;;  %v6053_v59 = vld [vmem:[#allocation8 + $0x588] sm:$0xf] }
 0x1dc   :  { %v6074_v56 = vor.u32 %v6704_v9, %v6071_v47  ;;  %v6640_v47 = vld [vmem:[#allocation8 + $0x3ac] sm:$0xf] }
 0x1dd   :  { %3764 = vmatpush.bf16.msrb.mxu2 %v5370_v15  ;;  %v6664_v15 = vld [vmem:[#allocation8 + $0x46c] sm:$0xf] }
 0x1de   :  { %3695 = vmatpush.bf16.msra.mxu1 %v5558_v19  ;;  %v5914_v54 = vor.u32 %v6664_v15, %v5911_v29  ;;  %v6612_v19 = vld [vmem:[#allocation8 + $0x2cc] sm:$0xf]  ;;  %v6714_v15 = vld [vmem:[#allocation8 + $0x5f4] sm:$0xf0] }
 0x1df   :  { %v3533_v28 = vpop.f32.mrf.mxu0  ;;  %3773 = vmatpush.bf16.msrb.mxu3 %v5562_v20  ;;  %3736 = vmatpush.bf16.msrb.mxu0 %v5910_v48  ;;  %v5494_v20 = vor.u32 %v6562_v62, %v5493_v7  ;;  %v5498_v48 = vor.u32 %v6560_v13, %v5495_v61  ;;  %v6712_v29 = vld [vmem:[#allocation8 + $0x5ec] sm:$0xf]  ;;  %v5623_v61 = vld [vmem:[#allocation8 + $0x238] sm:$0xf0] }
 0x1e0   :  { %v3546_v30 = vpop.f32.mrf.mxu1  ;;  %v6696_v62 = vld [vmem:[#allocation8 + $0x56c] sm:$0xf] }
 0x1e1   :  { %3765 = vmatpush.bf16.msrb.mxu2 %v5354_v35  ;;  %v6570_v35 = vld [vmem:[#allocation8 + $0x174] sm:$0xf0]  ;;  %v6592_v13 = vld [vmem:[#allocation8 + $0x22c] sm:$0xf] }
 0x1e2   :  { %3696 = vmatpush.bf16.msra.mxu1 %v5542_v18  ;;  %v5526_v42 = vor.u32 %v6570_v35, %v5525_v32  ;;  %v6608_v18 = vld [vmem:[#allocation8 + $0x2ac] sm:$0xf] }
 0x1e3   :  { %3774 = vmatpush.bf16.msrb.mxu3 %v5546_v31  ;;  %3737 = vmatpush.bf16.msrb.mxu0 %v5894_v33  ;;  %v5687_v31 = vld [vmem:[#allocation8 + $0x2b8] sm:$0xf0]  ;;  %v5482_v33 = vor.u32 %v6556_v24, %v5479_v8  ;;  %v6588_v24 = vld [vmem:[#allocation8 + $0x20c] sm:$0xf]  ;;  %v6690_v8 = vld [vmem:[#allocation8 + $0x534] sm:$0xf0] }
 0x1e4   :  { %3766 = vmatmul.bf16.vlgmr.msrb.gmra.mxu2 %v7142_v52  ;;  %v2556_v52 = vperm.slane %v7188_v46, 0 }
 0x1e5   :  { %3810 = vmatpush.bf16.msra.mxu2 %v5978_v37  ;;  %v5527_v37 = vld [vmem:[#allocation8 + $0x178] sm:$0xf0]  ;;  %3649 = vmatmul.bf16.vlgmr.msrb.gmra.mxu1 %v7151_v12 }
 0x1e6   :  { %v3534_v4 = vadd.f32 %v3533_v28, %v2556_v52  ;;  %v5530_v44 = vor.u32 %v6568_v34, %v5527_v37  ;;  %3727 = vmatmul.bf16.vlgmr.msra.gmra.mxu3 %v7151_v12  ;;  %3697 = vmatpush.bf16.msra.mxu1 %v5526_v42  ;;  %v5703_v52 = vld [vmem:[#allocation8 + $0x2d8] sm:$0xf0]  ;;  %v6101_v28 = vld [vmem:[#allocation8 + $0x5e8] sm:$0xf]  ;;  %v6708_v37 = vld [vmem:[#allocation8 + $0x5cc] sm:$0xf] }
 0x1e7   :  { %v3559_v51 = vpop.f32.mrf.mxu2  ;;  %v3535_v1 = vpop.f32.mrf.mxu0  ;;  %3738 = vmatpush.bf16.msrb.mxu0 %v5878_v45  ;;  %v5706_v27 = vor.u32 %v6612_v19, %v5703_v52  ;;  %v6102_v32 = vor.u32 %v6714_v15, %v6101_v28  ;;  %v6085_v34 = vld [vmem:[#allocation8 + $0x5c8] sm:$0xf]  ;;  %v6090_v42 = vor.u32 %v6708_v37, %v6087_v39  ;;  %v5674_v45 = vor.u32 %v6604_v40, %v5671_v41  ;;  %v6694_v52 = vld [vmem:[#allocation8 + $0x554] sm:$0xf0]  ;;  %v5847_v37 = vld [vmem:[#allocation8 + $0x3f8] sm:$0xf0] }
 0x1e8   :  { %v3547_v22 = vadd.f32 %v3546_v30, %v3534_v4  ;;  %v3548_v5 = vpop.f32.mrf.mxu1  ;;  %3775 = vmatpush.bf16.msrb.mxu3 %v5530_v44  ;;  %v6103_v4 = vld [vmem:[#allocation8 + $0x5f8] sm:$0xf0]  ;;  %v5478_v30 = vor.u32 %v6558_v58, %v5477_v23  ;;  %v6706_v44 = vld [vmem:[#allocation8 + $0x5b4] sm:$0xf0]  ;;  %v6700_v1 = vld [vmem:[#allocation8 + $0x58c] sm:$0xf] }
 0x1e9   :  { %3811 = vmatpush.bf16.msra.mxu2 %v5962_v60  ;;  %v6656_v60 = vld [vmem:[#allocation8 + $0x42c] sm:$0xf]  ;;  %v6106_v35 = vor.u32 %v6712_v29, %v6103_v4  ;;  %v6021_v19 = vld [vmem:[#allocation8 + $0x548] sm:$0xf]  ;;  %v6023_v58 = vld [vmem:[#allocation8 + $0x558] sm:$0xf0] }
 0x1ea   :  { %v7191_v63 = vadd.f32 %v3559_v51, %v3547_v22  ;;  %3698 = vmatpush.bf16.msra.mxu1 %v5510_v50  ;;  %v6710_v22 = vld [vmem:[#allocation8 + $0x5d4] sm:$0xf0]  ;;  %v5655_v51 = vld [vmem:[#allocation8 + $0x278] sm:$0xf0]  ;;  %v6692_v23 = vld [vmem:[#allocation8 + $0x54c] sm:$0xf] }
 0x1eb   :  { %3739 = vmatpush.bf16.msrb.mxu0 %v5862_v53  ;;  %v6086_v21 = vor.u32 %v6710_v22, %v6085_v34  ;;  %v5642_v53 = vor.u32 %v6596_v38, %v5639_v3  ;;  %v6688_v29 = vld [vmem:[#allocation8 + $0x52c] sm:$0xf]  ;;  %v6007_v4 = vld [vmem:[#allocation8 + $0x538] sm:$0xf0] }
 0x1ec   :  { %3776 = vmatpush.bf16.msrb.mxu3 %v5514_v6  ;;  %v6037_v6 = vld [vmem:[#allocation8 + $0x568] sm:$0xf]  ;;  %v5991_v22 = vld [vmem:[#allocation8 + $0x518] sm:$0xf0]  ;;  %v6628_v3 = vld [vmem:[#allocation8 + $0x34c] sm:$0xf] }
 0x1ed   :  { %3812 = vmatpush.bf16.msra.mxu2 %v5946_v10  ;;  %v5882_v10 = vor.u32 %v6656_v60, %v5879_v2  ;;  %v5658_v60 = vor.u32 %v6600_v49, %v5655_v51  ;;  %v6055_v2 = vld [vmem:[#allocation8 + $0x598] sm:$0xf0] }
 0x1ee   :  { %3699 = vmatpush.bf16.msra.mxu1 %v5494_v20  ;;  %3740 = vmatmul.bf16.vlgmr.msrb.gmra.mxu0 %v7173_v17  ;;  %v6058_v50 = vor.u32 %v6700_v1, %v6055_v2  ;;  %v5815_v49 = vld [vmem:[#allocation8 + $0x3b8] sm:$0xf0]  ;;  %v6721_v2 = vld [vmem:[#allocation11 + $0x30] sm:$0xff] }
 0x1ef   :  { %3784 = vmatpush.bf16.msra.mxu0 %v5722_v11  ;;  %v5818_v51 = vor.u32 %v6640_v47, %v5815_v49  ;;  %v5783_v1 = vld [vmem:[#allocation8 + $0x378] sm:$0xf0] }
 0x1f0   :  { %3777 = vmatpush.bf16.msrb.mxu3 %v5498_v48  ;;  %v5626_v48 = vor.u32 %v6592_v13, %v5623_v61  ;;  %v6718_v13 = vld [vmem:[#allocation11 + $0x18] sm:$0xff] }
 0x1f1   :  { %3813 = vmatpush.bf16.msra.mxu2 %v5930_v0  ;;  %v3561_v0 = vpop.f32.mrf.mxu2  ;;  %v6734_v47 = vld [vmem:[#allocation11 + $0x98] sm:$0xff] }
 0x1f2   :  { %3700 = vmatpush.bf16.msra.mxu1 %v5478_v30  ;;  %v5607_v0 = vld [vmem:[#allocation8 + $0x218] sm:$0xf0]  ;;  %v2557_v30 = vperm.slane %v7188_v46, 1 }
 0x1f3   :  { %3785 = vmatpush.bf16.msra.mxu0 %v5706_v27  ;;  %v6005_v27 = vld [vmem:[#allocation8 + $0x528] sm:$0xf]  ;;  %v5610_v28 = vor.u32 %v6588_v24, %v5607_v0  ;;  %v6728_v24 = vld [vmem:[#allocation11 + $0x68] sm:$0xff] }
 0x1f4   :  { %3778 = vmatpush.bf16.msrb.mxu3 %v5482_v33  ;;  %v5989_v33 = vld [vmem:[#allocation8 + $0x508] sm:$0xf] }
 0x1f5   :  { %3814 = vmatpush.bf16.msra.mxu2 %v5914_v54  ;;  %v5690_v54 = vor.u32 %v6608_v18, %v5687_v31  ;;  %3701 = vmatmul.bf16.vlgmr.msra.gmra.mxu1 %v7144_v55  ;;  %v6006_v18 = vor.u32 %v6690_v8, %v6005_v27  ;;  %v6010_v31 = vor.u32 %v6688_v29, %v6007_v4  ;;  %v6727_v0 = vld [vmem:[#allocation11 + $0x60] sm:$0xff]  ;;  %v6725_v8 = vld [vmem:[#allocation11 + $0x50] sm:$0xff] }
 0x1f6   :  { %3745 = vmatpush.bf16.msrb.mxu1 %v6102_v32  ;;  %v6686_v32 = vld [vmem:[#allocation8 + $0x514] sm:$0xf0]  ;;  %v6723_v29 = vld [vmem:[#allocation11 + $0x40] sm:$0xff] }
 0x1f7   :  { %3786 = vmatpush.bf16.msra.mxu0 %v5690_v54  ;;  %3779 = vmatmul.bf16.vlgmr.msrb.gmra.mxu3 %v7144_v55  ;;  %v6698_v55 = vld [vmem:[#allocation8 + $0x574] sm:$0xf0]  ;;  %v6648_v54 = vld [vmem:[#allocation8 + $0x3ec] sm:$0xf]  ;;  %v5990_v39 = vor.u32 %v6686_v32, %v5989_v33 }
 0x1f8   :  { %3823 = vmatpush.bf16.msra.mxu3 %v6106_v35  ;;  %v3572_v7 = vpop.f32.mrf.mxu3  ;;  %v6038_v14 = vor.u32 %v6698_v55, %v6037_v6  ;;  %v6684_v35 = vld [vmem:[#allocation8 + $0x50c] sm:$0xf]  ;;  %v5751_v55 = vld [vmem:[#allocation8 + $0x338] sm:$0xf0] }
 0x1f9   :  { %3815 = vmatpush.bf16.msra.mxu2 %v5898_v57  ;;  %v6070_v57 = vor.u32 %v6706_v44, %v6069_v43  ;;  %v7200_v11 = vadd.f32 %v3572_v7, %v7191_v63  ;;  %v6026_v63 = vor.u32 %v6692_v23, %v6023_v58  ;;  %v5994_v41 = vor.u32 %v6684_v35, %v5991_v22  ;;  %v6644_v43 = vld [vmem:[#allocation8 + $0x3cc] sm:$0xf]  ;;  %v5831_v44 = vld [vmem:[#allocation8 + $0x3d8] sm:$0xf0]  ;;  %v6715_v58 = vld [vmem:[#allocation11] sm:$0xff] }
 0x1fa   :  { %3746 = vmatpush.bf16.msrb.mxu1 %v6086_v21  ;;  %v5850_v21 = vor.u32 %v6648_v54, %v5847_v37  ;;  %v5834_v9 = vor.u32 %v6644_v43, %v5831_v44  ;;  %v6624_v6 = vld [vmem:[#allocation8 + $0x32c] sm:$0xf]  ;;  %v6735_v43 = vld [vmem:[#allocation11 + $0xa0] sm:$0xff] }
 0x1fb   :  { %3787 = vmatpush.bf16.msra.mxu0 %v5674_v45  ;;  %v5754_v7 = vor.u32 %v6624_v6, %v5751_v55  ;;  %v6745_v6 = vld [vmem:[#allocation11 + $0xf0] sm:$0xff] }
 0x1fc   :  { %3824 = vmatpush.bf16.msra.mxu3 %v6090_v42 }
 0x1fd   :  { %3816 = vmatpush.bf16.msra.mxu2 %v5882_v10  ;;  %v6039_v10 = vld [vmem:[#allocation8 + $0x578] sm:$0xf0] }
 0x1fe   :  { %3747 = vmatpush.bf16.msrb.mxu1 %v6070_v57  ;;  %v6042_v16 = vor.u32 %v6696_v62, %v6039_v10  ;;  %v6636_v57 = vld [vmem:[#allocation8 + $0x38c] sm:$0xf]  ;;  %v5735_v10 = vld [vmem:[#allocation8 + $0x318] sm:$0xf0] }
 0x1ff   :  { %3788 = vmatpush.bf16.msra.mxu0 %v5658_v60  ;;  %v6632_v60 = vld [vmem:[#allocation8 + $0x36c] sm:$0xf] }
 0x200   :  { %3825 = vmatpush.bf16.msra.mxu3 %v6074_v56  ;;  %v3574_v15 = vpop.f32.mrf.mxu3  ;;  %v5799_v56 = vld [vmem:[#allocation8 + $0x398] sm:$0xf0]  ;;  %v5786_v38 = vor.u32 %v6632_v60, %v5783_v1  ;;  %v6620_v62 = vld [vmem:[#allocation8 + $0x30c] sm:$0xf] }
 0x201   :  { %3817 = vmatpush.bf16.msra.mxu2 %v5866_v26  ;;  %v6022_v26 = vor.u32 %v6694_v52, %v6021_v19  ;;  %v5738_v61 = vor.u32 %v6620_v62, %v5735_v10  ;;  %v6716_v52 = vld [vmem:[#allocation11 + $0x8] sm:$0xff] }
 0x202   :  { %v6724_v15 = vld [vmem:[#allocation11 + $0x48] sm:$0xff] }
 0x203   :  { %3789 = vmatpush.bf16.msra.mxu0 %v5642_v53  ;;  %v6719_v53 = vld [vmem:[#allocation11 + $0x20] sm:$0xff]  ;;  %v6732_v1 = vld [vmem:[#allocation11 + $0x88] sm:$0xff] }
 0x204   :  { %3818 = vmatmul.bf16.vlgmr.msra.gmra.mxu2 %v7173_v17  ;;  %v6702_v17 = vld [vmem:[#allocation8 + $0x594] sm:$0xf0]  ;;  %3826 = vmatpush.bf16.msra.mxu3 %v6058_v50  ;;  %v6720_v50 = vld [vmem:[#allocation11 + $0x28] sm:$0xff] }
 0x205   :  { %v6054_v5 = vor.u32 %v6702_v17, %v6053_v59  ;;  %v6722_v59 = vld [vmem:[#allocation11 + $0x38] sm:$0xff]  ;;  %v5802_v17 = vor.u32 %v6636_v57, %v5799_v56 }
 0x207   :  { %3748 = vmatpush.bf16.msrb.mxu1 %v6054_v5  ;;  %v3611_v20 = vpop.f32.mrf.mxu2  ;;  %3790 = vmatpush.bf16.msra.mxu0 %v5626_v48  ;;  %v5767_v5 = vld [vmem:[#allocation8 + $0x358] sm:$0xf0] }
 0x208   :  { %3827 = vmatpush.bf16.msra.mxu3 %v6042_v16  ;;  %v3612_v40 = vadd.f32 %v3611_v20, %v2557_v30  ;;  %v3624_v42 = vpop.f32.mrf.mxu3  ;;  %v6730_v16 = vld [vmem:[#allocation11 + $0x78] sm:$0xff]  ;;  %v6729_v20 = vld [vmem:[#allocation11 + $0x70] sm:$0xff] }
 0x20a   :  { %v7204_v45 = vadd.f32 %v3624_v42, %v3612_v40  ;;  %v6737_v40 = vld [vmem:[#allocation11 + $0xb0] sm:$0xff] }
 0x20b   :  { %3749 = vmatpush.bf16.msrb.mxu1 %v6038_v14  ;;  %3791 = vmatpush.bf16.msra.mxu0 %v5610_v28  ;;  %v6717_v14 = vld [vmem:[#allocation11 + $0x10] sm:$0xff] }
 0x20c   :  { %3828 = vmatpush.bf16.msra.mxu3 %v6026_v63  ;;  %v6726_v63 = vld [vmem:[#allocation11 + $0x58] sm:$0xff] }
 0x20e   :  { %3792 = vmatmul.bf16.vlgmr.msra.gmra.mxu0 %v7140_v36 }
 0x20f   :  { %3750 = vmatpush.bf16.msrb.mxu1 %v6022_v26  ;;  %v3613_v34 = vpop.f32.mrf.mxu2  ;;  %4104 = vmatpush.bf16.msrb.mxu0 %v6722_v59  ;;  %v6733_v59 = vld [vmem:[#allocation11 + $0x90] sm:$0xff] }
 0x210   :  { %3829 = vmatpush.bf16.msra.mxu3 %v6010_v31  ;;  %v3626_v36 = vpop.f32.mrf.mxu3  ;;  %v6738_v34 = vld [vmem:[#allocation11 + $0xb8] sm:$0xff] }
 0x211   :  { %4130 = vmatpush.bf16.msrb.mxu2 %v6738_v34 }
 0x213   :  { %3751 = vmatpush.bf16.msrb.mxu1 %v6006_v18  ;;  %4105 = vmatpush.bf16.msrb.mxu0 %v6721_v2 }
 0x214   :  { %3830 = vmatpush.bf16.msra.mxu3 %v5994_v41  ;;  %v6736_v41 = vld [vmem:[#allocation11 + $0xa8] sm:$0xff] }
 0x215   :  { %4131 = vmatpush.bf16.msrb.mxu2 %v6737_v40 }
 0x217   :  { %3752 = vmatpush.bf16.msrb.mxu1 %v5990_v39  ;;  %3831 = vmatmul.bf16.vlgmr.msra.gmra.mxu3 %v7183_v25 }
 0x218   :  { %4106 = vmatpush.bf16.msrb.mxu0 %v6720_v50  ;;  %v6746_v50 = vld [vmem:[#allocation11 + $0xf8] sm:$0xff] }
 0x219   :  { %4132 = vmatpush.bf16.msrb.mxu2 %v6736_v41  ;;  %4143 = vmatpush.bf16.msrb.mxu3 %v6746_v50  ;;  %v6761_v41 = vld [vmem:[#allocation13] ss:$0 sm:$0xff] }
 0x21a   :  { %3753 = vmatmul.bf16.vlgmr.msrb.gmra.mxu1 %v7183_v25  ;;  %v5770_v25 = vor.u32 %v6628_v3, %v5767_v5 }
 0x21b   :  { %3797 = vmatpush.bf16.msra.mxu1 %v5850_v21 }
 0x21c   :  { %4107 = vmatpush.bf16.msrb.mxu0 %v6719_v53  ;;  %v2558_v53 = vperm.slane %v7188_v46, 2 }
 0x21d   :  { %4133 = vmatpush.bf16.msrb.mxu2 %v6735_v43  ;;  %4144 = vmatpush.bf16.msrb.mxu3 %v6745_v6 }
 0x21f   :  { %3798 = vmatpush.bf16.msra.mxu1 %v5834_v9 }
 0x220   :  { %4108 = vmatpush.bf16.msrb.mxu0 %v6718_v13 }
 0x221   :  { %4134 = vmatpush.bf16.msrb.mxu2 %v6734_v47 }
 0x223   :  { %3799 = vmatpush.bf16.msra.mxu1 %v5818_v51 }
 0x224   :  { %4109 = vmatpush.bf16.msrb.mxu0 %v6717_v14 }
 0x225   :  { %4135 = vmatpush.bf16.msrb.mxu2 %v6733_v59 }
 0x227   :  { %3800 = vmatpush.bf16.msra.mxu1 %v5802_v17 }
 0x228   :  { %4110 = vmatpush.bf16.msrb.mxu0 %v6716_v52 }
 0x229   :  { %4136 = vmatpush.bf16.msrb.mxu2 %v6732_v1 }
 0x22a   :  { %v3585_v19 = vpop.f32.mrf.mxu0 }
 0x22b   :  { %3801 = vmatpush.bf16.msra.mxu1 %v5786_v38  ;;  %v3586_v18 = vadd.f32 %v3585_v19, %v7200_v11  ;;  %v6731_v38 = vld [vmem:[#allocation11 + $0x80] sm:$0xff] }
 0x22c   :  { %4111 = vmatpush.bf16.msrb.mxu0 %v6715_v58 }
 0x22d   :  { %4137 = vmatpush.bf16.msrb.mxu2 %v6731_v38 }
 0x22f   :  { %3802 = vmatpush.bf16.msra.mxu1 %v5770_v25 }
 0x231   :  { %v3663_v48 = vpop.f32.mrf.mxu2 }
 0x232   :  { %v3587_v23 = vpop.f32.mrf.mxu0 }
 0x233   :  { %3803 = vmatpush.bf16.msra.mxu1 %v5754_v7  ;;  %v6744_v7 = vld [vmem:[#allocation11 + $0xe8] sm:$0xff] }
 0x234   :  { %4145 = vmatpush.bf16.msrb.mxu3 %v6744_v7 }
 0x237   :  { %3804 = vmatpush.bf16.msra.mxu1 %v5738_v61  ;;  %v6743_v61 = vld [vmem:[#allocation11 + $0xe0] sm:$0xff] }
 0x238   :  { %4146 = vmatpush.bf16.msrb.mxu3 %v6743_v61 }
 0x239   :  { %v3665_v26 = vpop.f32.mrf.mxu2 }
 0x23a   :  { %3805 = vmatmul.bf16.vlgmr.msra.gmra.mxu1 %v7151_v12  ;;  %v3637_v27 = vpop.f32.mrf.mxu0 }
 0x23b   :  { %4117 = vmatpush.bf16.msrb.mxu1 %v6730_v16  ;;  %v3638_v42 = vadd.f32 %v3637_v27, %v7204_v45  ;;  %v6742_v16 = vld [vmem:[#allocation11 + $0xd8] sm:$0xff]  ;;  %v6739_v27 = vld [vmem:[#allocation11 + $0xc0] sm:$0xff] }
 0x23c   :  { %4147 = vmatpush.bf16.msrb.mxu3 %v6742_v16 }
 0x23f   :  { %4118 = vmatpush.bf16.msrb.mxu1 %v6729_v20 }
 0x242   :  { %v3639_v12 = vpop.f32.mrf.mxu0 }
 0x243   :  { %4119 = vmatpush.bf16.msrb.mxu1 %v6728_v24  ;;  %v6740_v24 = vld [vmem:[#allocation11 + $0xc8] sm:$0xff] }
 0x247   :  { %4120 = vmatpush.bf16.msrb.mxu1 %v6727_v0  ;;  %v7209_v28 = vpop.f32.mrf.mxu2 }
 0x24b   :  { %4121 = vmatpush.bf16.msrb.mxu1 %v6726_v63  ;;  %v3689_v30 = vpop.f32.mrf.mxu0 }
 0x24c   :  { %v3690_v10 = vadd.f32 %v3689_v30, %v2558_v53 }
 0x24f   :  { %4122 = vmatpush.bf16.msrb.mxu1 %v6725_v8  ;;  %v3717_v4 = vpop.f32.mrf.mxu2 }
 0x252   :  { %v3598_v31 = vpop.f32.mrf.mxu1 }
 0x253   :  { %4123 = vmatpush.bf16.msrb.mxu1 %v6724_v15  ;;  %v3599_v33 = vadd.f32 %v3598_v31, %v3586_v18  ;;  %v3691_v35 = vpop.f32.mrf.mxu0 }
 0x255   :  { %v3836_v32 = vmax.f32 %v3599_v33, 0.0 }
 0x257   :  { %4124 = vmatpush.bf16.msrb.mxu1 %v6723_v29  ;;  %v3840_v22 = vpack.c.bf16 %v3836_v32, %v3836_v32 }
 0x259   :  { %v3676_v54 = vpop.f32.mrf.mxu3  ;;  %4112 = vmatmul.bf16.vlgmr.msrb.gmra.mxu0 %v3840_v22 }
 0x25a   :  { %v3600_v39 = vpop.f32.mrf.mxu1 }
 0x261   :  { %v3678_v21 = vpop.f32.mrf.mxu3 }
 0x262   :  { %v3650_v44 = vpop.f32.mrf.mxu1 }
 0x263   :  { %v3651_v9 = vadd.f32 %v3650_v44, %v3638_v42 }
 0x265   :  { %v3664_v49 = vadd.f32 %v3663_v48, %v3651_v9  ;;  %v6741_v48 = vld [vmem:[#allocation11 + $0xd0] sm:$0xff] }
 0x266   :  { %4148 = vmatpush.bf16.msrb.mxu3 %v6741_v48 }
 0x267   :  { %v7212_v37 = vpop.f32.mrf.mxu2  ;;  %v3677_v51 = vadd.f32 %v3676_v54, %v3664_v49 }
 0x269   :  { %v3728_v36 = vpop.f32.mrf.mxu3  ;;  %v3837_v57 = vmax.f32 %v3677_v51, 0.0 }
 0x26a   :  { %v3652_v56 = vpop.f32.mrf.mxu1  ;;  %4149 = vmatpush.bf16.msrb.mxu3 %v6740_v24 }
 0x26b   :  { %v3841_v17 = vpack.c.bf16 %v3837_v57, %v3837_v57  ;;  %v3741_v60 = vpop.f32.mrf.mxu0 }
 0x26d   :  { %4125 = vmatmul.bf16.vlgmr.msrb.gmra.mxu1 %v3841_v17 }
 0x26e   :  { %4150 = vmatpush.bf16.msrb.mxu3 %v6739_v27 }
 0x26f   :  { %v3769_v11 = vpop.f32.mrf.mxu2 }
 0x271   :  { %v3730_v2 = vpop.f32.mrf.mxu3 }
 0x272   :  { %v3702_v45 = vpop.f32.mrf.mxu1 }
 0x273   :  { %v3743_v3 = vpop.f32.mrf.mxu0  ;;  %v3703_v14 = vadd.f32 %v3702_v45, %v3690_v10 }
 0x275   :  { %v3716_v19 = vadd.f32 %v7209_v28, %v3703_v14  ;;  %v2559_v28 = vperm.slane %v7188_v46, 3 }
 0x277   :  { %v3729_v20 = vadd.f32 %v3728_v36, %v3716_v19  ;;  %v3768_v4 = vadd.f32 %v7212_v37, %v2559_v28 }
 0x279   :  { %v3742_v23 = vadd.f32 %v3741_v60, %v3729_v20 }
 0x27a   :  { %v3780_v25 = vpop.f32.mrf.mxu3  ;;  %v3704_v55 = vpop.f32.mrf.mxu1 }
 0x27b   :  { %v3781_v30 = vadd.f32 %v3780_v25, %v3768_v4 }
 0x282   :  { %v3782_v13 = vpop.f32.mrf.mxu3 }
 0x287   :  { %v3819_v5 = vpop.f32.mrf.mxu2 }
 0x28b   :  { %v3793_v52 = vpop.f32.mrf.mxu0 }
 0x28c   :  { %v3794_v18 = vadd.f32 %v3793_v52, %v3781_v30 }
 0x28f   :  { %v3821_v62 = vpop.f32.mrf.mxu2 }
 0x293   :  { %v3795_v26 = vpop.f32.mrf.mxu0 }
 0x297   :  { %v3754_v58 = vpop.f32.mrf.mxu1 }
 0x298   :  { %v3755_v0 = vadd.f32 %v3754_v58, %v3742_v23 }
 0x29a   :  { %v3838_v63 = vmax.f32 %v3755_v0, 0.0  ;;  %v3832_v12 = vpop.f32.mrf.mxu3 }
 0x29c   :  { %v3842_v8 = vpack.c.bf16 %v3838_v63, %v3838_v63 }
 0x29e   :  { %4138 = vmatmul.bf16.vlgmr.msrb.gmra.mxu2 %v3842_v8 }
 0x29f   :  { %v3756_v15 = vpop.f32.mrf.mxu1 }
 0x2a2   :  { %v3834_v29 = vpop.f32.mrf.mxu3 }
 0x2b7   :  { %v3806_v31 = vpop.f32.mrf.mxu1 }
 0x2b8   :  { %v3807_v33 = vadd.f32 %v3806_v31, %v3794_v18 }
 0x2ba   :  { %v3820_v32 = vadd.f32 %v3819_v5, %v3807_v33 }
 0x2bc   :  { %v3833_v35 = vadd.f32 %v3832_v12, %v3820_v32 }
 0x2be   :  { %v3839_v34 = vmax.f32 %v3833_v35, 0.0 }
 0x2bf   :  { %v3808_v22 = vpop.f32.mrf.mxu1 }
 0x2c0   :  { %v3843_v54 = vpack.c.bf16 %v3839_v34, %v3839_v34 }
 0x2c2   :  { %4151 = vmatmul.bf16.vlgmr.msrb.gmra.mxu3 %v3843_v54 }
 0x2d6   :  { %v4113_v39 = vpop.f32.mrf.mxu0 }
 0x2d7   :  { %v4114_v21 = vadd.f32 %v6761_v41, %v4113_v39 }
 0x2de   :  { %v4115_v40 = vpop.f32.mrf.mxu0 }
 0x2ea   :  { %v4126_v42 = vpop.f32.mrf.mxu1 }
 0x2eb   :  { %v4127_v11 = vadd.f32 %v4126_v42, %v4114_v21 }
 0x2f2   :  { %v4128_v43 = vpop.f32.mrf.mxu1 }
 0x321   :  { %v4139_v46 = vpop.f32.mrf.mxu2 }
 0x322   :  { %v4140_v37 = vadd.f32 %v4139_v46, %v4127_v11 }
 0x329   :  { %v4141_v44 = vpop.f32.mrf.mxu2 }
 0x345   :  { %v4152_v9 = vpop.f32.mrf.mxu3 }
 0x346   :  { %v4153_v47 = vadd.f32 %v4152_v9, %v4140_v37 }
 0x348   :  { %4156 = vmax.xlane.f32.xlu0 %v4153_v47 }
 0x34d   :  { %v4154_v49 = vpop.f32.mrf.mxu3 }
 0x3bb   :  { %v4157_v51 = vpop.xlane.xlu0 %4156 }
 0x3bc   :  { %v4158_v36 = vsub.f32 %v4153_v47, %v4157_v51 }
 0x3be   :  { %v4159_v57 = vmul.f32 1.442695, %v4158_v36 }
 0x3c0   :  { %6774 = vpow2.f32 %v4159_v57 }
 0x3c6   :  { %v6775_v56 = vpop.eup %6774 }
 0x3c7   :  { %4161 = vadd.xlane.f32.xlu0 %v6775_v56 }
 0x43a   :  { %v4162_v59 = vpop.xlane.xlu0 %4161 }
 0x43b   :  { %6776 = vlog2.f32 %v4162_v59 }
 0x441   :  { %v6777_v17 = vpop.eup %6776 }
 0x442   :  { %v4164_v60 = vmul.f32 0.6931472, %v6777_v17 }
 0x444   :  { %v4165_v1 = vsub.f32 %v4158_v36, %v4164_v60 }
 0x446   :  { %4166 = vst [vmem:[#allocation14] sm:$0xff] %v4165_v1 }
 0x447   :  { %4177 = dma.vmem_to_hbm [thread:$0]  %s4173_s6, 128, %s4175_s15, [#allocation4]  }
 0x448   :  { %6979 = dma.done.wait [#allocation4], 128  }
 0x449   :  { %6980 = vsyncadd [#allocation4], 4294967168 }
 0x44a   :  { %4182 = vsyncpa [#allocation3], 1 }
 0x44b   :  { %4183 = vsyncpa [#allocation6], 1 }
 0x44c   :  { %4184 = vsyncpa [#allocation9], 1 }
 0x44d   :  { %4185 = vsyncpa [#allocation12], 1 }
 0x44e   :  { %4186 = vsyncpa [#allocation4], 1 }

</bundles_post_ra>
